<compile_context>
chip_gen: v5e
topology: v5e:2x2
jax: 0.10.0
libtpu: 0.0.40
codegen_flags: <defaults>
</compile_context>

<pallas_src>
import math
import jax
import jax.numpy as jnp
from jax.experimental import pallas as pl
from jax.experimental.pallas import tpu as pltpu


LATENT = 100
LATENT_PAD = 128   # 100 -> 128 (lane-aligned contraction dim for layer 1)
OUT = 784          # 28 * 28 (unpadded; out block uses the full array dim)


def generator_kernel(x_ref,
                     w1_ref, b1_ref,
                     w2_ref, b2_ref,
                     w3_ref, b3_ref,
                     w4_ref, b4_ref,
                     o_ref):
    # One batch tile per grid step; weights/biases have constant index_maps so
    # they stay VMEM-resident across the whole batch grid.
    x = x_ref[...]                                                 # bf16 (tm, 128)

    h1 = jnp.dot(x, w1_ref[...], preferred_element_type=jnp.float32) + b1_ref[...]
    h1 = jnp.maximum(h1, 0.0).astype(jnp.bfloat16)                 # (tm, 256)

    h2 = jnp.dot(h1, w2_ref[...], preferred_element_type=jnp.float32) + b2_ref[...]
    h2 = jnp.maximum(h2, 0.0).astype(jnp.bfloat16)                 # (tm, 512)

    h3 = jnp.dot(h2, w3_ref[...], preferred_element_type=jnp.float32) + b3_ref[...]
    h3 = jnp.maximum(h3, 0.0).astype(jnp.bfloat16)                 # (tm, 1024)

    h4 = jnp.dot(h3, w4_ref[...], preferred_element_type=jnp.float32) + b4_ref[...]
    o_ref[...] = jnp.tanh(h4)                                      # f32 (tm, 784)


def init_generator_params(key):
    """PyTorch-style init: U(-1/sqrt(fan_in), 1/sqrt(fan_in)).

    Weights are (in_features, out_features) -- transposed relative to
    nn.Linear storage -- so the kernel computes x @ W + b.
    """
    dims = [(100, 256), (256, 512), (512, 1024), (1024, 784)]
    params = []
    for (fan_in, fan_out) in dims:
        key, wk, bk = jax.random.split(key, 3)
        bound = 1.0 / math.sqrt(fan_in)
        w = jax.random.uniform(wk, (fan_in, fan_out), jnp.float32, -bound, bound)
        b = jax.random.uniform(bk, (1, fan_out), jnp.float32, -bound, bound)
        params.append((w, b))
    return params


def prepare_params(params):
    """Pad layer-1 contraction dim to 128 and cast weights to bf16."""
    (w1, b1), (w2, b2), (w3, b3), (w4, b4) = params
    w1p = jnp.zeros((LATENT_PAD, 256), jnp.float32).at[:LATENT, :].set(w1)
    return (
        (w1p.astype(jnp.bfloat16), b1),
        (w2.astype(jnp.bfloat16), b2),
        (w3.astype(jnp.bfloat16), b3),
        (w4.astype(jnp.bfloat16), b4),
    )


def _choose_batch_tile(B, batch_tile):
    if B >= batch_tile:
        return batch_tile
    return max(8, ((B + 7) // 8) * 8)


def generator_forward(x, prepared, *, batch_tile=256):
    """x: (B, 100) f32 latent -> (B, 1, 28, 28) f32 image in [-1, 1]."""
    B = x.shape[0]
    (w1, b1), (w2, b2), (w3, b3), (w4, b4) = prepared

    tm = _choose_batch_tile(B, batch_tile)
    B_pad = ((B + tm - 1) // tm) * tm

    # Pad latent to (B_pad, 128) directly in bf16 (zero cols x zero weight rows
    # contribute nothing; padded rows are dropped after the kernel).
    xp = (jnp.zeros((B_pad, LATENT_PAD), jnp.bfloat16)
          .at[:B, :LATENT].set(x.astype(jnp.bfloat16)))

    grid = (B_pad // tm,)

    const = lambda i: (0, 0)   # weights/biases: same block every grid step
    in_specs = [
        pl.BlockSpec((tm, LATENT_PAD), lambda i: (i, 0)),
        pl.BlockSpec((LATENT_PAD, 256), const), pl.BlockSpec((1, 256), const),
        pl.BlockSpec((256, 512), const),        pl.BlockSpec((1, 512), const),
        pl.BlockSpec((512, 1024), const),       pl.BlockSpec((1, 1024), const),
        pl.BlockSpec((1024, OUT), const),       pl.BlockSpec((1, OUT), const),
    ]
    out_spec = pl.BlockSpec((tm, OUT), lambda i: (i, 0))

    out = pl.pallas_call(
        generator_kernel,
        out_shape=jax.ShapeDtypeStruct((B_pad, OUT), jnp.float32),
        grid=grid,
        in_specs=in_specs,
        out_specs=out_spec,
        compiler_params=pltpu.CompilerParams(
            dimension_semantics=("parallel",),
            vmem_limit_bytes=32 * 1024 * 1024,
        ),
    )(xp, w1, b1, w2, b2, w3, b3, w4, b4)

    if B_pad != B:
        out = out[:B]                        # leading-dim slice only
    # Matches output.view(B, 1, 28, 28)
    return out.reshape(B, 1, 28, 28)


def reference_forward(x, prepared):
    """Plain-JAX reference with the same dtype flow as the kernel."""
    B = x.shape[0]
    (w1, b1), (w2, b2), (w3, b3), (w4, b4) = prepared
    h = (jnp.zeros((B, LATENT_PAD), jnp.bfloat16)
         .at[:, :LATENT].set(x.astype(jnp.bfloat16)))
    h = jnp.maximum(jnp.dot(h, w1, preferred_element_type=jnp.float32) + b1, 0.0)
    h = jnp.maximum(jnp.dot(h.astype(jnp.bfloat16), w2,
                            preferred_element_type=jnp.float32) + b2, 0.0)
    h = jnp.maximum(jnp.dot(h.astype(jnp.bfloat16), w3,
                            preferred_element_type=jnp.float32) + b3, 0.0)
    h = jnp.tanh(jnp.dot(h.astype(jnp.bfloat16), w4,
                         preferred_element_type=jnp.float32) + b4)
    return h.reshape(B, 1, 28, 28)


if __name__ == "__main__":
    key = jax.random.PRNGKey(0)
    pkey, xkey = jax.random.split(key)

    params = init_generator_params(pkey)
    prepared = prepare_params(params)

    B = 8  # small batch
    x = jax.random.normal(xkey, (B, 100), dtype=jnp.float32)  # latent noise

    img = generator_forward(x, prepared)
    jax.block_until_ready(img)

    assert img.shape == (B, 1, 28, 28), img.shape
    assert img.dtype == jnp.float32
    # tanh output must be in [-1, 1]
    assert bool(jnp.all(jnp.abs(img) <= 1.0 + 1e-6))

    # Kernel vs same-dtype JAX reference
    ref = reference_forward(x, prepared)
    assert bool(jnp.allclose(img, ref, atol=1e-2, rtol=0.0)), \
        float(jnp.max(jnp.abs(img - ref)))

    # Exercise a multi-step batch grid as well (pipelined / multi-TC path).
    B2 = 512
    x2 = jax.random.normal(jax.random.PRNGKey(1), (B2, 100), dtype=jnp.float32)
    img2 = generator_forward(x2, prepared, batch_tile=256)
    jax.block_until_ready(img2)
    assert img2.shape == (B2, 1, 28, 28)
    ref2 = reference_forward(x2, prepared)
    assert bool(jnp.allclose(img2, ref2, atol=1e-2, rtol=0.0)), \
        float(jnp.max(jnp.abs(img2 - ref2)))

    print("KERNEL_OK")
</pallas_src>

<mosaic_0001>
module attributes {stable_mosaic.version = 11 : i64} {
  func.func @generator_kernel(%arg0: i32, %arg1: memref<8x128xbf16, #tpu.memory_space<vmem>>, %arg2: memref<128x256xbf16, #tpu.memory_space<vmem>>, %arg3: memref<1x256xf32, #tpu.memory_space<vmem>>, %arg4: memref<256x512xbf16, #tpu.memory_space<vmem>>, %arg5: memref<1x512xf32, #tpu.memory_space<vmem>>, %arg6: memref<512x1024xbf16, #tpu.memory_space<vmem>>, %arg7: memref<1x1024xf32, #tpu.memory_space<vmem>>, %arg8: memref<1024x784xbf16, #tpu.memory_space<vmem>>, %arg9: memref<1x784xf32, #tpu.memory_space<vmem>>, %arg10: memref<8x784xf32, #tpu.memory_space<vmem>>) attributes {dimension_semantics = [#tpu.dimension_semantics<parallel>], iteration_bounds = array<i64: 1>, scalar_prefetch = 0 : i64, scratch_operands = 0 : i64, tpu.core_type = #tpu.core_type<tc>, window_params = [{transform_indices = @transform_0, window_bounds = array<i64: 8, 128>}, {pipeline_mode = #tpu.pipeline_mode<synchronous>, transform_indices = @transform_1, window_bounds = array<i64: 128, 256>}, {pipeline_mode = #tpu.pipeline_mode<synchronous>, transform_indices = @transform_2, window_bounds = array<i64: 1, 256>}, {pipeline_mode = #tpu.pipeline_mode<synchronous>, transform_indices = @transform_3, window_bounds = array<i64: 256, 512>}, {pipeline_mode = #tpu.pipeline_mode<synchronous>, transform_indices = @transform_4, window_bounds = array<i64: 1, 512>}, {pipeline_mode = #tpu.pipeline_mode<synchronous>, transform_indices = @transform_5, window_bounds = array<i64: 512, 1024>}, {pipeline_mode = #tpu.pipeline_mode<synchronous>, transform_indices = @transform_6, window_bounds = array<i64: 1, 1024>}, {pipeline_mode = #tpu.pipeline_mode<synchronous>, transform_indices = @transform_7, window_bounds = array<i64: 1024, 784>}, {pipeline_mode = #tpu.pipeline_mode<synchronous>, transform_indices = @transform_8, window_bounds = array<i64: 1, 784>}, {transform_indices = @transform_9, window_bounds = array<i64: 8, 784>}]} {
    %c0 = arith.constant 0 : index
    %c0_0 = arith.constant 0 : index
    %0 = vector.load %arg1[%c0, %c0_0] : memref<8x128xbf16, #tpu.memory_space<vmem>>, vector<8x128xbf16>
    %c0_1 = arith.constant 0 : index
    %c0_2 = arith.constant 0 : index
    %1 = vector.load %arg2[%c0_1, %c0_2] : memref<128x256xbf16, #tpu.memory_space<vmem>>, vector<128x256xbf16>
    %cst = arith.constant dense<0.000000e+00> : vector<8x256xf32>
    %2 = tpu.matmul %0, %1, %cst {dimension_numbers = #tpu.dot_dimension_numbers<[1], [0], [0], [1], [0, 0, 1, 1], [], []>} : vector<8x128xbf16>, vector<128x256xbf16>, vector<8x256xf32> -> vector<8x256xf32>
    %c0_3 = arith.constant 0 : index
    %c0_4 = arith.constant 0 : index
    %3 = vector.load %arg3[%c0_3, %c0_4] : memref<1x256xf32, #tpu.memory_space<vmem>>, vector<1x256xf32>
    %4 = vector.broadcast %3 : vector<1x256xf32> to vector<8x256xf32>
    %5 = arith.addf %2, %4 : vector<8x256xf32>
    %cst_5 = arith.constant 0.000000e+00 : f32
    %6 = vector.broadcast %cst_5 : f32 to vector<8x256xf32>
    %7 = arith.maximumf %5, %6 : vector<8x256xf32>
    %8 = arith.truncf %7 : vector<8x256xf32> to vector<8x256xbf16>
    %c0_6 = arith.constant 0 : index
    %c0_7 = arith.constant 0 : index
    %9 = vector.load %arg4[%c0_6, %c0_7] : memref<256x512xbf16, #tpu.memory_space<vmem>>, vector<256x512xbf16>
    %cst_8 = arith.constant dense<0.000000e+00> : vector<8x512xf32>
    %10 = tpu.matmul %8, %9, %cst_8 {dimension_numbers = #tpu.dot_dimension_numbers<[1], [0], [0], [1], [0, 0, 1, 1], [], []>} : vector<8x256xbf16>, vector<256x512xbf16>, vector<8x512xf32> -> vector<8x512xf32>
    %c0_9 = arith.constant 0 : index
    %c0_10 = arith.constant 0 : index
    %11 = vector.load %arg5[%c0_9, %c0_10] : memref<1x512xf32, #tpu.memory_space<vmem>>, vector<1x512xf32>
    %12 = vector.broadcast %11 : vector<1x512xf32> to vector<8x512xf32>
    %13 = arith.addf %10, %12 : vector<8x512xf32>
    %cst_11 = arith.constant 0.000000e+00 : f32
    %14 = vector.broadcast %cst_11 : f32 to vector<8x512xf32>
    %15 = arith.maximumf %13, %14 : vector<8x512xf32>
    %16 = arith.truncf %15 : vector<8x512xf32> to vector<8x512xbf16>
    %c0_12 = arith.constant 0 : index
    %c0_13 = arith.constant 0 : index
    %17 = vector.load %arg6[%c0_12, %c0_13] : memref<512x1024xbf16, #tpu.memory_space<vmem>>, vector<512x1024xbf16>
    %cst_14 = arith.constant dense<0.000000e+00> : vector<8x1024xf32>
    %18 = tpu.matmul %16, %17, %cst_14 {dimension_numbers = #tpu.dot_dimension_numbers<[1], [0], [0], [1], [0, 0, 1, 1], [], []>} : vector<8x512xbf16>, vector<512x1024xbf16>, vector<8x1024xf32> -> vector<8x1024xf32>
    %c0_15 = arith.constant 0 : index
    %c0_16 = arith.constant 0 : index
    %19 = vector.load %arg7[%c0_15, %c0_16] : memref<1x1024xf32, #tpu.memory_space<vmem>>, vector<1x1024xf32>
    %20 = vector.broadcast %19 : vector<1x1024xf32> to vector<8x1024xf32>
    %21 = arith.addf %18, %20 : vector<8x1024xf32>
    %cst_17 = arith.constant 0.000000e+00 : f32
    %22 = vector.broadcast %cst_17 : f32 to vector<8x1024xf32>
    %23 = arith.maximumf %21, %22 : vector<8x1024xf32>
    %24 = arith.truncf %23 : vector<8x1024xf32> to vector<8x1024xbf16>
    %c0_18 = arith.constant 0 : index
    %c0_19 = arith.constant 0 : index
    %25 = vector.load %arg8[%c0_18, %c0_19] : memref<1024x784xbf16, #tpu.memory_space<vmem>>, vector<1024x784xbf16>
    %cst_20 = arith.constant dense<0.000000e+00> : vector<8x784xf32>
    %26 = tpu.matmul %24, %25, %cst_20 {dimension_numbers = #tpu.dot_dimension_numbers<[1], [0], [0], [1], [0, 0, 1, 1], [], []>} : vector<8x1024xbf16>, vector<1024x784xbf16>, vector<8x784xf32> -> vector<8x784xf32>
    %c0_21 = arith.constant 0 : index
    %c0_22 = arith.constant 0 : index
    %27 = vector.load %arg9[%c0_21, %c0_22] : memref<1x784xf32, #tpu.memory_space<vmem>>, vector<1x784xf32>
    %28 = vector.broadcast %27 : vector<1x784xf32> to vector<8x784xf32>
    %29 = arith.addf %26, %28 : vector<8x784xf32>
    %30 = math.tanh %29 : vector<8x784xf32>
    %c0_23 = arith.constant 0 : index
    %c0_24 = arith.constant 0 : index
    %31 = vector.load %arg10[%c0_23, %c0_24] : memref<8x784xf32, #tpu.memory_space<vmem>>, vector<8x784xf32>
    tpu.vector_store %arg10[%c0_23, %c0_24], %30 {strides = array<i32>} : memref<8x784xf32, #tpu.memory_space<vmem>>, vector<8x784xf32>,
    return
  }
  func.func @transform_0(%arg0: i32) -> (i32, i32) {
    %c0_i32 = arith.constant 0 : i32
    %c0_i32_0 = arith.constant 0 : i32
    return %arg0, %c0_i32 : i32, i32
  }
  func.func @transform_1(%arg0: i32) -> (i32, i32) {
    %c0_i32 = arith.constant 0 : i32
    %c0_i32_0 = arith.constant 0 : i32
    %c0_i32_1 = arith.constant 0 : i32
    return %c0_i32, %c0_i32_0 : i32, i32
  }
  func.func @transform_2(%arg0: i32) -> (i32, i32) {
    %c0_i32 = arith.constant 0 : i32
    %c0_i32_0 = arith.constant 0 : i32
    %c0_i32_1 = arith.constant 0 : i32
    return %c0_i32, %c0_i32_0 : i32, i32
  }
  func.func @transform_3(%arg0: i32) -> (i32, i32) {
    %c0_i32 = arith.constant 0 : i32
    %c0_i32_0 = arith.constant 0 : i32
    %c0_i32_1 = arith.constant 0 : i32
    return %c0_i32, %c0_i32_0 : i32, i32
  }
  func.func @transform_4(%arg0: i32) -> (i32, i32) {
    %c0_i32 = arith.constant 0 : i32
    %c0_i32_0 = arith.constant 0 : i32
    %c0_i32_1 = arith.constant 0 : i32
    return %c0_i32, %c0_i32_0 : i32, i32
  }
  func.func @transform_5(%arg0: i32) -> (i32, i32) {
    %c0_i32 = arith.constant 0 : i32
    %c0_i32_0 = arith.constant 0 : i32
    %c0_i32_1 = arith.constant 0 : i32
    return %c0_i32, %c0_i32_0 : i32, i32
  }
  func.func @transform_6(%arg0: i32) -> (i32, i32) {
    %c0_i32 = arith.constant 0 : i32
    %c0_i32_0 = arith.constant 0 : i32
    %c0_i32_1 = arith.constant 0 : i32
    return %c0_i32, %c0_i32_0 : i32, i32
  }
  func.func @transform_7(%arg0: i32) -> (i32, i32) {
    %c0_i32 = arith.constant 0 : i32
    %c0_i32_0 = arith.constant 0 : i32
    %c0_i32_1 = arith.constant 0 : i32
    return %c0_i32, %c0_i32_0 : i32, i32
  }
  func.func @transform_8(%arg0: i32) -> (i32, i32) {
    %c0_i32 = arith.constant 0 : i32
    %c0_i32_0 = arith.constant 0 : i32
    %c0_i32_1 = arith.constant 0 : i32
    return %c0_i32, %c0_i32_0 : i32, i32
  }
  func.func @transform_9(%arg0: i32) -> (i32, i32) {
    %c0_i32 = arith.constant 0 : i32
    %c0_i32_0 = arith.constant 0 : i32
    return %arg0, %c0_i32 : i32, i32
  }
}

</mosaic_0001>

<bundles_post_ra>
// kernel: tpu_custom_call.1
= control target key start
LH: loop header
LB: loop body
LE: loop exit
PB: predicated region body
PF: predicated region fallthrough
CT: control target
= control target key end

     0   :  { %s15264_s0 = inlined_call_operand.vmem [shape: bf16[8,128], index: 0, kind: input, shape index: {}]   ;;  %s15265_s1 = inlined_call_operand.vmem [shape: bf16[128,256], index: 1, kind: input, shape index: {}]   ;;  %s15266_s2 = inlined_call_operand.vmem [shape: f32[1,256], index: 2, kind: input, shape index: {}]   ;;  %s15267_s3 = inlined_call_operand.vmem [shape: bf16[256,512], index: 3, kind: input, shape index: {}]   ;;  %s15268_s4 = inlined_call_operand.vmem [shape: f32[1,512], index: 4, kind: input, shape index: {}]   ;;  %s15269_s5 = inlined_call_operand.vmem [shape: bf16[512,1024], index: 5, kind: input, shape index: {}]   ;;  %s15270_s6 = inlined_call_operand.vmem [shape: f32[1,1024], index: 6, kind: input, shape index: {}]   ;;  %s15271_s7 = inlined_call_operand.vmem [shape: bf16[1024,784], index: 7, kind: input, shape index: {}]   ;;  %s15272_s8 = inlined_call_operand.vmem [shape: f32[1,784], index: 8, kind: input, shape index: {}]   ;;  %s15273_s9 = inlined_call_operand.hbm [shape: f32[8,784], index: 9, kind: output, shape index: {}]  }
   0x1   :  { %v6307_v0 = vld [vmem:[%s15265_s1 + $0x70] sm:$0xf]  ;;  %v9400_v1 = vld [vmem:[%s15265_s1 + $0x74] sm:$0xf0]  ;;  %v9399_v2 = vld [vmem:[%s15265_s1 + $0x74] sm:$0xf] }
   0x2   :  { %v6308_v3 = vor.u32 %v9400_v1, %v6307_v0  ;;  %v6309_v4 = vld [vmem:[%s15265_s1 + $0x78] sm:$0xf0]  ;;  %v6299_v5 = vld [vmem:[%s15265_s1 + $0x60] sm:$0xf]  ;;  %v9398_v6 = vld [vmem:[%s15265_s1 + $0x64] sm:$0xf0] }
   0x3   :  { %v6312_v7 = vor.u32 %v9399_v2, %v6309_v4  ;;  %v9397_v8 = vld [vmem:[%s15265_s1 + $0x64] sm:$0xf]  ;;  %v6301_v9 = vld [vmem:[%s15265_s1 + $0x68] sm:$0xf0]  ;;  %v6300_v10 = vor.u32 %v9398_v6, %v6299_v5  ;;  %v6291_v12 = vld [vmem:[%s15265_s1 + $0x50] sm:$0xf] }
   0x4   :  { %136 = vmatpush.bf16.msra.mxu0 %v6308_v3  ;;  %v6304_v11 = vor.u32 %v9397_v8, %v6301_v9  ;;  %v9396_v13 = vld [vmem:[%s15265_s1 + $0x54] sm:$0xf0]  ;;  %v9395_v14 = vld [vmem:[%s15265_s1 + $0x54] sm:$0xf]  ;;  %v6293_v15 = vld [vmem:[%s15265_s1 + $0x58] sm:$0xf0] }
   0x5   :  { %149 = vmatpush.bf16.msra.mxu1 %v6312_v7  ;;  %v6292_v16 = vor.u32 %v9396_v13, %v6291_v12  ;;  %v6296_v17 = vor.u32 %v9395_v14, %v6293_v15  ;;  %v6283_v18 = vld [vmem:[%s15265_s1 + $0x40] sm:$0xf]  ;;  %v9394_v19 = vld [vmem:[%s15265_s1 + $0x44] sm:$0xf0]  ;;  %v9393_v20 = vld [vmem:[%s15265_s1 + $0x44] sm:$0xf] }
   0x6   :  { %v6285_v21 = vld [vmem:[%s15265_s1 + $0x48] sm:$0xf0]  ;;  %v6284_v22 = vor.u32 %v9394_v19, %v6283_v18  ;;  %v6427_v23 = vld [vmem:[%s15267_s3 + $0xe0] sm:$0xf]  ;;  %v9431_v24 = vld [vmem:[%s15267_s3 + $0xec] sm:$0xf0] }
   0x7   :  { %v6555_v25 = vld [vmem:[%s15267_s3 + $0x1e0] sm:$0xf]  ;;  %v6288_v26 = vor.u32 %v9393_v20, %v6285_v21  ;;  %v6275_v27 = vld [vmem:[%s15265_s1 + $0x30] sm:$0xf]  ;;  %v9392_v28 = vld [vmem:[%s15265_s1 + $0x34] sm:$0xf0]  ;;  %v6428_v29 = vor.u32 %v9431_v24, %v6427_v23 }
   0x8   :  { %137 = vmatpush.bf16.msra.mxu0 %v6300_v10  ;;  %v9463_v30 = vld [vmem:[%s15267_s3 + $0x1ec] sm:$0xf0]  ;;  %v9391_v31 = vld [vmem:[%s15265_s1 + $0x34] sm:$0xf]  ;;  %v6277_v32 = vld [vmem:[%s15265_s1 + $0x38] sm:$0xf0]  ;;  %v6276_v38 = vor.u32 %v9392_v28, %v6275_v27 }
   0x9   :  { %150 = vmatpush.bf16.msra.mxu1 %v6304_v11  ;;  %v6556_v33 = vor.u32 %v9463_v30, %v6555_v25  ;;  %v6411_v34 = vld [vmem:[%s15267_s3 + $0xc0] sm:$0xf]  ;;  %560 = vmatpush.bf16.msra.mxu2 %v6428_v29  ;;  %v9427_v35 = vld [vmem:[%s15267_s3 + $0xcc] sm:$0xf0]  ;;  %v9390_v40 = vld [vmem:[%s15265_s1 + $0x24] sm:$0xf0]  ;;  %v6280_v43 = vor.u32 %v9391_v31, %v6277_v32 }
   0xa   :  { %v6539_v36 = vld [vmem:[%s15267_s3 + $0x1c0] sm:$0xf]  ;;  %v9459_v37 = vld [vmem:[%s15267_s3 + $0x1cc] sm:$0xf0]  ;;  %v6412_v41 = vor.u32 %v9427_v35, %v6411_v34  ;;  %v9389_v44 = vld [vmem:[%s15265_s1 + $0x24] sm:$0xf] }
   0xb   :  { %v6267_v39 = vld [vmem:[%s15265_s1 + $0x20] sm:$0xf]  ;;  %573 = vmatpush.bf16.msra.mxu3 %v6556_v33  ;;  %v6540_v42 = vor.u32 %v9459_v37, %v6539_v36  ;;  %v9423_v46 = vld [vmem:[%s15267_s3 + $0xac] sm:$0xf0]  ;;  %v6269_v47 = vld [vmem:[%s15265_s1 + $0x28] sm:$0xf0] }
   0xc   :  { %138 = vmatpush.bf16.msra.mxu0 %v6292_v16  ;;  %v6395_v45 = vld [vmem:[%s15267_s3 + $0xa0] sm:$0xf]  ;;  %v9455_v49 = vld [vmem:[%s15267_s3 + $0x1ac] sm:$0xf0]  ;;  %v6268_v51 = vor.u32 %v9390_v40, %v6267_v39  ;;  %v6272_v56 = vor.u32 %v9389_v44, %v6269_v47  ;;  %v9388_v57 = vld [vmem:[%s15265_s1 + $0x14] sm:$0xf0] }
   0xd   :  { %151 = vmatpush.bf16.msra.mxu1 %v6296_v17  ;;  %v6523_v48 = vld [vmem:[%s15267_s3 + $0x1a0] sm:$0xf]  ;;  %561 = vmatpush.bf16.msra.mxu2 %v6412_v41  ;;  %v6396_v50 = vor.u32 %v9423_v46, %v6395_v45  ;;  %v6259_v52 = vld [vmem:[%s15265_s1 + $0x10] sm:$0xf]  ;;  %v9387_v60 = vld [vmem:[%s15265_s1 + $0x14] sm:$0xf] }
   0xe   :  { %v6524_v53 = vor.u32 %v9455_v49, %v6523_v48  ;;  %v6379_v54 = vld [vmem:[%s15267_s3 + $0x80] sm:$0xf]  ;;  %v9419_v55 = vld [vmem:[%s15267_s3 + $0x8c] sm:$0xf0]  ;;  %v6261_v61 = vld [vmem:[%s15265_s1 + $0x18] sm:$0xf0]  ;;  %v6260_v0 = vor.u32 %v9388_v57, %v6259_v52 }
   0xf   :  { %574 = vmatpush.bf16.msra.mxu3 %v6540_v42  ;;  %v6507_v58 = vld [vmem:[%s15267_s3 + $0x180] sm:$0xf]  ;;  %v9451_v59 = vld [vmem:[%s15267_s3 + $0x18c] sm:$0xf0]  ;;  %v6380_v63 = vor.u32 %v9419_v55, %v6379_v54  ;;  %v9386_v1 = vld [vmem:[%s15265_s1 + $0x4] sm:$0xf0]  ;;  %v6264_v5 = vor.u32 %v9387_v60, %v6261_v61 }
  0x10   :  { %139 = vmatpush.bf16.msra.mxu0 %v6284_v22  ;;  %v6251_v62 = vld [vmem:[%s15265_s1] sm:$0xf]  ;;  %v6508_v2 = vor.u32 %v9451_v59, %v6507_v58  ;;  %v9415_v4 = vld [vmem:[%s15267_s3 + $0x6c] sm:$0xf0]  ;;  %v9385_v6 = vld [vmem:[%s15265_s1 + $0x4] sm:$0xf] }
  0x11   :  { %152 = vmatpush.bf16.msra.mxu1 %v6288_v26  ;;  %562 = vmatpush.bf16.msra.mxu2 %v6396_v50  ;;  %v6363_v3 = vld [vmem:[%s15267_s3 + $0x60] sm:$0xf]  ;;  %v9447_v8 = vld [vmem:[%s15267_s3 + $0x16c] sm:$0xf0]  ;;  %v6253_v9 = vld [vmem:[%s15265_s1 + $0x8] sm:$0xf0]  ;;  %v6252_v15 = vor.u32 %v9386_v1, %v6251_v62 }
  0x12   :  { %v6491_v7 = vld [vmem:[%s15267_s3 + $0x160] sm:$0xf]  ;;  %v9429_v10 = vld [vmem:[%s15267_s3 + $0xe4] sm:$0xf]  ;;  %v6429_v11 = vld [vmem:[%s15267_s3 + $0xf0] sm:$0xf0]  ;;  %v6364_v14 = vor.u32 %v9415_v4, %v6363_v3  ;;  %v6256_v19 = vor.u32 %v9385_v6, %v6253_v9 }
  0x13   :  { %575 = vmatpush.bf16.msra.mxu3 %v6524_v53  ;;  %v9461_v12 = vld [vmem:[%s15267_s3 + $0x1e4] sm:$0xf]  ;;  %v6557_v13 = vld [vmem:[%s15267_s3 + $0x1f0] sm:$0xf0]  ;;  %v6492_v16 = vor.u32 %v9447_v8, %v6491_v7  ;;  %v6347_v17 = vld [vmem:[%s15267_s3 + $0x40] sm:$0xf]  ;;  %v6432_v20 = vor.u32 %v9429_v10, %v6429_v11 }
  0x14   :  { %140 = vmatpush.bf16.msra.mxu0 %v6276_v38  ;;  %v9411_v18 = vld [vmem:[%s15267_s3 + $0x4c] sm:$0xf0]  ;;  %v6475_v21 = vld [vmem:[%s15267_s3 + $0x140] sm:$0xf]  ;;  %v6560_v23 = vor.u32 %v9461_v12, %v6557_v13  ;;  %v9425_v24 = vld [vmem:[%s15267_s3 + $0xc4] sm:$0xf] }
  0x15   :  { %153 = vmatpush.bf16.msra.mxu1 %v6280_v43  ;;  %563 = vmatpush.bf16.msra.mxu2 %v6380_v63  ;;  %v9443_v22 = vld [vmem:[%s15267_s3 + $0x14c] sm:$0xf0]  ;;  %v6413_v25 = vld [vmem:[%s15267_s3 + $0xd0] sm:$0xf0]  ;;  %v9457_v26 = vld [vmem:[%s15267_s3 + $0x1c4] sm:$0xf]  ;;  %v6348_v28 = vor.u32 %v9411_v18, %v6347_v17 }
  0x16   :  { %v6541_v27 = vld [vmem:[%s15267_s3 + $0x1d0] sm:$0xf0]  ;;  %v33_v29 = vld [vmem:[%s15264_s0] sm:$0xf]  ;;  %v6476_v30 = vor.u32 %v9443_v22, %v6475_v21  ;;  %v9407_v32 = vld [vmem:[%s15267_s3 + $0x2c] sm:$0xf0]  ;;  %v6416_v33 = vor.u32 %v9425_v24, %v6413_v25 }
  0x17   :  { %576 = vmatpush.bf16.msra.mxu3 %v6508_v2  ;;  %v6331_v31 = vld [vmem:[%s15267_s3 + $0x20] sm:$0xf]  ;;  %v9439_v35 = vld [vmem:[%s15267_s3 + $0x12c] sm:$0xf0]  ;;  %v6544_v36 = vor.u32 %v9457_v26, %v6541_v27  ;;  %v9421_v37 = vld [vmem:[%s15267_s3 + $0xa4] sm:$0xf] }
  0x18   :  { %141 = vmatpush.bf16.msra.mxu0 %v6268_v51  ;;  %v6459_v34 = vld [vmem:[%s15267_s3 + $0x120] sm:$0xf]  ;;  %v6397_v38 = vld [vmem:[%s15267_s3 + $0xb0] sm:$0xf0]  ;;  %v9453_v39 = vld [vmem:[%s15267_s3 + $0x1a4] sm:$0xf]  ;;  %v6332_v41 = vor.u32 %v9407_v32, %v6331_v31 }
  0x19   :  { %154 = vmatpush.bf16.msra.mxu1 %v6272_v56  ;;  %564 = vmatpush.bf16.msra.mxu2 %v6364_v14  ;;  %v6525_v40 = vld [vmem:[%s15267_s3 + $0x1b0] sm:$0xf0]  ;;  %v9417_v42 = vld [vmem:[%s15267_s3 + $0x84] sm:$0xf]  ;;  %v6460_v43 = vor.u32 %v9439_v35, %v6459_v34  ;;  %v6315_v44 = vld [vmem:[%s15267_s3] sm:$0xf]  ;;  %v6400_v47 = vor.u32 %v9421_v37, %v6397_v38 }
  0x1a   :  { %v9403_v45 = vld [vmem:[%s15267_s3 + $0xc] sm:$0xf0]  ;;  %v6443_v46 = vld [vmem:[%s15267_s3 + $0x100] sm:$0xf]  ;;  %v6435_v49 = vld [vmem:[%s15267_s3 + $0xe8] sm:$0xf]  ;;  %v6528_v51 = vor.u32 %v9453_v39, %v6525_v40 }
  0x1b   :  { %577 = vmatpush.bf16.msra.mxu3 %v6492_v16  ;;  %v9435_v48 = vld [vmem:[%s15267_s3 + $0x10c] sm:$0xf0]  ;;  %v9432_v50 = vld [vmem:[%s15267_s3 + $0xf4] sm:$0xf0]  ;;  %v6381_v52 = vld [vmem:[%s15267_s3 + $0x90] sm:$0xf0]  ;;  %v6316_v57 = vor.u32 %v9403_v45, %v6315_v44 }
  0x1c   :  { %142 = vmatpush.bf16.msra.mxu0 %v6260_v0  ;;  %v6563_v53 = vld [vmem:[%s15267_s3 + $0x1e8] sm:$0xf]  ;;  %v9464_v54 = vld [vmem:[%s15267_s3 + $0x1f4] sm:$0xf0]  ;;  %v9449_v55 = vld [vmem:[%s15267_s3 + $0x184] sm:$0xf] }
  0x1d   :  { %155 = vmatpush.bf16.msra.mxu1 %v6264_v5  ;;  %565 = vmatpush.bf16.msra.mxu2 %v6348_v28  ;;  %v6509_v56 = vld [vmem:[%s15267_s3 + $0x190] sm:$0xf0] }
  0x1f   :  { %578 = vmatpush.bf16.msra.mxu3 %v6476_v30 }
  0x20   :  { %143 = vmatpush.bf16.msra.mxu0 %v6252_v15 }
  0x21   :  { %156 = vmatpush.bf16.msra.mxu1 %v6256_v19  ;;  %566 = vmatpush.bf16.msra.mxu2 %v6332_v41 }
  0x23   :  { %144 = vmatmul.bf16.vlgmr.msra.gmra.mxu0 %v33_v29 }
  0x24   :  { %586 = vmatpush.bf16.msrb.mxu0 %v6432_v20  ;;  %157 = vmatmul.bf16.vlgmr.msra.gmra.mxu1 %v33_v29 }
  0x25   :  { %599 = vmatpush.bf16.msrb.mxu1 %v6560_v23 }
  0x28   :  { %587 = vmatpush.bf16.msrb.mxu0 %v6416_v33 }
  0x29   :  { %600 = vmatpush.bf16.msrb.mxu1 %v6544_v36 }
  0x2a   :  { %14 = vsyncpa [#allocation3], 0  ;;  %579 = vmatpush.bf16.msra.mxu3 %v6460_v43  ;;  %v6444_v58 = vor.u32 %v9435_v48, %v6443_v46  ;;  %v6436_v59 = vor.u32 %v9432_v50, %v6435_v49  ;;  %v6384_v60 = vor.u32 %v9417_v42, %v6381_v52  ;;  %v9413_v61 = vld [vmem:[%s15267_s3 + $0x64] sm:$0xf]  ;;  %v6564_v62 = vor.u32 %v9464_v54, %v6563_v53  ;;  %v6419_v63 = vld [vmem:[%s15267_s3 + $0xc8] sm:$0xf] }
  0x2b   :  { %v9428_v0 = vld [vmem:[%s15267_s3 + $0xd4] sm:$0xf0]  ;;  %v6512_v1 = vor.u32 %v9449_v55, %v6509_v56  ;;  %v6365_v2 = vld [vmem:[%s15267_s3 + $0x70] sm:$0xf0]  ;;  %v6547_v3 = vld [vmem:[%s15267_s3 + $0x1c8] sm:$0xf]  ;;  %567 = vmatpush.bf16.msra.mxu2 %v6316_v57 }
  0x2c   :  { %588 = vmatpush.bf16.msrb.mxu0 %v6400_v47  ;;  %v9460_v4 = vld [vmem:[%s15267_s3 + $0x1d4] sm:$0xf0]  ;;  %v9445_v5 = vld [vmem:[%s15267_s3 + $0x164] sm:$0xf]  ;;  %v6493_v6 = vld [vmem:[%s15267_s3 + $0x170] sm:$0xf0]  ;;  %v6420_v7 = vor.u32 %v9428_v0, %v6419_v63  ;;  %v6368_v8 = vor.u32 %v9413_v61, %v6365_v2 }
  0x2d   :  { %601 = vmatpush.bf16.msrb.mxu1 %v6528_v51  ;;  %v6548_v9 = vor.u32 %v9460_v4, %v6547_v3  ;;  %v6496_v10 = vor.u32 %v9445_v5, %v6493_v6  ;;  %v9409_v11 = vld [vmem:[%s15267_s3 + $0x44] sm:$0xf]  ;;  %v6349_v12 = vld [vmem:[%s15267_s3 + $0x50] sm:$0xf0]  ;;  %v9430_v27 = vld [vmem:[%s15267_s3 + $0xec] sm:$0xf] }
  0x2e   :  { %580 = vmatpush.bf16.msra.mxu3 %v6444_v58  ;;  %v9441_v13 = vld [vmem:[%s15267_s3 + $0x144] sm:$0xf]  ;;  %v6477_v14 = vld [vmem:[%s15267_s3 + $0x150] sm:$0xf0]  ;;  %v6352_v15 = vor.u32 %v9409_v11, %v6349_v12  ;;  %v6437_v28 = vld [vmem:[%s15267_s3 + $0xf8] sm:$0xf0] }
  0x2f   :  { %612 = vmatpush.bf16.msrb.mxu2 %v6436_v59  ;;  %v6480_v16 = vor.u32 %v9441_v13, %v6477_v14  ;;  %v9405_v17 = vld [vmem:[%s15267_s3 + $0x24] sm:$0xf]  ;;  %v6333_v18 = vld [vmem:[%s15267_s3 + $0x30] sm:$0xf0]  ;;  %v9462_v29 = vld [vmem:[%s15267_s3 + $0x1ec] sm:$0xf]  ;;  %v6440_v33 = vor.u32 %v9430_v27, %v6437_v28 }
  0x30   :  { %589 = vmatpush.bf16.msrb.mxu0 %v6384_v60  ;;  %v9437_v19 = vld [vmem:[%s15267_s3 + $0x124] sm:$0xf]  ;;  %v6461_v20 = vld [vmem:[%s15267_s3 + $0x130] sm:$0xf0]  ;;  %v6336_v21 = vor.u32 %v9405_v17, %v6333_v18  ;;  %v6565_v30 = vld [vmem:[%s15267_s3 + $0x1f8] sm:$0xf0] }
  0x31   :  { %602 = vmatpush.bf16.msrb.mxu1 %v6512_v1  ;;  %v6464_v22 = vor.u32 %v9437_v19, %v6461_v20  ;;  %v9401_v23 = vld [vmem:[%s15267_s3 + $0x4] sm:$0xf]  ;;  %v6317_v24 = vld [vmem:[%s15267_s3 + $0x10] sm:$0xf0]  ;;  %v6568_v34 = vor.u32 %v9462_v29, %v6565_v30  ;;  %v9426_v35 = vld [vmem:[%s15267_s3 + $0xcc] sm:$0xf] }
  0x32   :  { %625 = vmatpush.bf16.msrb.mxu3 %v6564_v62  ;;  %v9433_v25 = vld [vmem:[%s15267_s3 + $0x104] sm:$0xf]  ;;  %v6445_v26 = vld [vmem:[%s15267_s3 + $0x110] sm:$0xf0]  ;;  %v6320_v31 = vor.u32 %v9401_v23, %v6317_v24  ;;  %v6421_v36 = vld [vmem:[%s15267_s3 + $0xd8] sm:$0xf0] }
  0x33   :  { %613 = vmatpush.bf16.msrb.mxu2 %v6420_v7  ;;  %v6448_v32 = vor.u32 %v9433_v25, %v6445_v26  ;;  %v9458_v37 = vld [vmem:[%s15267_s3 + $0x1cc] sm:$0xf]  ;;  %v6549_v38 = vld [vmem:[%s15267_s3 + $0x1d8] sm:$0xf0]  ;;  %v6424_v39 = vor.u32 %v9426_v35, %v6421_v36  ;;  %v6403_v41 = vld [vmem:[%s15267_s3 + $0xa8] sm:$0xf] }
  0x34   :  { %590 = vmatpush.bf16.msrb.mxu0 %v6368_v8  ;;  %v6552_v40 = vor.u32 %v9458_v37, %v6549_v38  ;;  %v9424_v42 = vld [vmem:[%s15267_s3 + $0xb4] sm:$0xf0]  ;;  %v6531_v43 = vld [vmem:[%s15267_s3 + $0x1a8] sm:$0xf]  ;;  %v9422_v46 = vld [vmem:[%s15267_s3 + $0xac] sm:$0xf] }
  0x35   :  { %603 = vmatpush.bf16.msrb.mxu1 %v6496_v10  ;;  %v6404_v44 = vor.u32 %v9424_v42, %v6403_v41  ;;  %v9456_v45 = vld [vmem:[%s15267_s3 + $0x1b4] sm:$0xf0]  ;;  %v6405_v47 = vld [vmem:[%s15267_s3 + $0xb8] sm:$0xf0]  ;;  %v9454_v50 = vld [vmem:[%s15267_s3 + $0x1ac] sm:$0xf] }
  0x36   :  { %626 = vmatpush.bf16.msrb.mxu3 %v6548_v9  ;;  %v6532_v48 = vor.u32 %v9456_v45, %v6531_v43  ;;  %v6408_v49 = vor.u32 %v9422_v46, %v6405_v47  ;;  %v6533_v51 = vld [vmem:[%s15267_s3 + $0x1b8] sm:$0xf0]  ;;  %v6387_v53 = vld [vmem:[%s15267_s3 + $0x88] sm:$0xf]  ;;  %v9420_v54 = vld [vmem:[%s15267_s3 + $0x94] sm:$0xf0] }
  0x37   :  { %614 = vmatpush.bf16.msrb.mxu2 %v6404_v44  ;;  %v6536_v52 = vor.u32 %v9454_v50, %v6533_v51  ;;  %v6515_v55 = vld [vmem:[%s15267_s3 + $0x188] sm:$0xf]  ;;  %v6388_v56 = vor.u32 %v9420_v54, %v6387_v53  ;;  %v9452_v57 = vld [vmem:[%s15267_s3 + $0x194] sm:$0xf0]  ;;  %v9418_v58 = vld [vmem:[%s15267_s3 + $0x8c] sm:$0xf] }
  0x38   :  { %591 = vmatpush.bf16.msrb.mxu0 %v6352_v15  ;;  %v6389_v59 = vld [vmem:[%s15267_s3 + $0x98] sm:$0xf0]  ;;  %v6516_v60 = vor.u32 %v9452_v57, %v6515_v55  ;;  %v9450_v62 = vld [vmem:[%s15267_s3 + $0x18c] sm:$0xf]  ;;  %v6371_v1 = vld [vmem:[%s15267_s3 + $0x68] sm:$0xf] }
  0x39   :  { %604 = vmatpush.bf16.msrb.mxu1 %v6480_v16  ;;  %v6392_v61 = vor.u32 %v9418_v58, %v6389_v59  ;;  %v6517_v63 = vld [vmem:[%s15267_s3 + $0x198] sm:$0xf0]  ;;  %v9416_v2 = vld [vmem:[%s15267_s3 + $0x74] sm:$0xf0]  ;;  %v6499_v3 = vld [vmem:[%s15267_s3 + $0x168] sm:$0xf] }
  0x3a   :  { %627 = vmatpush.bf16.msrb.mxu3 %v6532_v48  ;;  %v6520_v0 = vor.u32 %v9450_v62, %v6517_v63  ;;  %v6372_v4 = vor.u32 %v9416_v2, %v6371_v1  ;;  %v9448_v5 = vld [vmem:[%s15267_s3 + $0x174] sm:$0xf0]  ;;  %v9414_v6 = vld [vmem:[%s15267_s3 + $0x6c] sm:$0xf]  ;;  %v6373_v7 = vld [vmem:[%s15267_s3 + $0x78] sm:$0xf0] }
  0x3b   :  { %615 = vmatpush.bf16.msrb.mxu2 %v6388_v56  ;;  %v6500_v8 = vor.u32 %v9448_v5, %v6499_v3  ;;  %v6376_v9 = vor.u32 %v9414_v6, %v6373_v7  ;;  %v9446_v10 = vld [vmem:[%s15267_s3 + $0x16c] sm:$0xf]  ;;  %v6501_v11 = vld [vmem:[%s15267_s3 + $0x178] sm:$0xf0]  ;;  %v6355_v13 = vld [vmem:[%s15267_s3 + $0x48] sm:$0xf] }
  0x3c   :  { %592 = vmatpush.bf16.msrb.mxu0 %v6336_v21  ;;  %v6504_v12 = vor.u32 %v9446_v10, %v6501_v11  ;;  %v9412_v14 = vld [vmem:[%s15267_s3 + $0x54] sm:$0xf0]  ;;  %v6483_v15 = vld [vmem:[%s15267_s3 + $0x148] sm:$0xf]  ;;  %v9410_v18 = vld [vmem:[%s15267_s3 + $0x4c] sm:$0xf] }
  0x3d   :  { %605 = vmatpush.bf16.msrb.mxu1 %v6464_v22  ;;  %v6356_v16 = vor.u32 %v9412_v14, %v6355_v13  ;;  %v9444_v17 = vld [vmem:[%s15267_s3 + $0x154] sm:$0xf0]  ;;  %v6357_v19 = vld [vmem:[%s15267_s3 + $0x58] sm:$0xf0]  ;;  %v9442_v22 = vld [vmem:[%s15267_s3 + $0x14c] sm:$0xf] }
  0x3e   :  { %628 = vmatpush.bf16.msrb.mxu3 %v6516_v60  ;;  %v6484_v20 = vor.u32 %v9444_v17, %v6483_v15  ;;  %v6360_v21 = vor.u32 %v9410_v18, %v6357_v19  ;;  %v6485_v23 = vld [vmem:[%s15267_s3 + $0x158] sm:$0xf0]  ;;  %v6339_v24 = vld [vmem:[%s15267_s3 + $0x28] sm:$0xf]  ;;  %v9408_v26 = vld [vmem:[%s15267_s3 + $0x34] sm:$0xf0] }
  0x3f   :  { %616 = vmatpush.bf16.msrb.mxu2 %v6372_v4  ;;  %v6488_v25 = vor.u32 %v9442_v22, %v6485_v23  ;;  %v6467_v27 = vld [vmem:[%s15267_s3 + $0x128] sm:$0xf]  ;;  %v9440_v28 = vld [vmem:[%s15267_s3 + $0x134] sm:$0xf0]  ;;  %v6340_v29 = vor.u32 %v9408_v26, %v6339_v24  ;;  %v9406_v30 = vld [vmem:[%s15267_s3 + $0x2c] sm:$0xf] }
  0x40   :  { %593 = vmatpush.bf16.msrb.mxu0 %v6320_v31  ;;  %v6341_v31 = vld [vmem:[%s15267_s3 + $0x38] sm:$0xf0]  ;;  %v6323_v36 = vld [vmem:[%s15267_s3 + $0x8] sm:$0xf]  ;;  %v9404_v37 = vld [vmem:[%s15267_s3 + $0x14] sm:$0xf0] }
  0x41   :  { %606 = vmatpush.bf16.msrb.mxu1 %v6448_v32  ;;  %v9438_v32 = vld [vmem:[%s15267_s3 + $0x12c] sm:$0xf]  ;;  %v6469_v35 = vld [vmem:[%s15267_s3 + $0x138] sm:$0xf0]  ;;  %v6324_v45 = vor.u32 %v9404_v37, %v6323_v36  ;;  %v7051_v55 = vld [vmem:[%s15269_s5 + $0x3c0] sm:$0xf] }
  0x42   :  { %629 = vmatpush.bf16.msrb.mxu3 %v6500_v8  ;;  %v6472_v38 = vor.u32 %v9438_v32, %v6469_v35  ;;  %v9402_v41 = vld [vmem:[%s15267_s3 + $0xc] sm:$0xf]  ;;  %v6325_v42 = vld [vmem:[%s15267_s3 + $0x18] sm:$0xf0]  ;;  %v9589_v56 = vld [vmem:[%s15269_s5 + $0x3dc] sm:$0xf0] }
  0x43   :  { %617 = vmatpush.bf16.msrb.mxu2 %v6356_v16  ;;  %v9434_v43 = vld [vmem:[%s15267_s3 + $0x10c] sm:$0xf]  ;;  %v6453_v44 = vld [vmem:[%s15267_s3 + $0x118] sm:$0xf0]  ;;  %v6328_v47 = vor.u32 %v9402_v41, %v6325_v42  ;;  %v6795_v57 = vld [vmem:[%s15269_s5 + $0x1c0] sm:$0xf]  ;;  %v7052_v3 = vor.u32 %v9589_v56, %v7051_v55 }
  0x44   :  { %638 = vmatpush.bf16.msra.mxu0 %v6440_v33  ;;  %v6468_v33 = vor.u32 %v9440_v28, %v6467_v27  ;;  %v6456_v48 = vor.u32 %v9434_v43, %v6453_v44  ;;  %v9525_v59 = vld [vmem:[%s15269_s5 + $0x1dc] sm:$0xf0]  ;;  %s6240_s11 = sshll.u32 %s15273_s9, 4  ;;  %vm6231_vm0 = vcmask 130048   ;;  %s6241_s11 = int_to_ptr.hbm [resolvable:$true] %s6240_s11 }
  0x45   :  { %651 = vmatpush.bf16.msra.mxu1 %v6568_v34  ;;  %v6344_v34 = vor.u32 %v9406_v30, %v6341_v31  ;;  %v7563_v60 = vld [vmem:[%s15269_s5 + $0x7c0] sm:$0xf]  ;;  %v6796_v6 = vor.u32 %v9525_v59, %v6795_v57 }
  0x46   :  { %630 = vmatpush.bf16.msrb.mxu3 %v6484_v20  ;;  %v7307_v63 = vld [vmem:[%s15269_s5 + $0x5c0] sm:$0xf] }
  0x47   :  { %618 = vmatpush.bf16.msrb.mxu2 %v6340_v29  ;;  %v7019_v4 = vld [vmem:[%s15269_s5 + $0x380] sm:$0xf] }
  0x48   :  { %639 = vmatpush.bf16.msra.mxu0 %v6424_v39  ;;  %v6451_v39 = vld [vmem:[%s15267_s3 + $0x108] sm:$0xf]  ;;  %v9581_v5 = vld [vmem:[%s15269_s5 + $0x39c] sm:$0xf0] }
  0x49   :  { %652 = vmatpush.bf16.msra.mxu1 %v6552_v40  ;;  %v9436_v40 = vld [vmem:[%s15267_s3 + $0x114] sm:$0xf0]  ;;  %v6763_v8 = vld [vmem:[%s15269_s5 + $0x180] sm:$0xf]  ;;  %v7020_v18 = vor.u32 %v9581_v5, %v7019_v4 }
  0x4a   :  { %631 = vmatpush.bf16.msrb.mxu3 %v6468_v33  ;;  %v6452_v46 = vor.u32 %v9436_v40, %v6451_v39  ;;  %v7531_v11 = vld [vmem:[%s15269_s5 + $0x780] sm:$0xf] }
  0x4b   :  { %619 = vmatpush.bf16.msrb.mxu2 %v6324_v45  ;;  %v9709_v13 = vld [vmem:[%s15269_s5 + $0x79c] sm:$0xf0] }
  0x4c   :  { %640 = vmatpush.bf16.msra.mxu0 %v6408_v49  ;;  %v50_v49 = vld [vmem:[%s15266_s2] sm:$0x3]  ;;  %v7532_v24 = vor.u32 %v9709_v13, %v7531_v11 }
  0x4d   :  { %653 = vmatpush.bf16.msra.mxu1 %v6536_v52  ;;  %v52_v50 = vperm.slane %v50_v49, 0  ;;  %v53_v51 = vperm.slane %v50_v49, 1  ;;  %v7275_v14 = vld [vmem:[%s15269_s5 + $0x580] sm:$0xf] }
  0x4e   :  { %632 = vmatpush.bf16.msrb.mxu3 %v6452_v46  ;;  %v9645_v15 = vld [vmem:[%s15269_s5 + $0x59c] sm:$0xf0] }
  0x4f   :  { %v6987_v19 = vld [vmem:[%s15269_s5 + $0x340] sm:$0xf]  ;;  %v7276_v26 = vor.u32 %v9645_v15, %v7275_v14 }
  0x50   :  { %641 = vmatpush.bf16.msra.mxu0 %v6392_v61  ;;  %v9717_v61 = vld [vmem:[%s15269_s5 + $0x7dc] sm:$0xf0] }
  0x51   :  { %654 = vmatpush.bf16.msra.mxu1 %v6520_v0  ;;  %v9653_v0 = vld [vmem:[%s15269_s5 + $0x5dc] sm:$0xf0]  ;;  %v7564_v10 = vor.u32 %v9717_v61, %v7563_v60 }
  0x52   :  { %v9573_v20 = vld [vmem:[%s15269_s5 + $0x35c] sm:$0xf0] }
  0x53   :  { %v6731_v22 = vld [vmem:[%s15269_s5 + $0x140] sm:$0xf]  ;;  %v6988_v30 = vor.u32 %v9573_v20, %v6987_v19 }
  0x54   :  { %642 = vmatpush.bf16.msra.mxu0 %v6376_v9  ;;  %v9517_v9 = vld [vmem:[%s15269_s5 + $0x19c] sm:$0xf0] }
  0x55   :  { %655 = vmatpush.bf16.msra.mxu1 %v6504_v12  ;;  %v7308_v12 = vor.u32 %v9653_v0, %v7307_v63  ;;  %v9509_v23 = vld [vmem:[%s15269_s5 + $0x15c] sm:$0xf0] }
  0x56   :  { %v9701_v27 = vld [vmem:[%s15269_s5 + $0x75c] sm:$0xf0]  ;;  %v6732_v33 = vor.u32 %v9509_v23, %v6731_v22  ;;  %v7053_v23 = vld [vmem:[%s15269_s5 + $0x3e0] sm:$0xf0] }
  0x57   :  { %v7243_v28 = vld [vmem:[%s15269_s5 + $0x540] sm:$0xf] }
  0x58   :  { %643 = vmatpush.bf16.msra.mxu0 %v6360_v21  ;;  %v6764_v21 = vor.u32 %v9517_v9, %v6763_v8  ;;  %v9637_v29 = vld [vmem:[%s15269_s5 + $0x55c] sm:$0xf0] }
  0x59   :  { %656 = vmatpush.bf16.msra.mxu1 %v6488_v25  ;;  %v7499_v25 = vld [vmem:[%s15269_s5 + $0x740] sm:$0xf] }
  0x5a   :  { %v6955_v31 = vld [vmem:[%s15269_s5 + $0x300] sm:$0xf]  ;;  %v7500_v36 = vor.u32 %v9701_v27, %v7499_v25  ;;  %v6797_v25 = vld [vmem:[%s15269_s5 + $0x1e0] sm:$0xf0] }
  0x5b   :  { %v9565_v32 = vld [vmem:[%s15269_s5 + $0x31c] sm:$0xf0] }
  0x5c   :  { %644 = vmatpush.bf16.msra.mxu0 %v6344_v34  ;;  %v6699_v34 = vld [vmem:[%s15269_s5 + $0x100] sm:$0xf]  ;;  %v6956_v42 = vor.u32 %v9565_v32, %v6955_v31  ;;  %v7565_v31 = vld [vmem:[%s15269_s5 + $0x7e0] sm:$0xf0] }
  0x5d   :  { %657 = vmatpush.bf16.msra.mxu1 %v6472_v38  ;;  %v9501_v35 = vld [vmem:[%s15269_s5 + $0x11c] sm:$0xf0]  ;;  %v7244_v38 = vor.u32 %v9637_v29, %v7243_v28 }
  0x5e   :  { %v7467_v37 = vld [vmem:[%s15269_s5 + $0x700] sm:$0xf]  ;;  %v6700_v45 = vor.u32 %v9501_v35, %v6699_v34  ;;  %v7021_v35 = vld [vmem:[%s15269_s5 + $0x3a0] sm:$0xf0] }
  0x5f   :  { %v9693_v39 = vld [vmem:[%s15269_s5 + $0x71c] sm:$0xf0] }
  0x60   :  { %645 = vmatpush.bf16.msra.mxu0 %v6328_v47  ;;  %v7211_v40 = vld [vmem:[%s15269_s5 + $0x500] sm:$0xf] }
  0x61   :  { %658 = vmatpush.bf16.msra.mxu1 %v6456_v48  ;;  %v9629_v41 = vld [vmem:[%s15269_s5 + $0x51c] sm:$0xf0]  ;;  %v7468_v48 = vor.u32 %v9693_v39, %v7467_v37  ;;  %v6765_v37 = vld [vmem:[%s15269_s5 + $0x1a0] sm:$0xf0] }
  0x62   :  { %v6923_v43 = vld [vmem:[%s15269_s5 + $0x2c0] sm:$0xf] }
  0x63   :  { %v9557_v44 = vld [vmem:[%s15269_s5 + $0x2dc] sm:$0xf0] }
  0x64   :  { %v6667_v46 = vld [vmem:[%s15269_s5 + $0xc0] sm:$0xf] }
  0x65   :  { %v9493_v47 = vld [vmem:[%s15269_s5 + $0xdc] sm:$0xf0] }
  0x66   :  { %v7435_v49 = vld [vmem:[%s15269_s5 + $0x6c0] sm:$0xf]  ;;  %v6668_v57 = vor.u32 %v9493_v47, %v6667_v46  ;;  %v9561_v47 = vld [vmem:[%s15269_s5 + $0x304] sm:$0xf] }
  0x67   :  { %v6891_v55 = vld [vmem:[%s15269_s5 + $0x280] sm:$0xf] }
  0x68   :  { %v9549_v56 = vld [vmem:[%s15269_s5 + $0x29c] sm:$0xf0] }
  0x69   :  { %v9485_v59 = vld [vmem:[%s15269_s5 + $0x9c] sm:$0xf0] }
  0x6a   :  { %v7403_v61 = vld [vmem:[%s15269_s5 + $0x680] sm:$0xf] }
  0x6b   :  { %v9677_v63 = vld [vmem:[%s15269_s5 + $0x69c] sm:$0xf0] }
  0x6c   :  { %v7147_v0 = vld [vmem:[%s15269_s5 + $0x480] sm:$0xf]  ;;  %v7404_v8 = vor.u32 %v9677_v63, %v7403_v61  ;;  %v7533_v61 = vld [vmem:[%s15269_s5 + $0x7a0] sm:$0xf0] }
  0x6d   :  { %v9541_v4 = vld [vmem:[%s15269_s5 + $0x25c] sm:$0xf0] }
  0x6e   :  { %v7371_v9 = vld [vmem:[%s15269_s5 + $0x640] sm:$0xf] }
  0x6f   :  { %v9669_v11 = vld [vmem:[%s15269_s5 + $0x65c] sm:$0xf0] }
  0x70   :  { %v9605_v13 = vld [vmem:[%s15269_s5 + $0x45c] sm:$0xf0] }
  0x71   :  { %v6827_v15 = vld [vmem:[%s15269_s5 + $0x200] sm:$0xf] }
  0x72   :  { %v6571_v19 = vld [vmem:[%s15269_s5] sm:$0xf] }
  0x73   :  { %v9469_v20 = vld [vmem:[%s15269_s5 + $0x1c] sm:$0xf0] }
  0x74   :  { %v9661_v27 = vld [vmem:[%s15269_s5 + $0x61c] sm:$0xf0]  ;;  %v6572_v29 = vor.u32 %v9469_v20, %v6571_v19  ;;  %v9529_v20 = vld [vmem:[%s15269_s5 + $0x204] sm:$0xf] }
  0x75   :  { %v9597_v63 = vld [vmem:[%s15269_s5 + $0x41c] sm:$0xf0] }
  0xa0   :  { %v145_v52 = vpop.f32.mrf.mxu0 }
  0xa1   :  { %v146_v53 = vadd.f32 %v145_v52, %v52_v50  ;;  %v158_v54 = vpop.f32.mrf.mxu1  ;;  %v7212_v50 = vor.u32 %v9629_v41, %v7211_v40  ;;  %v7179_v52 = vld [vmem:[%s15269_s5 + $0x4c0] sm:$0xf]  ;;  %v9569_v41 = vld [vmem:[%s15269_s5 + $0x344] sm:$0xf] }
  0xa2   :  { %v159_v58 = vadd.f32 %v158_v54, %v53_v51  ;;  %v9685_v51 = vld [vmem:[%s15269_s5 + $0x6dc] sm:$0xf0]  ;;  %v6924_v54 = vor.u32 %v9557_v44, %v6923_v43  ;;  %v6989_v43 = vld [vmem:[%s15269_s5 + $0x360] sm:$0xf0] }
  0xa3   :  { %v162_v62 = vmax.f32 %v146_v53, 0.0  ;;  %v9621_v53 = vld [vmem:[%s15269_s5 + $0x4dc] sm:$0xf0]  ;;  %v7436_v60 = vor.u32 %v9685_v51, %v7435_v49  ;;  %v9505_v44 = vld [vmem:[%s15269_s5 + $0x144] sm:$0xf]  ;;  %v6992_v46 = vor.u32 %v9569_v41, %v6989_v43 }
  0xa4   :  { %v163_v1 = vmax.f32 %v159_v58, 0.0  ;;  %v6635_v58 = vld [vmem:[%s15269_s5 + $0x80] sm:$0xf]  ;;  %v6957_v49 = vld [vmem:[%s15269_s5 + $0x320] sm:$0xf0] }
  0xa5   :  { %v10774_v2 = vpack.c.bf16 %v162_v62, %v162_v62  ;;  %v7180_v62 = vor.u32 %v9621_v53, %v7179_v52  ;;  %v6636_v5 = vor.u32 %v9485_v59, %v6635_v58  ;;  %v6701_v51 = vld [vmem:[%s15269_s5 + $0x120] sm:$0xf0]  ;;  %v6960_v52 = vor.u32 %v9561_v47, %v6957_v49 }
  0xa6   :  { %v10782_v7 = vpack.c.bf16 %v163_v1, %v163_v1  ;;  %v9613_v1 = vld [vmem:[%s15269_s5 + $0x49c] sm:$0xf0]  ;;  %v6893_v58 = vld [vmem:[%s15269_s5 + $0x2a0] sm:$0xf0] }
  0xa7   :  { %568 = vmatmul.bf16.vlgmr.msra.gmra.mxu2 %v10774_v2  ;;  %594 = vmatmul.bf16.vlgmr.msrb.gmra.mxu0 %v10774_v2  ;;  %v9705_v59 = vld [vmem:[%s15269_s5 + $0x784] sm:$0xf] }
  0xa8   :  { %581 = vmatmul.bf16.vlgmr.msra.gmra.mxu3 %v10782_v7  ;;  %607 = vmatmul.bf16.vlgmr.msrb.gmra.mxu1 %v10782_v7  ;;  %v147_v16 = vpop.f32.mrf.mxu0  ;;  %v9673_v41 = vld [vmem:[%s15269_s5 + $0x684] sm:$0xf] }
  0xa9   :  { %v160_v17 = vpop.f32.mrf.mxu1  ;;  %2239 = vmatpush.bf16.msra.mxu3 %v7052_v3  ;;  %2226 = vmatpush.bf16.msra.mxu2 %v6796_v6  ;;  %v6892_v3 = vor.u32 %v9549_v56, %v6891_v55  ;;  %v6603_v6 = vld [vmem:[%s15269_s5 + $0x40] sm:$0xf]  ;;  %v6925_v55 = vld [vmem:[%s15269_s5 + $0x2e0] sm:$0xf0] }
  0xaa   :  { %2265 = vmatpush.bf16.msrb.mxu1 %v7564_v10  ;;  %2252 = vmatpush.bf16.msrb.mxu0 %v7308_v12  ;;  %v7148_v10 = vor.u32 %v9613_v1, %v7147_v0  ;;  %v7115_v12 = vld [vmem:[%s15269_s5 + $0x440] sm:$0xf]  ;;  %v7536_v0 = vor.u32 %v9705_v59, %v7533_v61  ;;  %v9665_v47 = vld [vmem:[%s15269_s5 + $0x644] sm:$0xf] }
  0xab   :  { %v9533_v16 = vld [vmem:[%s15269_s5 + $0x21c] sm:$0xf0]  ;;  %v7116_v22 = vor.u32 %v9605_v13, %v7115_v12  ;;  %v7501_v12 = vld [vmem:[%s15269_s5 + $0x760] sm:$0xf0] }
  0xac   :  { %v6828_v28 = vor.u32 %v9533_v16, %v6827_v15  ;;  %v6637_v15 = vld [vmem:[%s15269_s5 + $0xa0] sm:$0xf0]  ;;  %v11143_v59 = vld [vmem:[%s15268_s4] sm:$0xf] }
  0xad   :  { %2240 = vmatpush.bf16.msra.mxu3 %v7020_v18  ;;  %2227 = vmatpush.bf16.msra.mxu2 %v6764_v21  ;;  %v9585_v18 = vld [vmem:[%s15269_s5 + $0x3c4] sm:$0xf]  ;;  %v7372_v21 = vor.u32 %v9669_v11, %v7371_v9 }
  0xae   :  { %2266 = vmatpush.bf16.msrb.mxu1 %v7532_v24  ;;  %2253 = vmatpush.bf16.msrb.mxu0 %v7276_v26  ;;  %v9521_v24 = vld [vmem:[%s15269_s5 + $0x1c4] sm:$0xf]  ;;  %v7339_v26 = vld [vmem:[%s15269_s5 + $0x600] sm:$0xf]  ;;  %v7056_v32 = vor.u32 %v9585_v18, %v7053_v23 }
  0xaf   :  { %v6800_v34 = vor.u32 %v9521_v24, %v6797_v25  ;;  %v6861_v9 = vld [vmem:[%s15269_s5 + $0x260] sm:$0xf0] }
  0xb0   :  { %v9641_v16 = vld [vmem:[%s15269_s5 + $0x584] sm:$0xf] }
  0xb1   :  { %2241 = vmatpush.bf16.msra.mxu3 %v6988_v30  ;;  %2228 = vmatpush.bf16.msra.mxu2 %v6732_v33  ;;  %v9713_v30 = vld [vmem:[%s15269_s5 + $0x7c4] sm:$0xf] }
  0xb2   :  { %2267 = vmatpush.bf16.msrb.mxu1 %v7500_v36  ;;  %2254 = vmatpush.bf16.msrb.mxu0 %v7244_v38  ;;  %v9577_v33 = vld [vmem:[%s15269_s5 + $0x384] sm:$0xf]  ;;  %v7340_v38 = vor.u32 %v9661_v27, %v7339_v26  ;;  %v7568_v39 = vor.u32 %v9713_v30, %v7565_v31 }
  0xb3   :  { %v9513_v36 = vld [vmem:[%s15269_s5 + $0x184] sm:$0xf]  ;;  %v7024_v40 = vor.u32 %v9577_v33, %v7021_v35 }
  0xb4   :  { %v7277_v18 = vld [vmem:[%s15269_s5 + $0x5a0] sm:$0xf0] }
  0xb5   :  { %2242 = vmatpush.bf16.msra.mxu3 %v6956_v42  ;;  %2229 = vmatpush.bf16.msra.mxu2 %v6700_v45  ;;  %v6768_v42 = vor.u32 %v9513_v36, %v6765_v37  ;;  %v6733_v45 = vld [vmem:[%s15269_s5 + $0x160] sm:$0xf0]  ;;  %v7280_v19 = vor.u32 %v9641_v16, %v7277_v18  ;;  %v6803_v18 = vld [vmem:[%s15269_s5 + $0x1c8] sm:$0xf] }
  0xb6   :  { %2268 = vmatpush.bf16.msrb.mxu1 %v7468_v48  ;;  %2255 = vmatpush.bf16.msrb.mxu0 %v7212_v50  ;;  %v6736_v48 = vor.u32 %v9505_v44, %v6733_v45  ;;  %v9497_v50 = vld [vmem:[%s15269_s5 + $0x104] sm:$0xf] }
  0xb7   :  { %620 = vmatmul.bf16.vlgmr.msrb.gmra.mxu2 %v10774_v2  ;;  %646 = vmatmul.bf16.vlgmr.msra.gmra.mxu0 %v10774_v2  ;;  %v6859_v2 = vld [vmem:[%s15269_s5 + $0x240] sm:$0xf]  ;;  %v6704_v53 = vor.u32 %v9497_v50, %v6701_v51  ;;  %v9689_v23 = vld [vmem:[%s15269_s5 + $0x704] sm:$0xf] }
  0xb8   :  { %633 = vmatmul.bf16.vlgmr.msrb.gmra.mxu3 %v10782_v7  ;;  %659 = vmatmul.bf16.vlgmr.msra.gmra.mxu1 %v10782_v7  ;;  %v9477_v7 = vld [vmem:[%s15269_s5 + $0x5c] sm:$0xf0]  ;;  %v6860_v14 = vor.u32 %v9541_v4, %v6859_v2  ;;  %v6669_v2 = vld [vmem:[%s15269_s5 + $0xe0] sm:$0xf0] }
  0xb9   :  { %2243 = vmatpush.bf16.msra.mxu3 %v6924_v54  ;;  %2230 = vmatpush.bf16.msra.mxu2 %v6668_v57  ;;  %v6604_v17 = vor.u32 %v9477_v7, %v6603_v6  ;;  %v9553_v54 = vld [vmem:[%s15269_s5 + $0x2c4] sm:$0xf] }
  0xba   :  { %2269 = vmatpush.bf16.msrb.mxu1 %v7436_v60  ;;  %2256 = vmatpush.bf16.msrb.mxu0 %v7180_v62  ;;  %v6928_v56 = vor.u32 %v9553_v54, %v6925_v55  ;;  %v9545_v57 = vld [vmem:[%s15269_s5 + $0x284] sm:$0xf]  ;;  %v7083_v62 = vld [vmem:[%s15269_s5 + $0x400] sm:$0xf] }
  0xbb   :  { %v6896_v60 = vor.u32 %v9545_v57, %v6893_v58  ;;  %v7084_v1 = vor.u32 %v9597_v63, %v7083_v62  ;;  %v9649_v4 = vld [vmem:[%s15269_s5 + $0x5c4] sm:$0xf]  ;;  %v233_v62 = vperm.slane %v11143_v59, 1 }
  0xbc   :  { %v7309_v6 = vld [vmem:[%s15269_s5 + $0x5e0] sm:$0xf0] }
  0xbd   :  { %2244 = vmatpush.bf16.msra.mxu3 %v6892_v3  ;;  %2231 = vmatpush.bf16.msra.mxu2 %v6636_v5  ;;  %v9489_v3 = vld [vmem:[%s15269_s5 + $0xc4] sm:$0xf]  ;;  %v7312_v7 = vor.u32 %v9649_v4, %v7309_v6  ;;  %v232_v4 = vperm.slane %v11143_v59, 0  ;;  %v9590_v6 = vld [vmem:[%s15269_s5 + $0x3e4] sm:$0xf0] }
  0xbe   :  { %2270 = vmatpush.bf16.msrb.mxu1 %v7404_v8  ;;  %2257 = vmatpush.bf16.msrb.mxu0 %v7148_v10  ;;  %v6672_v5 = vor.u32 %v9489_v3, %v6669_v2  ;;  %v9537_v8 = vld [vmem:[%s15269_s5 + $0x244] sm:$0xf] }
  0xbf   :  { %v9697_v10 = vld [vmem:[%s15269_s5 + $0x744] sm:$0xf]  ;;  %v6864_v11 = vor.u32 %v9537_v8, %v6861_v9 }
  0xc0   :  { %v7504_v13 = vor.u32 %v9697_v10, %v7501_v12  ;;  %v7469_v24 = vld [vmem:[%s15269_s5 + $0x720] sm:$0xf0] }
  0xc1   :  { %2245 = vmatpush.bf16.msra.mxu3 %v6860_v14  ;;  %2232 = vmatpush.bf16.msra.mxu2 %v6604_v17  ;;  %v9481_v14 = vld [vmem:[%s15269_s5 + $0x84] sm:$0xf]  ;;  %v7472_v25 = vor.u32 %v9689_v23, %v7469_v24  ;;  %v9574_v23 = vld [vmem:[%s15269_s5 + $0x364] sm:$0xf0] }
  0xc2   :  { %2271 = vmatpush.bf16.msrb.mxu1 %v7372_v21  ;;  %2258 = vmatpush.bf16.msrb.mxu0 %v7116_v22  ;;  %v6640_v17 = vor.u32 %v9481_v14, %v6637_v15  ;;  %v6829_v21 = vld [vmem:[%s15269_s5 + $0x220] sm:$0xf0]  ;;  %v9582_v14 = vld [vmem:[%s15269_s5 + $0x3a4] sm:$0xf0] }
  0xc3   :  { %v6832_v22 = vor.u32 %v9529_v20, %v6829_v21  ;;  %v9473_v26 = vld [vmem:[%s15269_s5 + $0x44] sm:$0xf] }
  0xc4   :  { %v6605_v27 = vld [vmem:[%s15269_s5 + $0x60] sm:$0xf0] }
  0xc5   :  { %2246 = vmatpush.bf16.msra.mxu3 %v6828_v28  ;;  %2233 = vmatpush.bf16.msra.mxu2 %v6572_v29  ;;  %v6608_v28 = vor.u32 %v9473_v26, %v6605_v27  ;;  %v9633_v29 = vld [vmem:[%s15269_s5 + $0x544] sm:$0xf]  ;;  %v235_v26 = vperm.slane %v11143_v59, 3  ;;  %v6771_v27 = vld [vmem:[%s15269_s5 + $0x188] sm:$0xf] }
  0xc6   :  { %2272 = vmatpush.bf16.msrb.mxu1 %v7340_v38  ;;  %2259 = vmatpush.bf16.msrb.mxu0 %v7084_v1  ;;  %v7245_v30 = vld [vmem:[%s15269_s5 + $0x560] sm:$0xf0] }
  0xc7   :  { %v7248_v31 = vor.u32 %v9633_v29, %v7245_v30  ;;  %v7437_v33 = vld [vmem:[%s15269_s5 + $0x6e0] sm:$0xf0] }
  0xc8   :  { %v9465_v35 = vld [vmem:[%s15269_s5 + $0x4] sm:$0xf] }
  0xc9   :  { %2291 = vmatpush.bf16.msrb.mxu3 %v7056_v32  ;;  %2278 = vmatpush.bf16.msrb.mxu2 %v6800_v34  ;;  %v9681_v32 = vld [vmem:[%s15269_s5 + $0x6c4] sm:$0xf] }
  0xca   :  { %2317 = vmatpush.bf16.msra.mxu1 %v7568_v39  ;;  %2304 = vmatpush.bf16.msra.mxu0 %v7312_v7  ;;  %v7440_v34 = vor.u32 %v9681_v32, %v7437_v33  ;;  %v6573_v36 = vld [vmem:[%s15269_s5 + $0x20] sm:$0xf0]  ;;  %v6963_v32 = vld [vmem:[%s15269_s5 + $0x308] sm:$0xf] }
  0xcb   :  { %v9625_v37 = vld [vmem:[%s15269_s5 + $0x504] sm:$0xf]  ;;  %v6576_v38 = vor.u32 %v9465_v35, %v6573_v36  ;;  %v9566_v33 = vld [vmem:[%s15269_s5 + $0x324] sm:$0xf0] }
  0xcc   :  { %v7213_v39 = vld [vmem:[%s15269_s5 + $0x520] sm:$0xf0] }
  0xcd   :  { %2292 = vmatpush.bf16.msrb.mxu3 %v7024_v40  ;;  %2279 = vmatpush.bf16.msrb.mxu2 %v6768_v42  ;;  %v7216_v40 = vor.u32 %v9625_v37, %v7213_v39  ;;  %v7405_v42 = vld [vmem:[%s15269_s5 + $0x6a0] sm:$0xf0]  ;;  %v9510_v39 = vld [vmem:[%s15269_s5 + $0x164] sm:$0xf0] }
  0xce   :  { %2318 = vmatpush.bf16.msra.mxu1 %v7536_v0  ;;  %2305 = vmatpush.bf16.msra.mxu0 %v7280_v19  ;;  %v7408_v43 = vor.u32 %v9673_v41, %v7405_v42  ;;  %v9617_v44 = vld [vmem:[%s15269_s5 + $0x4c4] sm:$0xf]  ;;  %v9526_v19 = vld [vmem:[%s15269_s5 + $0x1e4] sm:$0xf0]  ;;  %v234_v41 = vperm.slane %v11143_v59, 2 }
  0xcf   :  { %v7181_v45 = vld [vmem:[%s15269_s5 + $0x4e0] sm:$0xf0]  ;;  %v6804_v24 = vor.u32 %v9526_v19, %v6803_v18  ;;  %v6931_v42 = vld [vmem:[%s15269_s5 + $0x2c8] sm:$0xf] }
  0xd0   :  { %v9609_v50 = vld [vmem:[%s15269_s5 + $0x484] sm:$0xf]  ;;  %v7539_v59 = vld [vmem:[%s15269_s5 + $0x788] sm:$0xf] }
  0xd1   :  { %2293 = vmatpush.bf16.msrb.mxu3 %v6992_v46  ;;  %2280 = vmatpush.bf16.msrb.mxu2 %v6736_v48  ;;  %v7184_v46 = vor.u32 %v9617_v44, %v7181_v45  ;;  %v7373_v48 = vld [vmem:[%s15269_s5 + $0x660] sm:$0xf0]  ;;  %v9558_v44 = vld [vmem:[%s15269_s5 + $0x2e4] sm:$0xf0] }
  0xd2   :  { %2319 = vmatpush.bf16.msra.mxu1 %v7504_v13  ;;  %2306 = vmatpush.bf16.msra.mxu0 %v7248_v31  ;;  %v7376_v49 = vor.u32 %v9665_v47, %v7373_v48  ;;  %v7149_v51 = vld [vmem:[%s15269_s5 + $0x4a0] sm:$0xf0]  ;;  %v7027_v13 = vld [vmem:[%s15269_s5 + $0x388] sm:$0xf] }
  0xd3   :  { %v7341_v54 = vld [vmem:[%s15269_s5 + $0x620] sm:$0xf0]  ;;  %v7028_v20 = vor.u32 %v9582_v14, %v7027_v13  ;;  %v7571_v45 = vld [vmem:[%s15269_s5 + $0x7c8] sm:$0xf] }
  0xd4   :  { %v7117_v57 = vld [vmem:[%s15269_s5 + $0x460] sm:$0xf0]  ;;  %v7283_v18 = vld [vmem:[%s15269_s5 + $0x588] sm:$0xf] }
  0xd5   :  { %2294 = vmatpush.bf16.msrb.mxu3 %v6960_v52  ;;  %2281 = vmatpush.bf16.msrb.mxu2 %v6704_v53  ;;  %v7152_v52 = vor.u32 %v9609_v50, %v7149_v51  ;;  %v9657_v53 = vld [vmem:[%s15269_s5 + $0x604] sm:$0xf]  ;;  %v9502_v50 = vld [vmem:[%s15269_s5 + $0x124] sm:$0xf0] }
  0xd6   :  { %2320 = vmatpush.bf16.msra.mxu1 %v7472_v25  ;;  %2307 = vmatpush.bf16.msra.mxu0 %v7216_v40  ;;  %v7344_v55 = vor.u32 %v9657_v53, %v7341_v54  ;;  %v7085_v61 = vld [vmem:[%s15269_s5 + $0x420] sm:$0xf0]  ;;  %v6964_v40 = vor.u32 %v9566_v33, %v6963_v32  ;;  %v6899_v54 = vld [vmem:[%s15269_s5 + $0x288] sm:$0xf]  ;;  %v7061_v32 = vld [vmem:[%s15269_s5 + $0x3e8] sm:$0xf0] }
  0xd7   :  { %v9646_v19 = vld [vmem:[%s15269_s5 + $0x5a4] sm:$0xf0] }
  0xd8   :  { %v6611_v33 = vld [vmem:[%s15269_s5 + $0x48] sm:$0xf] }
  0xd9   :  { %2295 = vmatpush.bf16.msrb.mxu3 %v6928_v56  ;;  %2282 = vmatpush.bf16.msrb.mxu2 %v6672_v5  ;;  %v9601_v56 = vld [vmem:[%s15269_s5 + $0x444] sm:$0xf]  ;;  %v7059_v5 = vld [vmem:[%s15269_s5 + $0x3c8] sm:$0xf] }
  0xda   :  { %2321 = vmatpush.bf16.msra.mxu1 %v7440_v34  ;;  %2308 = vmatpush.bf16.msra.mxu0 %v7184_v46  ;;  %v7120_v58 = vor.u32 %v9601_v56, %v7117_v57  ;;  %v7060_v9 = vor.u32 %v9590_v6, %v7059_v5  ;;  %v9718_v46 = vld [vmem:[%s15269_s5 + $0x7e4] sm:$0xf0] }
  0xdb   :  { %v7572_v53 = vor.u32 %v9718_v46, %v7571_v45  ;;  %v7029_v45 = vld [vmem:[%s15269_s5 + $0x3a8] sm:$0xf0]  ;;  %v6579_v46 = vld [vmem:[%s15269_s5 + $0x8] sm:$0xf] }
  0xdd   :  { %2296 = vmatpush.bf16.msrb.mxu3 %v6896_v60  ;;  %2283 = vmatpush.bf16.msrb.mxu2 %v6640_v17  ;;  %v9593_v60 = vld [vmem:[%s15269_s5 + $0x404] sm:$0xf] }
  0xde   :  { %2322 = vmatpush.bf16.msra.mxu1 %v7408_v43  ;;  %2309 = vmatpush.bf16.msra.mxu0 %v7152_v52  ;;  %v7088_v63 = vor.u32 %v9593_v60, %v7085_v61  ;;  %v6932_v52 = vor.u32 %v9558_v44, %v6931_v42  ;;  %v9710_v60 = vld [vmem:[%s15269_s5 + $0x7a4] sm:$0xf0]  ;;  %v9578_v44 = vld [vmem:[%s15269_s5 + $0x38c] sm:$0xf] }
  0xdf   :  { %v7540_v6 = vor.u32 %v9710_v60, %v7539_v59  ;;  %v9570_v59 = vld [vmem:[%s15269_s5 + $0x34c] sm:$0xf] }
  0xe0   :  { %v6997_v60 = vld [vmem:[%s15269_s5 + $0x368] sm:$0xf0] }
  0xe1   :  { %2297 = vmatpush.bf16.msrb.mxu3 %v6864_v11  ;;  %2284 = vmatpush.bf16.msrb.mxu2 %v6608_v28  ;;  %v9518_v28 = vld [vmem:[%s15269_s5 + $0x1a4] sm:$0xf0] }
  0xe2   :  { %2323 = vmatpush.bf16.msra.mxu1 %v7376_v49  ;;  %2310 = vmatpush.bf16.msra.mxu0 %v7120_v58  ;;  %v6772_v35 = vor.u32 %v9518_v28, %v6771_v27  ;;  %v6707_v49 = vld [vmem:[%s15269_s5 + $0x108] sm:$0xf] }
  0xe3   :  { %v9550_v58 = vld [vmem:[%s15269_s5 + $0x2a4] sm:$0xf0] }
  0xe4   :  { %v6900_v5 = vor.u32 %v9550_v58, %v6899_v54  ;;  %v7475_v27 = vld [vmem:[%s15269_s5 + $0x708] sm:$0xf] }
  0xe5   :  { %2298 = vmatpush.bf16.msrb.mxu3 %v6832_v22  ;;  %2285 = vmatpush.bf16.msrb.mxu2 %v6576_v38  ;;  %v6995_v22 = vld [vmem:[%s15269_s5 + $0x348] sm:$0xf] }
  0xe6   :  { %2324 = vmatpush.bf16.msra.mxu1 %v7344_v55  ;;  %2311 = vmatpush.bf16.msra.mxu0 %v7088_v63  ;;  %v6996_v30 = vor.u32 %v9574_v23, %v6995_v22  ;;  %v6739_v38 = vld [vmem:[%s15269_s5 + $0x148] sm:$0xf] }
  0xe7   :  { %v6740_v47 = vor.u32 %v9510_v39, %v6739_v38  ;;  %v6675_v63 = vld [vmem:[%s15269_s5 + $0xc8] sm:$0xf] }
  0xe8   :  { %v6835_v23 = vld [vmem:[%s15269_s5 + $0x208] sm:$0xf] }
  0xe9   :  { %v9694_v28 = vld [vmem:[%s15269_s5 + $0x724] sm:$0xf0] }
  0xea   :  { %v7476_v38 = vor.u32 %v9694_v28, %v7475_v27  ;;  %v7411_v54 = vld [vmem:[%s15269_s5 + $0x688] sm:$0xf] }
  0xeb   :  { %v7123_v27 = vld [vmem:[%s15269_s5 + $0x448] sm:$0xf] }
  0xec   :  { %v9606_v28 = vld [vmem:[%s15269_s5 + $0x464] sm:$0xf0] }
 0x124   :  { %v595_v0 = vpop.f32.mrf.mxu0 }
 0x125   :  { %v596_v1 = vadd.f32 %v595_v0, %v233_v62  ;;  %v608_v3 = vpop.f32.mrf.mxu1  ;;  %v6708_v62 = vor.u32 %v9502_v50, %v6707_v49  ;;  %v9630_v49 = vld [vmem:[%s15269_s5 + $0x524] sm:$0xf0] }
 0x127   :  { %v609_v2 = vadd.f32 %v608_v3, %v596_v1  ;;  %v9494_v3 = vld [vmem:[%s15269_s5 + $0xe4] sm:$0xf0] }
 0x128   :  { %v6676_v13 = vor.u32 %v9494_v3, %v6675_v63  ;;  %v9622_v63 = vld [vmem:[%s15269_s5 + $0x4e4] sm:$0xf0]  ;;  %v6773_v3 = vld [vmem:[%s15269_s5 + $0x1a8] sm:$0xf0] }
 0x129   :  { %v665_v7 = vmax.f32 %v609_v2, 0.0  ;;  %v7315_v2 = vld [vmem:[%s15269_s5 + $0x5c8] sm:$0xf] }
 0x12a   :  { %v569_v8 = vpop.f32.mrf.mxu2 }
 0x12b   :  { %v11159_v10 = vpack.c.bf16 %v665_v7, %v665_v7  ;;  %v570_v11 = vadd.f32 %v569_v8, %v232_v4  ;;  %v582_v12 = vpop.f32.mrf.mxu3  ;;  %v9654_v4 = vld [vmem:[%s15269_s5 + $0x5e4] sm:$0xf0] }
 0x12c   :  { %v597_v15 = vpop.f32.mrf.mxu0  ;;  %v6867_v7 = vld [vmem:[%s15269_s5 + $0x248] sm:$0xf]  ;;  %v7316_v14 = vor.u32 %v9654_v4, %v7315_v2  ;;  %v7000_v2 = vor.u32 %v9570_v59, %v6997_v60  ;;  %v7285_v59 = vld [vmem:[%s15269_s5 + $0x5a8] sm:$0xf0] }
 0x12d   :  { %v583_v16 = vadd.f32 %v582_v12, %v570_v11  ;;  %v610_v17 = vpop.f32.mrf.mxu1  ;;  %2247 = vmatmul.bf16.vlgmr.msra.gmra.mxu3 %v11159_v10  ;;  %v9542_v8 = vld [vmem:[%s15269_s5 + $0x264] sm:$0xf0] }
 0x12e   :  { %2343 = vmatpush.bf16.msra.mxu3 %v7060_v9  ;;  %v7507_v11 = vld [vmem:[%s15269_s5 + $0x748] sm:$0xf] }
 0x12f   :  { %v664_v21 = vmax.f32 %v583_v16, 0.0  ;;  %v9702_v12 = vld [vmem:[%s15269_s5 + $0x764] sm:$0xf0] }
 0x130   :  { %v6643_v15 = vld [vmem:[%s15269_s5 + $0x88] sm:$0xf]  ;;  %v7508_v22 = vor.u32 %v9702_v12, %v7507_v11 }
 0x131   :  { %v11180_v25 = vpack.c.bf16 %v664_v21, %v664_v21  ;;  %v9486_v17 = vld [vmem:[%s15269_s5 + $0xa4] sm:$0xf0]  ;;  %v6868_v21 = vor.u32 %v9542_v8, %v6867_v7  ;;  %v9562_v7 = vld [vmem:[%s15269_s5 + $0x30c] sm:$0xf] }
 0x132   :  { %2344 = vmatpush.bf16.msra.mxu3 %v7028_v20  ;;  %v571_v29 = vpop.f32.mrf.mxu2  ;;  %v7379_v4 = vld [vmem:[%s15269_s5 + $0x648] sm:$0xf]  ;;  %v6965_v8 = vld [vmem:[%s15269_s5 + $0x328] sm:$0xf0] }
 0x133   :  { %v584_v31 = vpop.f32.mrf.mxu3  ;;  %2234 = vmatmul.bf16.vlgmr.msra.gmra.mxu2 %v11180_v25  ;;  %v6644_v29 = vor.u32 %v9486_v17, %v6643_v15  ;;  %v7155_v11 = vld [vmem:[%s15269_s5 + $0x488] sm:$0xf]  ;;  %v6741_v15 = vld [vmem:[%s15269_s5 + $0x168] sm:$0xf0]  ;;  %v6968_v17 = vor.u32 %v9562_v7, %v6965_v8 }
 0x134   :  { %2330 = vmatpush.bf16.msra.mxu2 %v6804_v24  ;;  %v647_v34 = vpop.f32.mrf.mxu0  ;;  %v9586_v31 = vld [vmem:[%s15269_s5 + $0x3cc] sm:$0xf]  ;;  %v9614_v12 = vld [vmem:[%s15269_s5 + $0x4a4] sm:$0xf0] }
 0x135   :  { %v648_v36 = vadd.f32 %v647_v34, %v235_v26  ;;  %v660_v37 = vpop.f32.mrf.mxu1  ;;  %v9534_v26 = vld [vmem:[%s15269_s5 + $0x224] sm:$0xf0]  ;;  %v7064_v39 = vor.u32 %v9586_v31, %v7061_v32  ;;  %v6709_v31 = vld [vmem:[%s15269_s5 + $0x128] sm:$0xf0] }
 0x136   :  { %2345 = vmatpush.bf16.msra.mxu3 %v6996_v30  ;;  %v7284_v30 = vor.u32 %v9646_v19, %v7283_v18  ;;  %v9478_v34 = vld [vmem:[%s15269_s5 + $0x64] sm:$0xf0]  ;;  %v6613_v7 = vld [vmem:[%s15269_s5 + $0x68] sm:$0xf0] }
 0x137   :  { %v661_v43 = vadd.f32 %v660_v37, %v648_v36  ;;  %v9638_v36 = vld [vmem:[%s15269_s5 + $0x564] sm:$0xf0]  ;;  %v6836_v37 = vor.u32 %v9534_v26, %v6835_v23  ;;  %v6612_v42 = vor.u32 %v9478_v34, %v6611_v33  ;;  %v9714_v23 = vld [vmem:[%s15269_s5 + $0x7cc] sm:$0xf] }
 0x138   :  { %2331 = vmatpush.bf16.msra.mxu2 %v6772_v35  ;;  %v7251_v35 = vld [vmem:[%s15269_s5 + $0x548] sm:$0xf]  ;;  %v9546_v34 = vld [vmem:[%s15269_s5 + $0x28c] sm:$0xf] }
 0x139   :  { %v667_v48 = vmax.f32 %v661_v43, 0.0  ;;  %v7252_v43 = vor.u32 %v9638_v36, %v7251_v35  ;;  %v7347_v18 = vld [vmem:[%s15269_s5 + $0x608] sm:$0xf]  ;;  %v7124_v35 = vor.u32 %v9606_v28, %v7123_v27  ;;  %v6901_v36 = vld [vmem:[%s15269_s5 + $0x2a8] sm:$0xf0] }
 0x13a   :  { %2346 = vmatpush.bf16.msra.mxu3 %v6964_v40  ;;  %v621_v51 = vpop.f32.mrf.mxu2  ;;  %v7443_v40 = vld [vmem:[%s15269_s5 + $0x6c8] sm:$0xf]  ;;  %v9634_v8 = vld [vmem:[%s15269_s5 + $0x54c] sm:$0xf]  ;;  %v6811_v27 = vld [vmem:[%s15269_s5 + $0x1d0] sm:$0xf] }
 0x13b   :  { %v11224_v55 = vpack.c.bf16 %v667_v48, %v667_v48  ;;  %v622_v56 = vadd.f32 %v621_v51, %v234_v41  ;;  %v634_v57 = vpop.f32.mrf.mxu3  ;;  %v9686_v41 = vld [vmem:[%s15269_s5 + $0x6e4] sm:$0xf0]  ;;  %v9522_v51 = vld [vmem:[%s15269_s5 + $0x1cc] sm:$0xf]  ;;  %v9527_v28 = vld [vmem:[%s15269_s5 + $0x1ec] sm:$0xf0] }
 0x13c   :  { %2332 = vmatpush.bf16.msra.mxu2 %v6740_v47  ;;  %v649_v61 = vpop.f32.mrf.mxu0  ;;  %v9470_v47 = vld [vmem:[%s15269_s5 + $0x24] sm:$0xf0]  ;;  %v7444_v50 = vor.u32 %v9686_v41, %v7443_v40 }
 0x13d   :  { %v635_v0 = vadd.f32 %v634_v57, %v622_v56  ;;  %v662_v1 = vpop.f32.mrf.mxu1  ;;  %2273 = vmatmul.bf16.vlgmr.msrb.gmra.mxu1 %v11224_v55  ;;  %2299 = vmatmul.bf16.vlgmr.msrb.gmra.mxu3 %v11159_v10  ;;  %v7219_v48 = vld [vmem:[%s15269_s5 + $0x508] sm:$0xf]  ;;  %v6580_v57 = vor.u32 %v9470_v47, %v6579_v46  ;;  %v6904_v46 = vor.u32 %v9546_v34, %v6901_v36  ;;  %v7003_v34 = vld [vmem:[%s15269_s5 + $0x350] sm:$0xf] }
 0x13e   :  { %2347 = vmatpush.bf16.msra.mxu3 %v6932_v52  ;;  %2369 = vmatpush.bf16.msrb.mxu1 %v7572_v53  ;;  %v6805_v52 = vld [vmem:[%s15269_s5 + $0x1e8] sm:$0xf0]  ;;  %v7032_v53 = vor.u32 %v9578_v44, %v7029_v45  ;;  %v9678_v56 = vld [vmem:[%s15269_s5 + $0x6a4] sm:$0xf0]  ;;  %v7220_v58 = vor.u32 %v9630_v49, %v7219_v48  ;;  %v6812_v36 = vor.u32 %v9527_v28, %v6811_v27 }
 0x13f   :  { %v666_v9 = vmax.f32 %v635_v0, 0.0  ;;  %v6808_v61 = vor.u32 %v9522_v51, %v6805_v52  ;;  %v7412_v0 = vor.u32 %v9678_v56, %v7411_v54  ;;  %v9514_v1 = vld [vmem:[%s15269_s5 + $0x18c] sm:$0xf]  ;;  %v9662_v19 = vld [vmem:[%s15269_s5 + $0x624] sm:$0xf0] }
 0x140   :  { %2333 = vmatpush.bf16.msra.mxu2 %v6708_v62  ;;  %v7187_v62 = vld [vmem:[%s15269_s5 + $0x4c8] sm:$0xf]  ;;  %v9650_v44 = vld [vmem:[%s15269_s5 + $0x5cc] sm:$0xf] }
 0x141   :  { %v11264_v16 = vpack.c.bf16 %v666_v9, %v666_v9  ;;  %v6776_v9 = vor.u32 %v9514_v1, %v6773_v3  ;;  %v7091_v40 = vld [vmem:[%s15269_s5 + $0x408] sm:$0xf]  ;;  %v7317_v45 = vld [vmem:[%s15269_s5 + $0x5e8] sm:$0xf0] }
 0x142   :  { %2348 = vmatpush.bf16.msra.mxu3 %v6900_v5  ;;  %2370 = vmatpush.bf16.msrb.mxu1 %v7540_v6  ;;  %v623_v20 = vpop.f32.mrf.mxu2  ;;  %v9670_v5 = vld [vmem:[%s15269_s5 + $0x664] sm:$0xf0]  ;;  %v7188_v6 = vor.u32 %v9622_v63, %v7187_v62  ;;  %v9538_v48 = vld [vmem:[%s15269_s5 + $0x24c] sm:$0xf]  ;;  %v7320_v54 = vor.u32 %v9650_v44, %v7317_v45 }
 0x143   :  { %v636_v24 = vpop.f32.mrf.mxu3  ;;  %2260 = vmatmul.bf16.vlgmr.msrb.gmra.mxu0 %v11264_v16  ;;  %2286 = vmatmul.bf16.vlgmr.msrb.gmra.mxu2 %v11180_v25  ;;  %v9554_v20 = vld [vmem:[%s15269_s5 + $0x2cc] sm:$0xf]  ;;  %v9598_v41 = vld [vmem:[%s15269_s5 + $0x424] sm:$0xf0] }
 0x144   :  { %2334 = vmatpush.bf16.msra.mxu2 %v6676_v13  ;;  %2356 = vmatpush.bf16.msrb.mxu0 %v7316_v14  ;;  %v7380_v13 = vor.u32 %v9670_v5, %v7379_v4  ;;  %v9506_v14 = vld [vmem:[%s15269_s5 + $0x14c] sm:$0xf]  ;;  %v7092_v49 = vor.u32 %v9598_v41, %v7091_v40  ;;  %v7067_v4 = vld [vmem:[%s15269_s5 + $0x3d0] sm:$0xf] }
 0x145   :  { %v7573_v24 = vld [vmem:[%s15269_s5 + $0x7e8] sm:$0xf0]  ;;  %v6744_v26 = vor.u32 %v9506_v14, %v6741_v15  ;;  %v9591_v5 = vld [vmem:[%s15269_s5 + $0x3ec] sm:$0xf0] }
 0x146   :  { %2349 = vmatpush.bf16.msra.mxu3 %v6868_v21  ;;  %2371 = vmatpush.bf16.msrb.mxu1 %v7508_v22  ;;  %v7156_v21 = vor.u32 %v9614_v12, %v7155_v11  ;;  %v6933_v22 = vld [vmem:[%s15269_s5 + $0x2e8] sm:$0xf0]  ;;  %v7576_v33 = vor.u32 %v9714_v23, %v7573_v24  ;;  %v6779_v40 = vld [vmem:[%s15269_s5 + $0x190] sm:$0xf] }
 0x147   :  { %v6936_v32 = vor.u32 %v9554_v20, %v6933_v22  ;;  %v9698_v51 = vld [vmem:[%s15269_s5 + $0x74c] sm:$0xf]  ;;  %v9583_v20 = vld [vmem:[%s15269_s5 + $0x3ac] sm:$0xf0] }
 0x148   :  { %2335 = vmatpush.bf16.msra.mxu2 %v6644_v29  ;;  %2357 = vmatpush.bf16.msrb.mxu0 %v7284_v30  ;;  %v7348_v29 = vor.u32 %v9662_v19, %v7347_v18  ;;  %v9498_v30 = vld [vmem:[%s15269_s5 + $0x10c] sm:$0xf]  ;;  %v7035_v19 = vld [vmem:[%s15269_s5 + $0x390] sm:$0xf] }
 0x149   :  { %v7509_v52 = vld [vmem:[%s15269_s5 + $0x768] sm:$0xf0]  ;;  %v9519_v41 = vld [vmem:[%s15269_s5 + $0x1ac] sm:$0xf0] }
 0x14a   :  { %2350 = vmatpush.bf16.msra.mxu3 %v6836_v37  ;;  %2372 = vmatpush.bf16.msrb.mxu1 %v7476_v38  ;;  %v9706_v37 = vld [vmem:[%s15269_s5 + $0x78c] sm:$0xf] }
 0x14b   :  { %v7541_v38 = vld [vmem:[%s15269_s5 + $0x7a8] sm:$0xf0] }
 0x14c   :  { %2336 = vmatpush.bf16.msra.mxu2 %v6612_v42  ;;  %2358 = vmatpush.bf16.msrb.mxu0 %v7252_v43  ;;  %v9490_v42 = vld [vmem:[%s15269_s5 + $0xcc] sm:$0xf]  ;;  %v7544_v47 = vor.u32 %v9706_v37, %v7541_v38 }
 0x14d   :  { %2325 = vmatmul.bf16.vlgmr.msra.gmra.mxu1 %v11224_v55  ;;  %2351 = vmatmul.bf16.vlgmr.msra.gmra.mxu3 %v11159_v10  ;;  %v6677_v43 = vld [vmem:[%s15269_s5 + $0xe8] sm:$0xf0] }
 0x14e   :  { %2395 = vmatpush.bf16.msrb.mxu3 %v7064_v39  ;;  %2373 = vmatpush.bf16.msrb.mxu1 %v7444_v50  ;;  %v6712_v39 = vor.u32 %v9498_v30, %v6709_v31  ;;  %v6869_v50 = vld [vmem:[%s15269_s5 + $0x268] sm:$0xf0] }
 0x14f   :  { %v9482_v56 = vld [vmem:[%s15269_s5 + $0x8c] sm:$0xf]  ;;  %v6872_v60 = vor.u32 %v9538_v48, %v6869_v50  ;;  %v6780_v48 = vor.u32 %v9519_v41, %v6779_v40  ;;  %v9695_v40 = vld [vmem:[%s15269_s5 + $0x72c] sm:$0xf0] }
 0x150   :  { %2337 = vmatpush.bf16.msra.mxu2 %v6580_v57  ;;  %2359 = vmatpush.bf16.msrb.mxu0 %v7220_v58  ;;  %v6645_v57 = vld [vmem:[%s15269_s5 + $0xa8] sm:$0xf0] }
 0x151   :  { %v9642_v58 = vld [vmem:[%s15269_s5 + $0x58c] sm:$0xf]  ;;  %v6648_v3 = vor.u32 %v9482_v56, %v6645_v57 }
 0x152   :  { %2396 = vmatpush.bf16.msrb.mxu3 %v7032_v53  ;;  %2374 = vmatpush.bf16.msrb.mxu1 %v7412_v0  ;;  %v6680_v53 = vor.u32 %v9490_v42, %v6677_v43  ;;  %v9530_v62 = vld [vmem:[%s15269_s5 + $0x20c] sm:$0xf] }
 0x153   :  { %2312 = vmatmul.bf16.vlgmr.msra.gmra.mxu0 %v11264_v16  ;;  %2338 = vmatmul.bf16.vlgmr.msra.gmra.mxu2 %v11180_v25  ;;  %v6837_v63 = vld [vmem:[%s15269_s5 + $0x228] sm:$0xf0] }
 0x154   :  { %2382 = vmatpush.bf16.msrb.mxu2 %v6808_v61  ;;  %2360 = vmatpush.bf16.msrb.mxu0 %v7188_v6  ;;  %v7512_v61 = vor.u32 %v9698_v51, %v7509_v52  ;;  %v9690_v0 = vld [vmem:[%s15269_s5 + $0x70c] sm:$0xf]  ;;  %v6840_v11 = vor.u32 %v9530_v62, %v6837_v63  ;;  %v6747_v52 = vld [vmem:[%s15269_s5 + $0x150] sm:$0xf] }
 0x155   :  { %v7477_v1 = vld [vmem:[%s15269_s5 + $0x728] sm:$0xf0]  ;;  %v9719_v62 = vld [vmem:[%s15269_s5 + $0x7ec] sm:$0xf0] }
 0x156   :  { %2397 = vmatpush.bf16.msrb.mxu3 %v7000_v2  ;;  %2375 = vmatpush.bf16.msrb.mxu1 %v7380_v13  ;;  %v7288_v2 = vor.u32 %v9642_v58, %v7285_v59  ;;  %v9474_v6 = vld [vmem:[%s15269_s5 + $0x4c] sm:$0xf]  ;;  %v7480_v12 = vor.u32 %v9690_v0, %v7477_v1  ;;  %v7068_v13 = vor.u32 %v9591_v5, %v7067_v4  ;;  %v6939_v58 = vld [vmem:[%s15269_s5 + $0x2d0] sm:$0xf] }
 0x157   :  { %v9682_v14 = vld [vmem:[%s15269_s5 + $0x6cc] sm:$0xf]  ;;  %v9503_v4 = vld [vmem:[%s15269_s5 + $0x12c] sm:$0xf0] }
 0x158   :  { %2383 = vmatpush.bf16.msrb.mxu2 %v6776_v9  ;;  %2361 = vmatpush.bf16.msrb.mxu0 %v7156_v21  ;;  %v7253_v9 = vld [vmem:[%s15269_s5 + $0x568] sm:$0xf0] }
 0x159   :  { %v7445_v15 = vld [vmem:[%s15269_s5 + $0x6e8] sm:$0xf0]  ;;  %v7256_v18 = vor.u32 %v9634_v8, %v7253_v9  ;;  %v9551_v9 = vld [vmem:[%s15269_s5 + $0x2ac] sm:$0xf0] }
 0x15a   :  { %2398 = vmatpush.bf16.msrb.mxu3 %v6968_v17  ;;  %2376 = vmatpush.bf16.msrb.mxu1 %v7348_v29  ;;  %v6616_v17 = vor.u32 %v9474_v6, %v6613_v7  ;;  %v9466_v21 = vld [vmem:[%s15269_s5 + $0xc] sm:$0xf]  ;;  %v7036_v29 = vor.u32 %v9583_v20, %v7035_v19  ;;  %v6907_v7 = vld [vmem:[%s15269_s5 + $0x290] sm:$0xf] }
 0x15b   :  { %v6581_v22 = vld [vmem:[%s15269_s5 + $0x28] sm:$0xf0]  ;;  %v7323_v19 = vld [vmem:[%s15269_s5 + $0x5d0] sm:$0xf] }
 0x15c   :  { %2384 = vmatpush.bf16.msrb.mxu2 %v6744_v26  ;;  %2362 = vmatpush.bf16.msrb.mxu0 %v7124_v35  ;;  %v9626_v23 = vld [vmem:[%s15269_s5 + $0x50c] sm:$0xf]  ;;  %v7448_v26 = vor.u32 %v9682_v14, %v7445_v15  ;;  %v9575_v35 = vld [vmem:[%s15269_s5 + $0x36c] sm:$0xf0] }
 0x15d   :  { %2377 = vmatmul.bf16.vlgmr.msrb.gmra.mxu1 %v11224_v55  ;;  %v7221_v24 = vld [vmem:[%s15269_s5 + $0x528] sm:$0xf0]  ;;  %v7004_v42 = vor.u32 %v9575_v35, %v7003_v34  ;;  %v9655_v20 = vld [vmem:[%s15269_s5 + $0x5ec] sm:$0xf0] }
 0x15e   :  { %2399 = vmatpush.bf16.msrb.mxu3 %v6936_v32  ;;  %2421 = vmatpush.bf16.msra.mxu1 %v7576_v33  ;;  %v9674_v30 = vld [vmem:[%s15269_s5 + $0x68c] sm:$0xf]  ;;  %v6584_v32 = vor.u32 %v9466_v21, %v6581_v22  ;;  %v7224_v33 = vor.u32 %v9626_v23, %v7221_v24  ;;  %v6908_v21 = vor.u32 %v9551_v9, %v6907_v7  ;;  %v6875_v24 = vld [vmem:[%s15269_s5 + $0x250] sm:$0xf]  ;;  %v9571_v7 = vld [vmem:[%s15269_s5 + $0x354] sm:$0xf] }
 0x15f   :  { %v7413_v31 = vld [vmem:[%s15269_s5 + $0x6a8] sm:$0xf0]  ;;  %v7324_v28 = vor.u32 %v9655_v20, %v7323_v19  ;;  %v9647_v34 = vld [vmem:[%s15269_s5 + $0x5ac] sm:$0xf0]  ;;  %v7005_v9 = vld [vmem:[%s15269_s5 + $0x370] sm:$0xf0] }
 0x160   :  { %2385 = vmatpush.bf16.msrb.mxu2 %v6712_v39  ;;  %2363 = vmatpush.bf16.msrb.mxu0 %v7092_v49  ;;  %v9618_v37 = vld [vmem:[%s15269_s5 + $0x4cc] sm:$0xf]  ;;  %v7416_v39 = vor.u32 %v9674_v30, %v7413_v31  ;;  %v9703_v30 = vld [vmem:[%s15269_s5 + $0x76c] sm:$0xf0] }
 0x161   :  { %v7189_v38 = vld [vmem:[%s15269_s5 + $0x4e8] sm:$0xf0]  ;;  %v6651_v31 = vld [vmem:[%s15269_s5 + $0x90] sm:$0xf] }
 0x162   :  { %2400 = vmatpush.bf16.msrb.mxu3 %v6904_v46  ;;  %2422 = vmatpush.bf16.msra.mxu1 %v7544_v47  ;;  %v9666_v43 = vld [vmem:[%s15269_s5 + $0x64c] sm:$0xf]  ;;  %v7192_v45 = vor.u32 %v9618_v37, %v7189_v38  ;;  %v6971_v46 = vld [vmem:[%s15269_s5 + $0x310] sm:$0xf] }
 0x163   :  { %2364 = vmatmul.bf16.vlgmr.msrb.gmra.mxu0 %v11264_v16  ;;  %v7381_v44 = vld [vmem:[%s15269_s5 + $0x668] sm:$0xf0]  ;;  %v9567_v47 = vld [vmem:[%s15269_s5 + $0x32c] sm:$0xf0] }
 0x164   :  { %2386 = vmatpush.bf16.msrb.mxu2 %v6680_v53  ;;  %2408 = vmatpush.bf16.msra.mxu0 %v7320_v54  ;;  %v9610_v49 = vld [vmem:[%s15269_s5 + $0x48c] sm:$0xf]  ;;  %v7384_v51 = vor.u32 %v9666_v43, %v7381_v44  ;;  %v9511_v53 = vld [vmem:[%s15269_s5 + $0x16c] sm:$0xf0]  ;;  %v6972_v54 = vor.u32 %v9567_v47, %v6971_v46  ;;  %v9587_v43 = vld [vmem:[%s15269_s5 + $0x3d4] sm:$0xf] }
 0x165   :  { %v7157_v50 = vld [vmem:[%s15269_s5 + $0x4a8] sm:$0xf0]  ;;  %v6748_v63 = vor.u32 %v9511_v53, %v6747_v52  ;;  %v9535_v38 = vld [vmem:[%s15269_s5 + $0x22c] sm:$0xf0]  ;;  %v7069_v44 = vld [vmem:[%s15269_s5 + $0x3f0] sm:$0xf0] }
 0x166   :  { %2401 = vmatpush.bf16.msrb.mxu3 %v6872_v60  ;;  %2423 = vmatpush.bf16.msra.mxu1 %v7512_v61  ;;  %v9658_v56 = vld [vmem:[%s15269_s5 + $0x60c] sm:$0xf]  ;;  %v7160_v59 = vor.u32 %v9610_v49, %v7157_v50  ;;  %v9559_v60 = vld [vmem:[%s15269_s5 + $0x2ec] sm:$0xf0] }
 0x167   :  { %v7349_v57 = vld [vmem:[%s15269_s5 + $0x628] sm:$0xf0]  ;;  %v7579_v61 = vld [vmem:[%s15269_s5 + $0x7d0] sm:$0xf]  ;;  %v6940_v5 = vor.u32 %v9559_v60, %v6939_v58  ;;  %v7037_v58 = vld [vmem:[%s15269_s5 + $0x3b0] sm:$0xf0] }
 0x168   :  { %2387 = vmatpush.bf16.msrb.mxu2 %v6648_v3  ;;  %2409 = vmatpush.bf16.msra.mxu0 %v7288_v2  ;;  %v9602_v0 = vld [vmem:[%s15269_s5 + $0x44c] sm:$0xf]  ;;  %v7352_v3 = vor.u32 %v9658_v56, %v7349_v57  ;;  %v6715_v2 = vld [vmem:[%s15269_s5 + $0x110] sm:$0xf]  ;;  %v7580_v6 = vor.u32 %v9719_v62, %v7579_v61  ;;  %v9579_v57 = vld [vmem:[%s15269_s5 + $0x394] sm:$0xf] }
 0x169   :  { %v7125_v1 = vld [vmem:[%s15269_s5 + $0x468] sm:$0xf0]  ;;  %v9479_v46 = vld [vmem:[%s15269_s5 + $0x6c] sm:$0xf0] }
 0x16a   :  { %2402 = vmatpush.bf16.msrb.mxu3 %v6840_v11  ;;  %2424 = vmatpush.bf16.msra.mxu1 %v7480_v12  ;;  %v7128_v8 = vor.u32 %v9602_v0, %v7125_v1  ;;  %v7547_v11 = vld [vmem:[%s15269_s5 + $0x790] sm:$0xf]  ;;  %v9594_v14 = vld [vmem:[%s15269_s5 + $0x40c] sm:$0xf]  ;;  %v6813_v0 = vld [vmem:[%s15269_s5 + $0x1f0] sm:$0xf0] }
 0x16b   :  { %v9711_v12 = vld [vmem:[%s15269_s5 + $0x7ac] sm:$0xf0]  ;;  %v7093_v15 = vld [vmem:[%s15269_s5 + $0x428] sm:$0xf0] }
 0x16c   :  { %2388 = vmatpush.bf16.msrb.mxu2 %v6616_v17  ;;  %2410 = vmatpush.bf16.msra.mxu0 %v7256_v18  ;;  %v6683_v17 = vld [vmem:[%s15269_s5 + $0xd0] sm:$0xf]  ;;  %v7548_v22 = vor.u32 %v9711_v12, %v7547_v11  ;;  %v7096_v23 = vor.u32 %v9594_v14, %v7093_v15  ;;  %v6781_v14 = vld [vmem:[%s15269_s5 + $0x1b0] sm:$0xf0] }
 0x16d   :  { %2403 = vmatmul.bf16.vlgmr.msrb.gmra.mxu3 %v11159_v10  ;;  %v9495_v18 = vld [vmem:[%s15269_s5 + $0xec] sm:$0xf0] }
 0x16e   :  { %2447 = vmatpush.bf16.msra.mxu3 %v7068_v13  ;;  %2425 = vmatpush.bf16.msra.mxu1 %v7448_v26  ;;  %v6716_v13 = vor.u32 %v9503_v4, %v6715_v2  ;;  %v9543_v26 = vld [vmem:[%s15269_s5 + $0x26c] sm:$0xf0]  ;;  %v6684_v27 = vor.u32 %v9495_v18, %v6683_v17  ;;  %v7008_v17 = vor.u32 %v9571_v7, %v7005_v9  ;;  %v7293_v7 = vld [vmem:[%s15269_s5 + $0x5b0] sm:$0xf0] }
 0x16f   :  { %v6876_v35 = vor.u32 %v9543_v26, %v6875_v24  ;;  %v7259_v47 = vld [vmem:[%s15269_s5 + $0x550] sm:$0xf]  ;;  %v9531_v9 = vld [vmem:[%s15269_s5 + $0x214] sm:$0xf] }
 0x170   :  { %2389 = vmatpush.bf16.msrb.mxu2 %v6584_v32  ;;  %2411 = vmatpush.bf16.msra.mxu0 %v7224_v33  ;;  %v9487_v32 = vld [vmem:[%s15269_s5 + $0xac] sm:$0xf0] }
 0x171   :  { %v7291_v33 = vld [vmem:[%s15269_s5 + $0x590] sm:$0xf]  ;;  %v6652_v41 = vor.u32 %v9487_v32, %v6651_v31 }
 0x172   :  { %2448 = vmatpush.bf16.msra.mxu3 %v7036_v29  ;;  %2426 = vmatpush.bf16.msra.mxu1 %v7416_v39  ;;  %v7515_v29 = vld [vmem:[%s15269_s5 + $0x750] sm:$0xf] }
 0x173   :  { %2390 = vmatmul.bf16.vlgmr.msrb.gmra.mxu2 %v11180_v25  ;;  %v7516_v37 = vor.u32 %v9703_v30, %v7515_v29  ;;  %v7483_v39 = vld [vmem:[%s15269_s5 + $0x710] sm:$0xf] }
 0x174   :  { %2434 = vmatpush.bf16.msra.mxu2 %v6812_v36  ;;  %2412 = vmatpush.bf16.msra.mxu0 %v7192_v45  ;;  %v6843_v36 = vld [vmem:[%s15269_s5 + $0x210] sm:$0xf]  ;;  %v7484_v50 = vor.u32 %v9695_v40, %v7483_v39 }
 0x175   :  { %v6619_v45 = vld [vmem:[%s15269_s5 + $0x50] sm:$0xf]  ;;  %v6844_v49 = vor.u32 %v9535_v38, %v6843_v36  ;;  %v7581_v38 = vld [vmem:[%s15269_s5 + $0x7f0] sm:$0xf0] }
 0x176   :  { %2449 = vmatpush.bf16.msra.mxu3 %v7004_v42  ;;  %2427 = vmatpush.bf16.msra.mxu1 %v7384_v51  ;;  %v7292_v42 = vor.u32 %v9647_v34, %v7291_v33  ;;  %v7072_v51 = vor.u32 %v9587_v43, %v7069_v44  ;;  %v7451_v52 = vld [vmem:[%s15269_s5 + $0x6d0] sm:$0xf]  ;;  %v9555_v34 = vld [vmem:[%s15269_s5 + $0x2d4] sm:$0xf] }
 0x177   :  { %v9687_v53 = vld [vmem:[%s15269_s5 + $0x6ec] sm:$0xf0] }
 0x178   :  { %2435 = vmatpush.bf16.msra.mxu2 %v6780_v48  ;;  %2413 = vmatpush.bf16.msra.mxu0 %v7160_v59  ;;  %v9639_v48 = vld [vmem:[%s15269_s5 + $0x56c] sm:$0xf0]  ;;  %v7452_v1 = vor.u32 %v9687_v53, %v7451_v52 }
 0x179   :  { %v7260_v56 = vor.u32 %v9639_v48, %v7259_v47  ;;  %v6587_v59 = vld [vmem:[%s15269_s5 + $0x10] sm:$0xf]  ;;  %v6909_v47 = vld [vmem:[%s15269_s5 + $0x2b0] sm:$0xf0] }
 0x17a   :  { %2450 = vmatpush.bf16.msra.mxu3 %v6972_v54  ;;  %2428 = vmatpush.bf16.msra.mxu1 %v7352_v3  ;;  %v6620_v54 = vor.u32 %v9479_v46, %v6619_v45  ;;  %v9471_v60 = vld [vmem:[%s15269_s5 + $0x2c] sm:$0xf0]  ;;  %v7040_v3 = vor.u32 %v9579_v57, %v7037_v58  ;;  %v9547_v46 = vld [vmem:[%s15269_s5 + $0x294] sm:$0xf] }
 0x17b   :  { %v7227_v61 = vld [vmem:[%s15269_s5 + $0x510] sm:$0xf]  ;;  %v6588_v2 = vor.u32 %v9471_v60, %v6587_v59  ;;  %v9651_v57 = vld [vmem:[%s15269_s5 + $0x5d4] sm:$0xf]  ;;  %v6912_v59 = vor.u32 %v9547_v46, %v6909_v47  ;;  %v7011_v46 = vld [vmem:[%s15269_s5 + $0x358] sm:$0xf] }
 0x17c   :  { %2436 = vmatpush.bf16.msra.mxu2 %v6748_v63  ;;  %2414 = vmatpush.bf16.msra.mxu0 %v7128_v8  ;;  %v9631_v62 = vld [vmem:[%s15269_s5 + $0x52c] sm:$0xf0]  ;;  %v9523_v63 = vld [vmem:[%s15269_s5 + $0x1d4] sm:$0xf] }
 0x17d   :  { %2429 = vmatmul.bf16.vlgmr.msra.gmra.mxu1 %v11224_v55  ;;  %v7228_v4 = vor.u32 %v9631_v62, %v7227_v61  ;;  %v6816_v8 = vor.u32 %v9523_v63, %v6813_v0  ;;  %v7195_v11 = vld [vmem:[%s15269_s5 + $0x4d0] sm:$0xf]  ;;  %v7325_v58 = vld [vmem:[%s15269_s5 + $0x5f0] sm:$0xf0] }
 0x17e   :  { %2451 = vmatpush.bf16.msra.mxu3 %v6940_v5  ;;  %2473 = vmatpush.bf16.msrb.mxu1 %v7580_v6  ;;  %v7419_v5 = vld [vmem:[%s15269_s5 + $0x690] sm:$0xf]  ;;  %v9539_v63 = vld [vmem:[%s15269_s5 + $0x254] sm:$0xf] }
 0x17f   :  { %v9679_v6 = vld [vmem:[%s15269_s5 + $0x6ac] sm:$0xf0]  ;;  %v6877_v0 = vld [vmem:[%s15269_s5 + $0x270] sm:$0xf0] }
 0x180   :  { %2437 = vmatpush.bf16.msra.mxu2 %v6716_v13  ;;  %2415 = vmatpush.bf16.msra.mxu0 %v7096_v23  ;;  %v9623_v12 = vld [vmem:[%s15269_s5 + $0x4ec] sm:$0xf0]  ;;  %v9515_v13 = vld [vmem:[%s15269_s5 + $0x194] sm:$0xf]  ;;  %v7420_v15 = vor.u32 %v9679_v6, %v7419_v5 }
 0x181   :  { %v7196_v18 = vor.u32 %v9623_v12, %v7195_v11  ;;  %v7387_v19 = vld [vmem:[%s15269_s5 + $0x650] sm:$0xf]  ;;  %v6973_v23 = vld [vmem:[%s15269_s5 + $0x330] sm:$0xf0] }
 0x182   :  { %2452 = vmatpush.bf16.msra.mxu3 %v6908_v21  ;;  %2474 = vmatpush.bf16.msrb.mxu1 %v7548_v22  ;;  %v9671_v20 = vld [vmem:[%s15269_s5 + $0x66c] sm:$0xf0]  ;;  %v9563_v21 = vld [vmem:[%s15269_s5 + $0x314] sm:$0xf]  ;;  %v6784_v22 = vor.u32 %v9515_v13, %v6781_v14 }
 0x183   :  { %2416 = vmatmul.bf16.vlgmr.msra.gmra.mxu0 %v11264_v16  ;;  %v7163_v24 = vld [vmem:[%s15269_s5 + $0x490] sm:$0xf]  ;;  %v7388_v29 = vor.u32 %v9671_v20, %v7387_v19  ;;  %v6976_v31 = vor.u32 %v9563_v21, %v6973_v23  ;;  %v6653_v5 = vld [vmem:[%s15269_s5 + $0xb0] sm:$0xf0]  ;;  %v9592_v19 = vld [vmem:[%s15269_s5 + $0x3f4] sm:$0xf0] }
 0x184   :  { %2438 = vmatpush.bf16.msra.mxu2 %v6684_v27  ;;  %2460 = vmatpush.bf16.msrb.mxu0 %v7324_v28  ;;  %v9615_v26 = vld [vmem:[%s15269_s5 + $0x4ac] sm:$0xf0]  ;;  %v9507_v27 = vld [vmem:[%s15269_s5 + $0x154] sm:$0xf] }
 0x185   :  { %v6749_v28 = vld [vmem:[%s15269_s5 + $0x170] sm:$0xf0]  ;;  %v7355_v30 = vld [vmem:[%s15269_s5 + $0x610] sm:$0xf]  ;;  %v7164_v32 = vor.u32 %v9615_v26, %v7163_v24 }
 0x186   :  { %2453 = vmatpush.bf16.msra.mxu3 %v6876_v35  ;;  %2475 = vmatpush.bf16.msrb.mxu1 %v7516_v37  ;;  %v9663_v33 = vld [vmem:[%s15269_s5 + $0x62c] sm:$0xf0]  ;;  %v6941_v35 = vld [vmem:[%s15269_s5 + $0x2f0] sm:$0xf0]  ;;  %v6752_v36 = vor.u32 %v9507_v27, %v6749_v28 }
 0x187   :  { %v9715_v37 = vld [vmem:[%s15269_s5 + $0x7d4] sm:$0xf]  ;;  %v7131_v39 = vld [vmem:[%s15269_s5 + $0x450] sm:$0xf]  ;;  %v7356_v43 = vor.u32 %v9663_v33, %v7355_v30  ;;  %v6944_v44 = vor.u32 %v9555_v34, %v6941_v35  ;;  %v9584_v33 = vld [vmem:[%s15269_s5 + $0x3b4] sm:$0xf0] }
 0x188   :  { %2439 = vmatpush.bf16.msra.mxu2 %v6652_v41  ;;  %2461 = vmatpush.bf16.msrb.mxu0 %v7292_v42  ;;  %v9607_v40 = vld [vmem:[%s15269_s5 + $0x46c] sm:$0xf0]  ;;  %v9499_v41 = vld [vmem:[%s15269_s5 + $0x114] sm:$0xf]  ;;  %v7584_v45 = vor.u32 %v9715_v37, %v7581_v38  ;;  %v6819_v38 = vld [vmem:[%s15269_s5 + $0x1d8] sm:$0xf] }
 0x189   :  { %v6717_v42 = vld [vmem:[%s15269_s5 + $0x130] sm:$0xf0]  ;;  %v7132_v48 = vor.u32 %v9607_v40, %v7131_v39  ;;  %v7099_v52 = vld [vmem:[%s15269_s5 + $0x410] sm:$0xf]  ;;  %v9528_v39 = vld [vmem:[%s15269_s5 + $0x1f4] sm:$0xf0] }
 0x18a   :  { %2454 = vmatpush.bf16.msra.mxu3 %v6844_v49  ;;  %2476 = vmatpush.bf16.msrb.mxu1 %v7484_v50  ;;  %v6720_v49 = vor.u32 %v9499_v41, %v6717_v42  ;;  %v9707_v50 = vld [vmem:[%s15269_s5 + $0x794] sm:$0xf]  ;;  %v9599_v53 = vld [vmem:[%s15269_s5 + $0x42c] sm:$0xf0]  ;;  %v6820_v47 = vor.u32 %v9528_v39, %v6819_v38 }
 0x18b   :  { %v7100_v61 = vor.u32 %v9599_v53, %v7099_v52  ;;  %v9643_v6 = vld [vmem:[%s15269_s5 + $0x594] sm:$0xf]  ;;  %v9520_v52 = vld [vmem:[%s15269_s5 + $0x1b4] sm:$0xf0] }
 0x18c   :  { %2440 = vmatpush.bf16.msra.mxu2 %v6620_v54  ;;  %2462 = vmatpush.bf16.msrb.mxu0 %v7260_v56  ;;  %v9491_v54 = vld [vmem:[%s15269_s5 + $0xd4] sm:$0xf] }
 0x18d   :  { %2455 = vmatmul.bf16.vlgmr.msra.gmra.mxu3 %v11159_v10  ;;  %v6685_v56 = vld [vmem:[%s15269_s5 + $0xf0] sm:$0xf0] }
 0x18e   :  { %2499 = vmatpush.bf16.msrb.mxu3 %v7072_v51  ;;  %2477 = vmatpush.bf16.msrb.mxu1 %v7452_v1  ;;  %v7549_v51 = vld [vmem:[%s15269_s5 + $0x7b0] sm:$0xf0]  ;;  %v6688_v62 = vor.u32 %v9491_v54, %v6685_v56 }
 0x18f   :  { %v7552_v60 = vor.u32 %v9707_v50, %v7549_v51  ;;  %v9699_v1 = vld [vmem:[%s15269_s5 + $0x754] sm:$0xf]  ;;  %v6787_v51 = vld [vmem:[%s15269_s5 + $0x198] sm:$0xf] }
 0x190   :  { %2441 = vmatpush.bf16.msra.mxu2 %v6588_v2  ;;  %2463 = vmatpush.bf16.msrb.mxu0 %v7228_v4  ;;  %v7517_v2 = vld [vmem:[%s15269_s5 + $0x770] sm:$0xf0] }
 0x191   :  { %v9483_v4 = vld [vmem:[%s15269_s5 + $0x94] sm:$0xf]  ;;  %v7520_v11 = vor.u32 %v9699_v1, %v7517_v2  ;;  %v9512_v1 = vld [vmem:[%s15269_s5 + $0x174] sm:$0xf0] }
 0x192   :  { %2500 = vmatpush.bf16.msrb.mxu3 %v7040_v3  ;;  %2478 = vmatpush.bf16.msrb.mxu1 %v7420_v15  ;;  %v7328_v3 = vor.u32 %v9651_v57, %v7325_v58  ;;  %v6656_v12 = vor.u32 %v9483_v4, %v6653_v5  ;;  %v6845_v13 = vld [vmem:[%s15269_s5 + $0x230] sm:$0xf0] }
 0x193   :  { %2442 = vmatmul.bf16.vlgmr.msra.gmra.mxu2 %v11180_v25  ;;  %v9691_v14 = vld [vmem:[%s15269_s5 + $0x714] sm:$0xf]  ;;  %v6848_v24 = vor.u32 %v9531_v9, %v6845_v13 }
 0x194   :  { %2486 = vmatpush.bf16.msrb.mxu2 %v6816_v8  ;;  %2464 = vmatpush.bf16.msrb.mxu0 %v7196_v18  ;;  %v6880_v8 = vor.u32 %v9539_v63, %v6877_v0  ;;  %v7485_v15 = vld [vmem:[%s15269_s5 + $0x730] sm:$0xf0]  ;;  %v7075_v18 = vld [vmem:[%s15269_s5 + $0x3d8] sm:$0xf] }
 0x195   :  { %v9475_v20 = vld [vmem:[%s15269_s5 + $0x54] sm:$0xf]  ;;  %v7488_v26 = vor.u32 %v9691_v14, %v7485_v15  ;;  %v7076_v27 = vor.u32 %v9592_v19, %v7075_v18  ;;  %v6755_v0 = vld [vmem:[%s15269_s5 + $0x158] sm:$0xf] }
 0x196   :  { %2501 = vmatpush.bf16.msrb.mxu3 %v7008_v17  ;;  %2479 = vmatpush.bf16.msrb.mxu1 %v7388_v29  ;;  %v7296_v17 = vor.u32 %v9643_v6, %v7293_v7  ;;  %v6621_v21 = vld [vmem:[%s15269_s5 + $0x70] sm:$0xf0]  ;;  %v6947_v7 = vld [vmem:[%s15269_s5 + $0x2d8] sm:$0xf]  ;;  %v6756_v9 = vor.u32 %v9512_v1, %v6755_v0  ;;  %v9588_v0 = vld [vmem:[%s15269_s5 + $0x3dc] sm:$0xf] }
 0x197   :  { %v7261_v23 = vld [vmem:[%s15269_s5 + $0x570] sm:$0xf0]  ;;  %v6624_v30 = vor.u32 %v9475_v20, %v6621_v21  ;;  %v6723_v15 = vld [vmem:[%s15269_s5 + $0x118] sm:$0xf]  ;;  %v7077_v1 = vld [vmem:[%s15269_s5 + $0x3f8] sm:$0xf0] }
 0x198   :  { %2487 = vmatpush.bf16.msrb.mxu2 %v6784_v22  ;;  %2465 = vmatpush.bf16.msrb.mxu0 %v7164_v32  ;;  %v9635_v22 = vld [vmem:[%s15269_s5 + $0x554] sm:$0xf]  ;;  %v7043_v32 = vld [vmem:[%s15269_s5 + $0x398] sm:$0xf] }
 0x199   :  { %v9683_v28 = vld [vmem:[%s15269_s5 + $0x6d4] sm:$0xf]  ;;  %v7044_v41 = vor.u32 %v9584_v33, %v7043_v32  ;;  %v6691_v32 = vld [vmem:[%s15269_s5 + $0xd8] sm:$0xf] }
 0x19a   :  { %2502 = vmatpush.bf16.msrb.mxu3 %v6976_v31  ;;  %2480 = vmatpush.bf16.msrb.mxu1 %v7356_v43  ;;  %v7453_v29 = vld [vmem:[%s15269_s5 + $0x6f0] sm:$0xf0]  ;;  %v7264_v31 = vor.u32 %v9635_v22, %v7261_v23  ;;  %v6915_v22 = vld [vmem:[%s15269_s5 + $0x298] sm:$0xf] }
 0x19b   :  { %v9467_v34 = vld [vmem:[%s15269_s5 + $0x14] sm:$0xf]  ;;  %v7456_v40 = vor.u32 %v9683_v28, %v7453_v29  ;;  %v9552_v23 = vld [vmem:[%s15269_s5 + $0x2b4] sm:$0xf0] }
 0x19c   :  { %2488 = vmatpush.bf16.msrb.mxu2 %v6752_v36  ;;  %2466 = vmatpush.bf16.msrb.mxu0 %v7132_v48  ;;  %v6589_v35 = vld [vmem:[%s15269_s5 + $0x30] sm:$0xf0]  ;;  %v9576_v48 = vld [vmem:[%s15269_s5 + $0x374] sm:$0xf0] }
 0x19d   :  { %2481 = vmatmul.bf16.vlgmr.msrb.gmra.mxu1 %v11224_v55  ;;  %v9627_v36 = vld [vmem:[%s15269_s5 + $0x514] sm:$0xf]  ;;  %v6592_v42 = vor.u32 %v9467_v34, %v6589_v35  ;;  %v7012_v54 = vor.u32 %v9576_v48, %v7011_v46  ;;  %v7555_v28 = vld [vmem:[%s15269_s5 + $0x798] sm:$0xf] }
 0x19e   :  { %2503 = vmatpush.bf16.msrb.mxu3 %v6944_v44  ;;  %2525 = vmatpush.bf16.msra.mxu1 %v7584_v45  ;;  %v7229_v37 = vld [vmem:[%s15269_s5 + $0x530] sm:$0xf0]  ;;  %v9712_v29 = vld [vmem:[%s15269_s5 + $0x7b4] sm:$0xf0] }
 0x19f   :  { %v7232_v43 = vor.u32 %v9627_v36, %v7229_v37  ;;  %v9675_v44 = vld [vmem:[%s15269_s5 + $0x694] sm:$0xf]  ;;  %v9496_v33 = vld [vmem:[%s15269_s5 + $0xf4] sm:$0xf0]  ;;  %v6916_v37 = vor.u32 %v9552_v23, %v6915_v22  ;;  %v7556_v38 = vor.u32 %v9712_v29, %v7555_v28 }
 0x1a0   :  { %2489 = vmatpush.bf16.msrb.mxu2 %v6720_v49  ;;  %2467 = vmatpush.bf16.msrb.mxu0 %v7100_v61  ;;  %v7421_v45 = vld [vmem:[%s15269_s5 + $0x6b0] sm:$0xf0]  ;;  %v9568_v61 = vld [vmem:[%s15269_s5 + $0x334] sm:$0xf0] }
 0x1a1   :  { %v9619_v49 = vld [vmem:[%s15269_s5 + $0x4d4] sm:$0xf]  ;;  %v7424_v53 = vor.u32 %v9675_v44, %v7421_v45  ;;  %v7331_v35 = vld [vmem:[%s15269_s5 + $0x5d8] sm:$0xf] }
 0x1a2   :  { %2504 = vmatpush.bf16.msrb.mxu3 %v6912_v59  ;;  %2526 = vmatpush.bf16.msra.mxu1 %v7552_v60  ;;  %v7197_v50 = vld [vmem:[%s15269_s5 + $0x4f0] sm:$0xf0]  ;;  %v6979_v59 = vld [vmem:[%s15269_s5 + $0x318] sm:$0xf]  ;;  %v6788_v60 = vor.u32 %v9520_v52, %v6787_v51 }
 0x1a3   :  { %2468 = vmatmul.bf16.vlgmr.msrb.gmra.mxu0 %v11264_v16  ;;  %v7200_v56 = vor.u32 %v9619_v49, %v7197_v50  ;;  %v9667_v57 = vld [vmem:[%s15269_s5 + $0x654] sm:$0xf]  ;;  %v6980_v4 = vor.u32 %v9568_v61, %v6979_v59  ;;  %v9656_v36 = vld [vmem:[%s15269_s5 + $0x5f4] sm:$0xf0] }
 0x1a4   :  { %2490 = vmatpush.bf16.msrb.mxu2 %v6688_v62  ;;  %2512 = vmatpush.bf16.msra.mxu0 %v7328_v3  ;;  %v7389_v58 = vld [vmem:[%s15269_s5 + $0x670] sm:$0xf0]  ;;  %v7332_v45 = vor.u32 %v9656_v36, %v7331_v35  ;;  %v9704_v46 = vld [vmem:[%s15269_s5 + $0x774] sm:$0xf0]  ;;  %v9572_v36 = vld [vmem:[%s15269_s5 + $0x35c] sm:$0xf] }
 0x1a5   :  { %v9611_v62 = vld [vmem:[%s15269_s5 + $0x494] sm:$0xf]  ;;  %v7392_v3 = vor.u32 %v9667_v57, %v7389_v58  ;;  %v9488_v48 = vld [vmem:[%s15269_s5 + $0xb4] sm:$0xf0] }
 0x1a6   :  { %2505 = vmatpush.bf16.msrb.mxu3 %v6880_v8  ;;  %2527 = vmatpush.bf16.msra.mxu1 %v7520_v11  ;;  %v7165_v63 = vld [vmem:[%s15269_s5 + $0x4b0] sm:$0xf0]  ;;  %v9560_v8 = vld [vmem:[%s15269_s5 + $0x2f4] sm:$0xf0] }
 0x1a7   :  { %v9659_v2 = vld [vmem:[%s15269_s5 + $0x614] sm:$0xf]  ;;  %v7168_v5 = vor.u32 %v9611_v62, %v7165_v63  ;;  %v7587_v11 = vld [vmem:[%s15269_s5 + $0x7d8] sm:$0xf]  ;;  %v6948_v20 = vor.u32 %v9560_v8, %v6947_v7  ;;  %v7080_v8 = vor.u32 %v9588_v0, %v7077_v1 }
 0x1a8   :  { %2491 = vmatpush.bf16.msrb.mxu2 %v6656_v12  ;;  %2513 = vmatpush.bf16.msra.mxu0 %v7296_v17  ;;  %v7357_v6 = vld [vmem:[%s15269_s5 + $0x630] sm:$0xf0]  ;;  %v9720_v12 = vld [vmem:[%s15269_s5 + $0x7f4] sm:$0xf0] }
 0x1a9   :  { %v9603_v13 = vld [vmem:[%s15269_s5 + $0x454] sm:$0xf]  ;;  %v9504_v17 = vld [vmem:[%s15269_s5 + $0x134] sm:$0xf0]  ;;  %v7360_v18 = vor.u32 %v9659_v2, %v7357_v6  ;;  %v7588_v21 = vor.u32 %v9720_v12, %v7587_v11 }
 0x1aa   :  { %2506 = vmatpush.bf16.msrb.mxu3 %v6848_v24  ;;  %2528 = vmatpush.bf16.msra.mxu1 %v7488_v26  ;;  %v7133_v14 = vld [vmem:[%s15269_s5 + $0x470] sm:$0xf0]  ;;  %v12016_v24 = vld [vmem:[%s15270_s6] sm:$0xff]  ;;  %v7299_v50 = vld [vmem:[%s15269_s5 + $0x598] sm:$0xf] }
 0x1ab   :  { %v7136_v26 = vor.u32 %v9603_v13, %v7133_v14  ;;  %v930_v34 = vperm.slane %v12016_v24, 0  ;;  %v9648_v51 = vld [vmem:[%s15269_s5 + $0x5b4] sm:$0xf0] }
 0x1ac   :  { %2492 = vmatpush.bf16.msrb.mxu2 %v6624_v30  ;;  %2514 = vmatpush.bf16.msra.mxu0 %v7264_v31  ;;  %v9595_v30 = vld [vmem:[%s15269_s5 + $0x414] sm:$0xf]  ;;  %v9536_v58 = vld [vmem:[%s15269_s5 + $0x234] sm:$0xf0]  ;;  %v7300_v63 = vor.u32 %v9648_v51, %v7299_v50  ;;  %v9564_v50 = vld [vmem:[%s15269_s5 + $0x31c] sm:$0xf] }
 0x1ad   :  { %2507 = vmatmul.bf16.vlgmr.msrb.gmra.mxu3 %v11159_v10  ;;  %v7101_v31 = vld [vmem:[%s15269_s5 + $0x430] sm:$0xf0]  ;;  %v7491_v59 = vld [vmem:[%s15269_s5 + $0x718] sm:$0xf] }
 0x1ae   :  { %2551 = vmatpush.bf16.msra.mxu3 %v7076_v27  ;;  %2529 = vmatpush.bf16.msra.mxu1 %v7456_v40  ;;  %v6724_v27 = vor.u32 %v9504_v17, %v6723_v15  ;;  %v7104_v39 = vor.u32 %v9595_v30, %v7101_v31  ;;  %v6692_v40 = vor.u32 %v9496_v33, %v6691_v32  ;;  %v9480_v2 = vld [vmem:[%s15269_s5 + $0x74] sm:$0xf0]  ;;  %v9580_v15 = vld [vmem:[%s15269_s5 + $0x39c] sm:$0xf] }
 0x1af   :  { %v9688_v11 = vld [vmem:[%s15269_s5 + $0x6f4] sm:$0xf0]  ;;  %v7045_v17 = vld [vmem:[%s15269_s5 + $0x3b8] sm:$0xf0] }
 0x1b0   :  { %2493 = vmatpush.bf16.msrb.mxu2 %v6592_v42  ;;  %2515 = vmatpush.bf16.msra.mxu0 %v7232_v43  ;;  %v2248_v19 = vpop.f32.mrf.mxu3  ;;  %v9544_v42 = vld [vmem:[%s15269_s5 + $0x274] sm:$0xf0]  ;;  %v7048_v30 = vor.u32 %v9580_v15, %v7045_v17  ;;  %v9548_v17 = vld [vmem:[%s15269_s5 + $0x29c] sm:$0xf] }
 0x1b1   :  { %v7523_v43 = vld [vmem:[%s15269_s5 + $0x758] sm:$0xf] }
 0x1b2   :  { %2552 = vmatpush.bf16.msra.mxu3 %v7044_v41  ;;  %2530 = vmatpush.bf16.msra.mxu1 %v7424_v53  ;;  %v6883_v41 = vld [vmem:[%s15269_s5 + $0x258] sm:$0xf] }
 0x1b3   :  { %2494 = vmatmul.bf16.vlgmr.msrb.gmra.mxu2 %v11180_v25  ;;  %v6884_v53 = vor.u32 %v9544_v42, %v6883_v41  ;;  %v9680_v35 = vld [vmem:[%s15269_s5 + $0x6b4] sm:$0xf0]  ;;  %v9516_v42 = vld [vmem:[%s15269_s5 + $0x19c] sm:$0xf] }
 0x1b4   :  { %2538 = vmatpush.bf16.msra.mxu2 %v6820_v47  ;;  %2516 = vmatpush.bf16.msra.mxu0 %v7200_v56  ;;  %v6659_v47 = vld [vmem:[%s15269_s5 + $0x98] sm:$0xf]  ;;  %v7524_v56 = vor.u32 %v9704_v46, %v7523_v43  ;;  %v6789_v43 = vld [vmem:[%s15269_s5 + $0x1b8] sm:$0xf0] }
 0x1b5   :  { %v6660_v57 = vor.u32 %v9488_v48, %v6659_v47  ;;  %v9624_v41 = vld [vmem:[%s15269_s5 + $0x4f4] sm:$0xf0]  ;;  %v6792_v51 = vor.u32 %v9516_v42, %v6789_v43  ;;  %v9700_v42 = vld [vmem:[%s15269_s5 + $0x75c] sm:$0xf] }
 0x1b6   :  { %2553 = vmatpush.bf16.msra.mxu3 %v7012_v54  ;;  %2531 = vmatpush.bf16.msra.mxu1 %v7392_v3  ;;  %v2235_v44 = vpop.f32.mrf.mxu2  ;;  %v6851_v54 = vld [vmem:[%s15269_s5 + $0x218] sm:$0xf] }
 0x1b7   :  { %v2236_v49 = vadd.f32 %v2235_v44, %v930_v34  ;;  %v6627_v3 = vld [vmem:[%s15269_s5 + $0x58] sm:$0xf]  ;;  %v6852_v6 = vor.u32 %v9536_v58, %v6851_v54  ;;  %v9508_v58 = vld [vmem:[%s15269_s5 + $0x15c] sm:$0xf] }
 0x1b8   :  { %2539 = vmatpush.bf16.msra.mxu2 %v6788_v60  ;;  %2517 = vmatpush.bf16.msra.mxu0 %v7168_v5  ;;  %v2250_v52 = vpop.f32.mrf.mxu3  ;;  %v9696_v60 = vld [vmem:[%s15269_s5 + $0x734] sm:$0xf0]  ;;  %v6628_v13 = vor.u32 %v9480_v2, %v6627_v3  ;;  %v9556_v3 = vld [vmem:[%s15269_s5 + $0x2dc] sm:$0xf] }
 0x1b9   :  { %v2249_v61 = vadd.f32 %v2248_v19, %v2236_v49  ;;  %v9640_v5 = vld [vmem:[%s15269_s5 + $0x574] sm:$0xf0]  ;;  %v7492_v7 = vor.u32 %v9696_v60, %v7491_v59  ;;  %v6981_v52 = vld [vmem:[%s15269_s5 + $0x338] sm:$0xf0] }
 0x1ba   :  { %2554 = vmatpush.bf16.msra.mxu3 %v6980_v4  ;;  %2532 = vmatpush.bf16.msra.mxu1 %v7360_v18  ;;  %v2274_v62 = vpop.f32.mrf.mxu1  ;;  %v7267_v4 = vld [vmem:[%s15269_s5 + $0x558] sm:$0xf]  ;;  %v6757_v59 = vld [vmem:[%s15269_s5 + $0x178] sm:$0xf0] }
 0x1bb   :  { %v7268_v14 = vor.u32 %v9640_v5, %v7267_v4  ;;  %v6595_v18 = vld [vmem:[%s15269_s5 + $0x18] sm:$0xf]  ;;  %v6949_v2 = vld [vmem:[%s15269_s5 + $0x2f8] sm:$0xf0]  ;;  %v6760_v4 = vor.u32 %v9508_v58, %v6757_v59 }
 0x1bc   :  { %2540 = vmatpush.bf16.msra.mxu2 %v6756_v9  ;;  %2518 = vmatpush.bf16.msra.mxu0 %v7136_v26  ;;  %v7459_v9 = vld [vmem:[%s15269_s5 + $0x6d8] sm:$0xf]  ;;  %v9524_v26 = vld [vmem:[%s15269_s5 + $0x1dc] sm:$0xf] }
 0x1bd   :  { %2533 = vmatmul.bf16.vlgmr.msra.gmra.mxu1 %v11224_v55  ;;  %v9472_v19 = vld [vmem:[%s15269_s5 + $0x34] sm:$0xf0]  ;;  %v7460_v29 = vor.u32 %v9688_v11, %v7459_v9  ;;  %v9716_v5 = vld [vmem:[%s15269_s5 + $0x7dc] sm:$0xf] }
 0x1be   :  { %2555 = vmatpush.bf16.msra.mxu3 %v6948_v20  ;;  %2577 = vmatpush.bf16.msrb.mxu1 %v7588_v21  ;;  %v2237_v12 = vpop.f32.mrf.mxu2  ;;  %v7235_v20 = vld [vmem:[%s15269_s5 + $0x518] sm:$0xf]  ;;  %v6596_v32 = vor.u32 %v9472_v19, %v6595_v18  ;;  %v9500_v9 = vld [vmem:[%s15269_s5 + $0x11c] sm:$0xf] }
 0x1bf   :  { %v9632_v21 = vld [vmem:[%s15269_s5 + $0x534] sm:$0xf0]  ;;  %v6725_v11 = vld [vmem:[%s15269_s5 + $0x138] sm:$0xf0] }
 0x1c0   :  { %2541 = vmatpush.bf16.msra.mxu2 %v6724_v27  ;;  %2519 = vmatpush.bf16.msra.mxu0 %v7104_v39  ;;  %v2261_v22 = vpop.f32.mrf.mxu0  ;;  %v12123_v23 = vpop.f32.mrf.mxu3  ;;  %v6821_v27 = vld [vmem:[%s15269_s5 + $0x1f8] sm:$0xf0]  ;;  %v7236_v33 = vor.u32 %v9632_v21, %v7235_v20  ;;  %v7427_v34 = vld [vmem:[%s15269_s5 + $0x698] sm:$0xf]  ;;  %v6728_v20 = vor.u32 %v9500_v9, %v6725_v11 }
 0x1c1   :  { %v2262_v28 = vadd.f32 %v2261_v22, %v2249_v61  ;;  %v7013_v39 = vld [vmem:[%s15269_s5 + $0x378] sm:$0xf0]  ;;  %v7428_v44 = vor.u32 %v9680_v35, %v7427_v34  ;;  %v7395_v48 = vld [vmem:[%s15269_s5 + $0x658] sm:$0xf] }
 0x1c2   :  { %2556 = vmatpush.bf16.msra.mxu3 %v6916_v37  ;;  %2578 = vmatpush.bf16.msrb.mxu1 %v7556_v38  ;;  %v2276_v31 = vpop.f32.mrf.mxu1  ;;  %v6824_v38 = vor.u32 %v9524_v26, %v6821_v27  ;;  %v7016_v46 = vor.u32 %v9572_v36, %v7013_v39  ;;  %v9672_v49 = vld [vmem:[%s15269_s5 + $0x674] sm:$0xf0]  ;;  %v6917_v18 = vld [vmem:[%s15269_s5 + $0x2b8] sm:$0xf0] }
 0x1c3   :  { %2520 = vmatmul.bf16.vlgmr.msra.gmra.mxu0 %v11264_v16  ;;  %v12140_v37 = vadd.f32 %v2274_v62, %v2262_v28  ;;  %v9616_v54 = vld [vmem:[%s15269_s5 + $0x4b4] sm:$0xf0]  ;;  %v7396_v60 = vor.u32 %v9672_v49, %v7395_v48  ;;  %v9708_v21 = vld [vmem:[%s15269_s5 + $0x79c] sm:$0xf]  ;;  %v6920_v35 = vor.u32 %v9548_v17, %v6917_v18 }
 0x1c4   :  { %2542 = vmatpush.bf16.msra.mxu2 %v6692_v40  ;;  %2564 = vmatpush.bf16.msrb.mxu0 %v7332_v45  ;;  %v7203_v40 = vld [vmem:[%s15269_s5 + $0x4d8] sm:$0xf]  ;;  %v7557_v22 = vld [vmem:[%s15269_s5 + $0x7b8] sm:$0xf0] }
 0x1c5   :  { %v7204_v47 = vor.u32 %v9624_v41, %v7203_v40  ;;  %v7363_v61 = vld [vmem:[%s15269_s5 + $0x618] sm:$0xf]  ;;  %v6693_v31 = vld [vmem:[%s15269_s5 + $0xf8] sm:$0xf0]  ;;  %v7560_v36 = vor.u32 %v9708_v21, %v7557_v22  ;;  %v7791_v21 = vld [vmem:[%s15271_s7 + $0x188] sm:$0xf] }
 0x1c6   :  { %2557 = vmatpush.bf16.msra.mxu3 %v6884_v53  ;;  %2579 = vmatpush.bf16.msrb.mxu1 %v7524_v56  ;;  %v12158_v45 = vpop.f32.mrf.mxu2  ;;  %v7171_v53 = vld [vmem:[%s15269_s5 + $0x498] sm:$0xf]  ;;  %v9540_v40 = vld [vmem:[%s15269_s5 + $0x25c] sm:$0xf]  ;;  %v9773_v22 = vld [vmem:[%s15271_s7 + $0x1a0] sm:$0xf0] }
 0x1c7   :  { %v7172_v0 = vor.u32 %v9616_v54, %v7171_v53  ;;  %v9664_v1 = vld [vmem:[%s15269_s5 + $0x634] sm:$0xf0]  ;;  %v6885_v41 = vld [vmem:[%s15269_s5 + $0x278] sm:$0xf0] }
 0x1c8   :  { %2543 = vmatpush.bf16.msra.mxu2 %v6660_v57  ;;  %2565 = vmatpush.bf16.msrb.mxu0 %v7300_v63  ;;  %v2263_v56 = vpop.f32.mrf.mxu0  ;;  %v2302_v57 = vpop.f32.mrf.mxu3  ;;  %v6984_v63 = vor.u32 %v9564_v50, %v6981_v52  ;;  %v7364_v12 = vor.u32 %v9664_v1, %v7363_v61  ;;  %v7107_v26 = vld [vmem:[%s15269_s5 + $0x418] sm:$0xf]  ;;  %v9644_v48 = vld [vmem:[%s15269_s5 + $0x59c] sm:$0xf]  ;;  %v6888_v50 = vor.u32 %v9540_v40, %v6885_v41 }
 0x1c9   :  { %v7301_v49 = vld [vmem:[%s15269_s5 + $0x5b8] sm:$0xf0] }
 0x1ca   :  { %2558 = vmatpush.bf16.msra.mxu3 %v6852_v6  ;;  %2580 = vmatpush.bf16.msrb.mxu1 %v7492_v7  ;;  %v12188_v62 = vpop.f32.mrf.mxu1  ;;  %v7589_v6 = vld [vmem:[%s15269_s5 + $0x7f8] sm:$0xf0]  ;;  %v7139_v7 = vld [vmem:[%s15269_s5 + $0x458] sm:$0xf]  ;;  %v7304_v61 = vor.u32 %v9644_v48, %v7301_v49 }
 0x1cb   :  { %v7592_v15 = vor.u32 %v9716_v5, %v7589_v6  ;;  %v6853_v56 = vld [vmem:[%s15269_s5 + $0x238] sm:$0xf0] }
 0x1cc   :  { %2544 = vmatpush.bf16.msra.mxu2 %v6628_v13  ;;  %2566 = vmatpush.bf16.msrb.mxu0 %v7268_v14  ;;  %v6952_v14 = vor.u32 %v9556_v3, %v6949_v2  ;;  %v9692_v57 = vld [vmem:[%s15269_s5 + $0x71c] sm:$0xf] }
 0x1cd   :  { %2559 = vmatmul.bf16.vlgmr.msra.gmra.mxu3 %v11159_v10  ;;  %v7493_v58 = vld [vmem:[%s15269_s5 + $0x738] sm:$0xf0] }
 0x1ce   :  { %2603 = vmatpush.bf16.msrb.mxu3 %v7080_v8  ;;  %2581 = vmatpush.bf16.msrb.mxu1 %v7460_v29  ;;  %v9608_v8 = vld [vmem:[%s15269_s5 + $0x474] sm:$0xf0]  ;;  %v2289_v13 = vpop.f32.mrf.mxu2  ;;  %v9476_v1 = vld [vmem:[%s15269_s5 + $0x5c] sm:$0xf] }
 0x1cf   :  { %v7140_v19 = vor.u32 %v9608_v8, %v7139_v7  ;;  %v9600_v29 = vld [vmem:[%s15269_s5 + $0x434] sm:$0xf0]  ;;  %v6629_v3 = vld [vmem:[%s15269_s5 + $0x78] sm:$0xf0]  ;;  %v7496_v7 = vor.u32 %v9692_v57, %v7493_v58  ;;  %v9759_v58 = vld [vmem:[%s15271_s7 + $0x130] sm:$0xf0] }
 0x1d0   :  { %2545 = vmatpush.bf16.msra.mxu2 %v6596_v32  ;;  %2567 = vmatpush.bf16.msrb.mxu0 %v7236_v33  ;;  %v12232_v27 = vpop.f32.mrf.mxu0  ;;  %v12234_v28 = vpop.f32.mrf.mxu3  ;;  %v9652_v32 = vld [vmem:[%s15269_s5 + $0x5dc] sm:$0xf]  ;;  %v7735_v57 = vld [vmem:[%s15271_s7 + $0x118] sm:$0xf] }
 0x1d1   :  { %v7333_v33 = vld [vmem:[%s15269_s5 + $0x5f8] sm:$0xf0] }
 0x1d2   :  { %2604 = vmatpush.bf16.msrb.mxu3 %v7048_v30  ;;  %2582 = vmatpush.bf16.msrb.mxu1 %v7428_v44  ;;  %v9492_v30 = vld [vmem:[%s15269_s5 + $0xdc] sm:$0xf]  ;;  %v2328_v34 = vpop.f32.mrf.mxu1  ;;  %v7336_v43 = vor.u32 %v9652_v32, %v7333_v33 }
 0x1d3   :  { %2546 = vmatmul.bf16.vlgmr.msra.gmra.mxu2 %v11180_v25  ;;  %v6696_v39 = vor.u32 %v9492_v30, %v6693_v31  ;;  %v7525_v44 = vld [vmem:[%s15269_s5 + $0x778] sm:$0xf0] }
 0x1d4   :  { %2590 = vmatpush.bf16.msrb.mxu2 %v6824_v38  ;;  %2568 = vmatpush.bf16.msrb.mxu0 %v7204_v47  ;;  %v7108_v38 = vor.u32 %v9600_v29, %v7107_v26  ;;  %v6661_v47 = vld [vmem:[%s15269_s5 + $0xb8] sm:$0xf0]  ;;  %v7528_v53 = vor.u32 %v9700_v42, %v7525_v44 }
 0x1d5   :  { %v9636_v2 = vld [vmem:[%s15269_s5 + $0x55c] sm:$0xf] }
 0x1d6   :  { %2605 = vmatpush.bf16.msrb.mxu3 %v7016_v46  ;;  %2583 = vmatpush.bf16.msrb.mxu1 %v7396_v60  ;;  %v9484_v46 = vld [vmem:[%s15269_s5 + $0x9c] sm:$0xf]  ;;  %v12279_v52 = vpop.f32.mrf.mxu2 }
 0x1d7   :  { %v6664_v54 = vor.u32 %v9484_v46, %v6661_v47  ;;  %v9684_v9 = vld [vmem:[%s15269_s5 + $0x6dc] sm:$0xf] }
 0x1d8   :  { %2591 = vmatpush.bf16.msrb.mxu2 %v6792_v51  ;;  %2569 = vmatpush.bf16.msrb.mxu0 %v7172_v0  ;;  %v9532_v51 = vld [vmem:[%s15269_s5 + $0x21c] sm:$0xf]  ;;  %v2315_v59 = vpop.f32.mrf.mxu0  ;;  %v2354_v60 = vpop.f32.mrf.mxu3  ;;  %v9829_v0 = vld [vmem:[%s15271_s7 + $0x360] sm:$0xf0] }
 0x1d9   :  { %v6856_v6 = vor.u32 %v9532_v51, %v6853_v56  ;;  %v7461_v11 = vld [vmem:[%s15269_s5 + $0x6f8] sm:$0xf0]  ;;  %v931_v59 = vperm.slane %v12016_v24, 1 }
 0x1da   :  { %2606 = vmatpush.bf16.msrb.mxu3 %v6984_v63  ;;  %2584 = vmatpush.bf16.msrb.mxu1 %v7364_v12  ;;  %v8015_v63 = vld [vmem:[%s15271_s7 + $0x348] sm:$0xf]  ;;  %v12309_v5 = vpop.f32.mrf.mxu1  ;;  %v6632_v12 = vor.u32 %v9476_v1, %v6629_v3  ;;  %v9468_v17 = vld [vmem:[%s15269_s5 + $0x1c] sm:$0xf]  ;;  %v7464_v29 = vor.u32 %v9684_v9, %v7461_v11  ;;  %v7707_v11 = vld [vmem:[%s15271_s7 + $0xe0] sm:$0xf] }
 0x1db   :  { %v8016_v8 = vor.u32 %v9829_v0, %v8015_v63  ;;  %v6597_v18 = vld [vmem:[%s15269_s5 + $0x38] sm:$0xf0]  ;;  %v7903_v3 = vld [vmem:[%s15271_s7 + $0x268] sm:$0xf] }
 0x1dc   :  { %2592 = vmatpush.bf16.msrb.mxu2 %v6760_v4  ;;  %2570 = vmatpush.bf16.msrb.mxu0 %v7140_v19  ;;  %v7269_v4 = vld [vmem:[%s15269_s5 + $0x578] sm:$0xf0]  ;;  %v6600_v31 = vor.u32 %v9468_v17, %v6597_v18  ;;  %v7875_v18 = vld [vmem:[%s15271_s7 + $0x230] sm:$0xf] }
 0x1dd   :  { %2585 = vmatmul.bf16.vlgmr.msrb.gmra.mxu1 %v11224_v55  ;;  %v7272_v13 = vor.u32 %v9636_v2, %v7269_v4  ;;  %v9628_v19 = vld [vmem:[%s15269_s5 + $0x51c] sm:$0xf]  ;;  %v7736_v4 = vor.u32 %v9759_v58, %v7735_v57 }
 0x1de   :  { %2607 = vmatpush.bf16.msrb.mxu3 %v6952_v14  ;;  %2629 = vmatpush.bf16.msra.mxu1 %v7592_v15  ;;  %v7987_v14 = vld [vmem:[%s15271_s7 + $0x310] sm:$0xf]  ;;  %v9822_v15 = vld [vmem:[%s15271_s7 + $0x328] sm:$0xf0]  ;;  %v2341_v26 = vpop.f32.mrf.mxu2  ;;  %v9676_v33 = vld [vmem:[%s15269_s5 + $0x69c] sm:$0xf] }
 0x1df   :  { %v7988_v30 = vor.u32 %v9822_v15, %v7987_v14  ;;  %v7429_v34 = vld [vmem:[%s15269_s5 + $0x6b8] sm:$0xf0]  ;;  %v9934_v26 = vld [vmem:[%s15271_s7 + $0x6a8] sm:$0xf0] }
 0x1e0   :  { %2593 = vmatpush.bf16.msrb.mxu2 %v6728_v20  ;;  %2571 = vmatpush.bf16.msrb.mxu0 %v7108_v38  ;;  %v7237_v20 = vld [vmem:[%s15269_s5 + $0x538] sm:$0xf0]  ;;  %v7792_v38 = vor.u32 %v9773_v22, %v7791_v21  ;;  %v7432_v44 = vor.u32 %v9676_v33, %v7429_v34  ;;  %v8239_v34 = vld [vmem:[%s15271_s7 + $0x508] sm:$0xf] }
 0x1e1   :  { %v7240_v32 = vor.u32 %v9628_v19, %v7237_v20  ;;  %v9620_v40 = vld [vmem:[%s15269_s5 + $0x4dc] sm:$0xf]  ;;  %v9794_v19 = vld [vmem:[%s15271_s7 + $0x248] sm:$0xf0] }
 0x1e2   :  { %2608 = vmatpush.bf16.msrb.mxu3 %v6920_v35  ;;  %2630 = vmatpush.bf16.msra.mxu1 %v7560_v36  ;;  %v7959_v35 = vld [vmem:[%s15271_s7 + $0x2d8] sm:$0xf]  ;;  %v12351_v36 = vpop.f32.mrf.mxu0  ;;  %v7205_v41 = vld [vmem:[%s15269_s5 + $0x4f8] sm:$0xf0]  ;;  %v2380_v42 = vpop.f32.mrf.mxu1 }
 0x1e3   :  { %2572 = vmatmul.bf16.vlgmr.msrb.gmra.mxu0 %v11264_v16  ;;  %v7208_v47 = vor.u32 %v9620_v40, %v7205_v41  ;;  %v9668_v48 = vld [vmem:[%s15269_s5 + $0x65c] sm:$0xf] }
 0x1e4   :  { %2594 = vmatpush.bf16.msrb.mxu2 %v6696_v39  ;;  %2616 = vmatpush.bf16.msra.mxu0 %v7336_v43  ;;  %v9815_v39 = vld [vmem:[%s15271_s7 + $0x2f0] sm:$0xf0]  ;;  %v9766_v43 = vld [vmem:[%s15271_s7 + $0x168] sm:$0xf0]  ;;  %v7397_v49 = vld [vmem:[%s15269_s5 + $0x678] sm:$0xf0] }
 0x1e5   :  { %v7960_v46 = vor.u32 %v9815_v39, %v7959_v35  ;;  %v7173_v56 = vld [vmem:[%s15269_s5 + $0x4b8] sm:$0xf0]  ;;  %v7400_v60 = vor.u32 %v9668_v48, %v7397_v49  ;;  %v9885_v35 = vld [vmem:[%s15271_s7 + $0x520] sm:$0xf0]  ;;  %v8211_v49 = vld [vmem:[%s15271_s7 + $0x4d0] sm:$0xf] }
 0x1e6   :  { %2609 = vmatpush.bf16.msrb.mxu3 %v6888_v50  ;;  %2631 = vmatpush.bf16.msra.mxu1 %v7528_v53  ;;  %v7931_v50 = vld [vmem:[%s15271_s7 + $0x2a0] sm:$0xf]  ;;  %v9808_v53 = vld [vmem:[%s15271_s7 + $0x2b8] sm:$0xf0] }
 0x1e7   :  { %v7932_v63 = vor.u32 %v9808_v53, %v7931_v50  ;;  %v7365_v1 = vld [vmem:[%s15269_s5 + $0x638] sm:$0xf0] }
 0x1e8   :  { %2595 = vmatpush.bf16.msrb.mxu2 %v6664_v54  ;;  %2617 = vmatpush.bf16.msra.mxu0 %v7304_v61  ;;  %v9612_v54 = vld [vmem:[%s15269_s5 + $0x49c] sm:$0xf] }
 0x1e9   :  { %v9660_v61 = vld [vmem:[%s15269_s5 + $0x61c] sm:$0xf]  ;;  %v7176_v0 = vor.u32 %v9612_v54, %v7173_v56 }
 0x1ea   :  { %2610 = vmatpush.bf16.msrb.mxu3 %v6856_v6  ;;  %2632 = vmatpush.bf16.msra.mxu1 %v7496_v7  ;;  %v2367_v2 = vpop.f32.mrf.mxu0  ;;  %v8463_v6 = vld [vmem:[%s15271_s7 + $0x6c8] sm:$0xf]  ;;  %v9941_v7 = vld [vmem:[%s15271_s7 + $0x6e0] sm:$0xf0]  ;;  %v7141_v9 = vld [vmem:[%s15269_s5 + $0x478] sm:$0xf0]  ;;  %v7368_v14 = vor.u32 %v9660_v61, %v7365_v1 }
 0x1eb   :  { %v8464_v17 = vor.u32 %v9941_v7, %v8463_v6  ;;  %v9780_v58 = vld [vmem:[%s15271_s7 + $0x1d8] sm:$0xf0]  ;;  %v10053_v2 = vld [vmem:[%s15271_s7 + $0xa60] sm:$0xf0] }
 0x1ec   :  { %2596 = vmatpush.bf16.msrb.mxu2 %v6632_v12  ;;  %2618 = vmatpush.bf16.msra.mxu0 %v7272_v13  ;;  %v9752_v12 = vld [vmem:[%s15271_s7 + $0xf8] sm:$0xf0]  ;;  %v2288_v13 = vadd.f32 %v12158_v45, %v931_v59  ;;  %v8435_v45 = vld [vmem:[%s15271_s7 + $0x690] sm:$0xf]  ;;  %v8379_v59 = vld [vmem:[%s15271_s7 + $0x620] sm:$0xf] }
 0x1ed   :  { %2611 = vmatmul.bf16.vlgmr.msrb.gmra.mxu3 %v11159_v10  ;;  %v7763_v10 = vld [vmem:[%s15271_s7 + $0x150] sm:$0xf]  ;;  %v7708_v22 = vor.u32 %v9752_v12, %v7707_v11  ;;  %v8436_v39 = vor.u32 %v9934_v26, %v8435_v45  ;;  %v8351_v12 = vld [vmem:[%s15271_s7 + $0x5e8] sm:$0xf]  ;;  %v9997_v45 = vld [vmem:[%s15271_s7 + $0x8a0] sm:$0xf0] }
 0x1ee   :  { %5503 = vmatpush.bf16.msra.mxu3 %v8016_v8  ;;  %2633 = vmatpush.bf16.msra.mxu1 %v7464_v29  ;;  %v7764_v51 = vor.u32 %v9766_v43, %v7763_v10  ;;  %v9604_v8 = vld [vmem:[%s15269_s5 + $0x45c] sm:$0xf]  ;;  %v2301_v33 = vadd.f32 %v12123_v23, %v2288_v13  ;;  %v7847_v23 = vld [vmem:[%s15271_s7 + $0x1f8] sm:$0xf]  ;;  %v9787_v10 = vld [vmem:[%s15271_s7 + $0x210] sm:$0xf0] }
 0x1ef   :  { %v7144_v21 = vor.u32 %v9604_v8, %v7141_v9  ;;  %v9596_v29 = vld [vmem:[%s15269_s5 + $0x41c] sm:$0xf]  ;;  %v8407_v43 = vld [vmem:[%s15271_s7 + $0x658] sm:$0xf]  ;;  %v7848_v50 = vor.u32 %v9787_v10, %v7847_v23  ;;  %v932_v8 = vperm.slane %v12016_v24, 2 }
 0x1f0   :  { %2597 = vmatpush.bf16.msrb.mxu2 %v6600_v31  ;;  %2619 = vmatpush.bf16.msra.mxu0 %v7240_v32  ;;  %v12431_v20 = vpop.f32.mrf.mxu3  ;;  %v7679_v31 = vld [vmem:[%s15271_s7 + $0xa8] sm:$0xf]  ;;  %v9745_v32 = vld [vmem:[%s15271_s7 + $0xc0] sm:$0xf0]  ;;  %v2314_v40 = vadd.f32 %v12232_v27, %v2301_v33  ;;  %v9927_v27 = vld [vmem:[%s15271_s7 + $0x670] sm:$0xf0] }
 0x1f1   :  { %v7680_v42 = vor.u32 %v9745_v32, %v7679_v31  ;;  %v8408_v54 = vor.u32 %v9927_v27, %v8407_v43  ;;  %v9913_v13 = vld [vmem:[%s15271_s7 + $0x600] sm:$0xf0]  ;;  %v2642_v31 = vmax.f32 %v12140_v37, 0.0  ;;  %v8127_v37 = vld [vmem:[%s15271_s7 + $0x428] sm:$0xf] }
 0x1f2   :  { %5504 = vmatpush.bf16.msra.mxu3 %v7988_v30  ;;  %2634 = vmatpush.bf16.msra.mxu1 %v7432_v44  ;;  %v7109_v30 = vld [vmem:[%s15269_s5 + $0x438] sm:$0xf0]  ;;  %v8240_v44 = vor.u32 %v9885_v35, %v8239_v34  ;;  %v2327_v53 = vadd.f32 %v12188_v62, %v2314_v40  ;;  %v7623_v62 = vld [vmem:[%s15271_s7 + $0x38] sm:$0xf]  ;;  %v8352_v33 = vor.u32 %v9913_v13, %v8351_v12  ;;  %v8323_v40 = vld [vmem:[%s15271_s7 + $0x5b0] sm:$0xf] }
 0x1f3   :  { %2598 = vmatmul.bf16.vlgmr.msrb.gmra.mxu2 %v11180_v25  ;;  %v9801_v25 = vld [vmem:[%s15271_s7 + $0x280] sm:$0xf0]  ;;  %v7112_v41 = vor.u32 %v9596_v29, %v7109_v30  ;;  %v8883_v29 = vld [vmem:[%s15271_s7 + $0xa10] sm:$0xf]  ;;  %v10046_v30 = vld [vmem:[%s15271_s7 + $0xa28] sm:$0xf0] }
 0x1f4   :  { %5490 = vmatpush.bf16.msra.mxu2 %v7792_v38  ;;  %2620 = vmatpush.bf16.msra.mxu0 %v7208_v47  ;;  %v7904_v15 = vor.u32 %v9801_v25, %v7903_v3  ;;  %v7876_v38 = vor.u32 %v9794_v19, %v7875_v18  ;;  %v9738_v47 = vld [vmem:[%s15271_s7 + $0x88] sm:$0xf0]  ;;  %v9871_v3 = vld [vmem:[%s15271_s7 + $0x4b0] sm:$0xf0]  ;;  %v8911_v25 = vld [vmem:[%s15271_s7 + $0xa48] sm:$0xf]  ;;  %v8884_v27 = vor.u32 %v10046_v30, %v8883_v29 }
 0x1f5   :  { %v2643_v7 = vmax.f32 %v2327_v53, 0.0  ;;  %v8912_v18 = vor.u32 %v10053_v2, %v8911_v25  ;;  %v9857_v10 = vld [vmem:[%s15271_s7 + $0x440] sm:$0xf0]  ;;  %v8659_v43 = vld [vmem:[%s15271_s7 + $0x850] sm:$0xf] }
 0x1f6   :  { %5505 = vmatpush.bf16.msra.mxu3 %v7960_v46  ;;  %2635 = vmatpush.bf16.msra.mxu1 %v7400_v60  ;;  %v7651_v46 = vld [vmem:[%s15271_s7 + $0x70] sm:$0xf]  ;;  %v2391_v48 = vpop.f32.mrf.mxu2  ;;  %v9920_v60 = vld [vmem:[%s15271_s7 + $0x638] sm:$0xf0]  ;;  %v9899_v53 = vld [vmem:[%s15271_s7 + $0x590] sm:$0xf0] }
 0x1f7   :  { %v7652_v57 = vor.u32 %v9738_v47, %v7651_v46  ;;  %v8380_v9 = vor.u32 %v9920_v60, %v8379_v59  ;;  %v12551_v32 = vpack.c.bf16 %v2643_v7, %v2643_v7  ;;  %v10039_v47 = vld [vmem:[%s15271_s7 + $0x9f0] sm:$0xf0]  ;;  %v8603_v7 = vld [vmem:[%s15271_s7 + $0x7e0] sm:$0xf]  ;;  %v10025_v12 = vld [vmem:[%s15271_s7 + $0x980] sm:$0xf0] }
 0x1f8   :  { %5491 = vmatpush.bf16.msra.mxu2 %v7764_v51  ;;  %2621 = vmatpush.bf16.msra.mxu0 %v7176_v0  ;;  %v7819_v51 = vld [vmem:[%s15271_s7 + $0x1c0] sm:$0xf]  ;;  %v2406_v56 = vpop.f32.mrf.mxu3  ;;  %v8183_v0 = vld [vmem:[%s15271_s7 + $0x498] sm:$0xf]  ;;  %v9983_v59 = vld [vmem:[%s15271_s7 + $0x830] sm:$0xf0] }
 0x1f9   :  { %v7820_v6 = vor.u32 %v9780_v58, %v7819_v51  ;;  %v8631_v58 = vld [vmem:[%s15271_s7 + $0x818] sm:$0xf]  ;;  %v10018_v29 = vld [vmem:[%s15271_s7 + $0x948] sm:$0xf0]  ;;  %v9135_v30 = vld [vmem:[%s15271_s7 + $0xc08] sm:$0xf] }
 0x1fa   :  { %5506 = vmatpush.bf16.msra.mxu3 %v7932_v63  ;;  %2636 = vmatpush.bf16.msra.mxu1 %v7368_v14  ;;  %v9731_v63 = vld [vmem:[%s15271_s7 + $0x50] sm:$0xf0]  ;;  %v12506_v1 = vpop.f32.mrf.mxu1  ;;  %v8184_v14 = vor.u32 %v9871_v3, %v8183_v0  ;;  %v8632_v2 = vor.u32 %v9983_v59, %v8631_v58  ;;  %v8017_v58 = vld [vmem:[%s15271_s7 + $0x364] sm:$0xf0] }
 0x1fb   :  { %v7624_v11 = vor.u32 %v9731_v63, %v7623_v62 }
 0x1fc   :  { %5492 = vmatpush.bf16.msra.mxu2 %v7736_v4  ;;  %2622 = vmatpush.bf16.msra.mxu0 %v7144_v21  ;;  %v933_v4 = vperm.slane %v12016_v24, 3  ;;  %v9864_v21 = vld [vmem:[%s15271_s7 + $0x478] sm:$0xf0] }
 0x1fd   :  { %2637 = vmatmul.bf16.vlgmr.msra.gmra.mxu1 %v11224_v55  ;;  %v9878_v55 = vld [vmem:[%s15271_s7 + $0x4e8] sm:$0xf0] }
 0x1fe   :  { %5507 = vmatpush.bf16.msra.mxu3 %v7904_v15  ;;  %5529 = vmatpush.bf16.msrb.mxu1 %v8464_v17  ;;  %v8212_v61 = vor.u32 %v9878_v55, %v8211_v49  ;;  %v9724_v15 = vld [vmem:[%s15271_s7 + $0x18] sm:$0xf0]  ;;  %v8155_v17 = vld [vmem:[%s15271_s7 + $0x460] sm:$0xf]  ;;  %v2393_v19 = vpop.f32.mrf.mxu2  ;;  %v2392_v26 = vadd.f32 %v2391_v48, %v933_v4  ;;  %v12580_v48 = vpack.c.bf16 %v2642_v31, %v2642_v31  ;;  %v10109_v31 = vld [vmem:[%s15271_s7 + $0xc20] sm:$0xf0] }
 0x1ff   :  { %v8267_v4 = vld [vmem:[%s15271_s7 + $0x540] sm:$0xf] }
 0x200   :  { %5493 = vmatpush.bf16.msra.mxu2 %v7708_v22  ;;  %2623 = vmatpush.bf16.msra.mxu0 %v7112_v41  ;;  %v8687_v22 = vld [vmem:[%s15271_s7 + $0x888] sm:$0xf]  ;;  %v2417_v34 = vpop.f32.mrf.mxu0  ;;  %v9906_v41 = vld [vmem:[%s15271_s7 + $0x5c8] sm:$0xf0]  ;;  %v2405_v46 = vadd.f32 %v12431_v20, %v2392_v26  ;;  %v8295_v20 = vld [vmem:[%s15271_s7 + $0x578] sm:$0xf] }
 0x201   :  { %v8324_v49 = vor.u32 %v9906_v41, %v8323_v40  ;;  %v8296_v63 = vor.u32 %v9899_v53, %v8295_v20  ;;  %v8043_v19 = vld [vmem:[%s15271_s7 + $0x380] sm:$0xf]  ;;  %v8771_v26 = vld [vmem:[%s15271_s7 + $0x930] sm:$0xf]  ;;  %v9962_v40 = vld [vmem:[%s15271_s7 + $0x788] sm:$0xf0] }
 0x202   :  { %5508 = vmatpush.bf16.msra.mxu3 %v7876_v38  ;;  %5530 = vmatpush.bf16.msrb.mxu1 %v8436_v39  ;;  %v8156_v38 = vor.u32 %v9864_v21, %v8155_v17  ;;  %v8688_v39 = vor.u32 %v9997_v45, %v8687_v22  ;;  %v2432_v23 = vpop.f32.mrf.mxu1  ;;  %v2418_v55 = vadd.f32 %v2417_v34, %v2405_v46  ;;  %v9836_v21 = vld [vmem:[%s15271_s7 + $0x398] sm:$0xf0]  ;;  %v8575_v22 = vld [vmem:[%s15271_s7 + $0x7a8] sm:$0xf]  ;;  %v9079_v53 = vld [vmem:[%s15271_s7 + $0xb98] sm:$0xf] }
 0x203   :  { %2624 = vmatmul.bf16.vlgmr.msra.gmra.mxu0 %v11264_v16  ;;  %v7595_v16 = vld [vmem:[%s15271_s7] sm:$0xf]  ;;  %v8772_v41 = vor.u32 %v10018_v29, %v8771_v26  ;;  %v10004_v20 = vld [vmem:[%s15271_s7 + $0x8d8] sm:$0xf0]  ;;  %v7737_v29 = vld [vmem:[%s15271_s7 + $0x134] sm:$0xf0] }
 0x204   :  { %5494 = vmatpush.bf16.msra.mxu2 %v7680_v42  ;;  %5516 = vmatpush.bf16.msrb.mxu0 %v8240_v44  ;;  %v7596_v35 = vor.u32 %v9724_v15, %v7595_v16  ;;  %v2340_v42 = vadd.f32 %v12279_v52, %v932_v8  ;;  %v9990_v44 = vld [vmem:[%s15271_s7 + $0x868] sm:$0xf0]  ;;  %v8855_v52 = vld [vmem:[%s15271_s7 + $0x9d8] sm:$0xf]  ;;  %v2431_v3 = vadd.f32 %v12506_v1, %v2418_v55  ;;  %v9843_v1 = vld [vmem:[%s15271_s7 + $0x3d0] sm:$0xf0] }
 0x205   :  { %v8660_v51 = vor.u32 %v9990_v44, %v8659_v43  ;;  %v8856_v60 = vor.u32 %v10039_v47, %v8855_v52  ;;  %v9976_v8 = vld [vmem:[%s15271_s7 + $0x7f8] sm:$0xf0]  ;;  %v9107_v43 = vld [vmem:[%s15271_s7 + $0xbd0] sm:$0xf]  ;;  %v10102_v44 = vld [vmem:[%s15271_s7 + $0xbe8] sm:$0xf0] }
 0x206   :  { %5509 = vmatpush.bf16.msra.mxu3 %v7848_v50  ;;  %5531 = vmatpush.bf16.msrb.mxu1 %v8408_v54  ;;  %v8128_v50 = vor.u32 %v9857_v10, %v8127_v37  ;;  %v8099_v54 = vld [vmem:[%s15271_s7 + $0x3f0] sm:$0xf]  ;;  %v2353_v56 = vadd.f32 %v12234_v28, %v2340_v42  ;;  %v8827_v28 = vld [vmem:[%s15271_s7 + $0x9a0] sm:$0xf]  ;;  %v2645_v16 = vmax.f32 %v2431_v3, 0.0  ;;  %v9136_v42 = vor.u32 %v10109_v31, %v9135_v30 }
 0x207   :  { %v8743_v37 = vld [vmem:[%s15271_s7 + $0x8f8] sm:$0xf]  ;;  %v10011_v10 = vld [vmem:[%s15271_s7 + $0x910] sm:$0xf0]  ;;  %v9756_v26 = vld [vmem:[%s15271_s7 + $0x11c] sm:$0xf] }
 0x208   :  { %5495 = vmatpush.bf16.msra.mxu2 %v7652_v57  ;;  %5517 = vmatpush.bf16.msrb.mxu0 %v8212_v61  ;;  %v9850_v57 = vld [vmem:[%s15271_s7 + $0x408] sm:$0xf0]  ;;  %v10032_v61 = vld [vmem:[%s15271_s7 + $0x9b8] sm:$0xf0]  ;;  %v2366_v62 = vadd.f32 %v12351_v36, %v2353_v56  ;;  %v2419_v0 = vpop.f32.mrf.mxu0  ;;  %v8071_v36 = vld [vmem:[%s15271_s7 + $0x3b8] sm:$0xf]  ;;  %v12661_v34 = vpack.c.bf16 %v2645_v16, %v2645_v16 }
 0x209   :  { %v8100_v25 = vor.u32 %v9850_v57, %v8099_v54  ;;  %v8072_v17 = vor.u32 %v9843_v1, %v8071_v36  ;;  %v9955_v55 = vld [vmem:[%s15271_s7 + $0x750] sm:$0xf0]  ;;  %v9826_v57 = vld [vmem:[%s15271_s7 + $0x34c] sm:$0xf]  ;;  %v7989_v1 = vld [vmem:[%s15271_s7 + $0x32c] sm:$0xf0] }
 0x20a   :  { %5510 = vmatpush.bf16.msra.mxu3 %v7820_v6  ;;  %5532 = vmatpush.bf16.msrb.mxu1 %v8380_v9  ;;  %v9892_v6 = vld [vmem:[%s15271_s7 + $0x558] sm:$0xf0]  ;;  %v8828_v9 = vor.u32 %v10032_v61, %v8827_v28  ;;  %v10095_v54 = vld [vmem:[%s15271_s7 + $0xbb0] sm:$0xf0]  ;;  %v8491_v28 = vld [vmem:[%s15271_s7 + $0x700] sm:$0xf] }
 0x20b   :  { %v8268_v13 = vor.u32 %v9892_v6, %v8267_v4  ;;  %v9948_v61 = vld [vmem:[%s15271_s7 + $0x718] sm:$0xf0]  ;;  %v9080_v0 = vor.u32 %v10095_v54, %v9079_v53  ;;  %v9051_v4 = vld [vmem:[%s15271_s7 + $0xb60] sm:$0xf]  ;;  %v9819_v36 = vld [vmem:[%s15271_s7 + $0x314] sm:$0xf] }
 0x20c   :  { %5496 = vmatpush.bf16.msra.mxu2 %v7624_v11  ;;  %5518 = vmatpush.bf16.msrb.mxu0 %v8184_v14  ;;  %v8799_v11 = vld [vmem:[%s15271_s7 + $0x968] sm:$0xf]  ;;  %v2379_v14 = vadd.f32 %v12309_v5, %v2366_v62  ;;  %v9969_v5 = vld [vmem:[%s15271_s7 + $0x7c0] sm:$0xf0]  ;;  %v9770_v62 = vld [vmem:[%s15271_s7 + $0x18c] sm:$0xf] }
 0x20d   :  { %5511 = vmatmul.bf16.vlgmr.msra.gmra.mxu3 %v12551_v32  ;;  %v8800_v45 = vor.u32 %v10025_v12, %v8799_v11  ;;  %v10088_v6 = vld [vmem:[%s15271_s7 + $0xb78] sm:$0xf0]  ;;  %v9763_v12 = vld [vmem:[%s15271_s7 + $0x154] sm:$0xf]  ;;  %v7765_v16 = vld [vmem:[%s15271_s7 + $0x16c] sm:$0xf0] }
 0x20e   :  { %5555 = vmatpush.bf16.msrb.mxu3 %v8912_v18  ;;  %5533 = vmatpush.bf16.msrb.mxu1 %v8352_v33  ;;  %v8604_v18 = vor.u32 %v9976_v8, %v8603_v7  ;;  %v2644_v33 = vmax.f32 %v2379_v14, 0.0  ;;  %v8492_v8 = vor.u32 %v9948_v61, %v8491_v28  ;;  %v10158_v53 = vld [vmem:[%s15271_s7 + $0xda8] sm:$0xf0] }
 0x210   :  { %5497 = vmatpush.bf16.msra.mxu2 %v7596_v35  ;;  %5519 = vmatpush.bf16.msrb.mxu0 %v8156_v38  ;;  %v12635_v15 = vpop.f32.mrf.mxu3  ;;  %v8044_v35 = vor.u32 %v9836_v21, %v8043_v19  ;;  %v8576_v38 = vor.u32 %v9969_v5, %v8575_v22  ;;  %v12683_v47 = vpack.c.bf16 %v2644_v33, %v2644_v33  ;;  %v9812_v21 = vld [vmem:[%s15271_s7 + $0x2dc] sm:$0xf]  ;;  %v7961_v22 = vld [vmem:[%s15271_s7 + $0x2f4] sm:$0xf0] }
 0x211   :  { %v7964_v33 = vor.u32 %v9812_v21, %v7961_v22  ;;  %v9728_v22 = vld [vmem:[%s15271_s7 + $0x3c] sm:$0xf] }
 0x212   :  { %5556 = vmatpush.bf16.msrb.mxu3 %v8884_v27  ;;  %5534 = vmatpush.bf16.msrb.mxu1 %v8324_v49  ;;  %v934_v27 = vperm.slane %v12016_v24, 4  ;;  %v8519_v49 = vld [vmem:[%s15271_s7 + $0x738] sm:$0xf]  ;;  %v9108_v24 = vor.u32 %v10102_v44, %v9107_v43  ;;  %v9749_v43 = vld [vmem:[%s15271_s7 + $0xe4] sm:$0xf] }
 0x213   :  { %5498 = vmatmul.bf16.vlgmr.msra.gmra.mxu2 %v12580_v48 }
 0x214   :  { %5542 = vmatpush.bf16.msrb.mxu2 %v8688_v39  ;;  %5520 = vmatpush.bf16.msrb.mxu0 %v8128_v50  ;;  %v8547_v39 = vld [vmem:[%s15271_s7 + $0x770] sm:$0xf]  ;;  %v8744_v50 = vor.u32 %v10011_v10, %v8743_v37  ;;  %v9359_v37 = vld [vmem:[%s15271_s7 + $0xdc8] sm:$0xf]  ;;  %v7740_v10 = vor.u32 %v9756_v26, %v7737_v29 }
 0x215   :  { %v8548_v52 = vor.u32 %v9962_v40, %v8547_v39  ;;  %v9805_v39 = vld [vmem:[%s15271_s7 + $0x2a4] sm:$0xf]  ;;  %v7933_v40 = vld [vmem:[%s15271_s7 + $0x2bc] sm:$0xf0] }
 0x216   :  { %5557 = vmatpush.bf16.msrb.mxu3 %v8856_v60  ;;  %5535 = vmatpush.bf16.msrb.mxu1 %v8296_v63  ;;  %v2443_v23 = vpop.f32.mrf.mxu2  ;;  %v8520_v60 = vor.u32 %v9955_v55, %v8519_v49  ;;  %v8967_v49 = vld [vmem:[%s15271_s7 + $0xab8] sm:$0xf]  ;;  %v10067_v55 = vld [vmem:[%s15271_s7 + $0xad0] sm:$0xf0] }
 0x217   :  { %v2444_v59 = vadd.f32 %v2443_v23, %v934_v27 }
 0x218   :  { %5543 = vmatpush.bf16.msrb.mxu2 %v8660_v51  ;;  %5521 = vmatpush.bf16.msrb.mxu0 %v8100_v25  ;;  %v2458_v46 = vpop.f32.mrf.mxu3  ;;  %v8715_v51 = vld [vmem:[%s15271_s7 + $0x8c0] sm:$0xf]  ;;  %v7793_v25 = vld [vmem:[%s15271_s7 + $0x1a4] sm:$0xf0] }
 0x219   :  { %v8716_v63 = vor.u32 %v10004_v20, %v8715_v51  ;;  %v2457_v7 = vadd.f32 %v12635_v15, %v2444_v59  ;;  %v7796_v11 = vor.u32 %v9770_v62, %v7793_v25  ;;  %v9023_v15 = vld [vmem:[%s15271_s7 + $0xb28] sm:$0xf]  ;;  %v7709_v46 = vld [vmem:[%s15271_s7 + $0xfc] sm:$0xf0]  ;;  %v9331_v20 = vld [vmem:[%s15271_s7 + $0xd90] sm:$0xf]  ;;  %v8968_v59 = vor.u32 %v10067_v55, %v8967_v49 }
 0x21a   :  { %5558 = vmatpush.bf16.msrb.mxu3 %v8828_v9  ;;  %5536 = vmatpush.bf16.msrb.mxu1 %v8268_v13  ;;  %v2482_v56 = vpop.f32.mrf.mxu1  ;;  %v9052_v13 = vor.u32 %v10088_v6, %v9051_v4  ;;  %v7905_v51 = vld [vmem:[%s15271_s7 + $0x284] sm:$0xf0]  ;;  %v7712_v54 = vor.u32 %v9749_v43, %v7709_v46  ;;  %v8939_v62 = vld [vmem:[%s15271_s7 + $0xa80] sm:$0xf]  ;;  %v9721_v43 = vld [vmem:[%s15271_s7 + $0x4] sm:$0xf] }
 0x21b   :  { %v8241_v25 = vld [vmem:[%s15271_s7 + $0x524] sm:$0xf0]  ;;  %v9861_v55 = vld [vmem:[%s15271_s7 + $0x464] sm:$0xf] }
 0x21c   :  { %5544 = vmatpush.bf16.msrb.mxu2 %v8632_v2  ;;  %5522 = vmatpush.bf16.msrb.mxu0 %v8072_v17  ;;  %v8020_v2 = vor.u32 %v9826_v57, %v8017_v58  ;;  %v7992_v17 = vor.u32 %v9819_v36, %v7989_v1  ;;  %v9791_v57 = vld [vmem:[%s15271_s7 + $0x234] sm:$0xf]  ;;  %v7877_v58 = vld [vmem:[%s15271_s7 + $0x24c] sm:$0xf0]  ;;  %v8689_v49 = vld [vmem:[%s15271_s7 + $0x8a4] sm:$0xf0] }
 0x21d   :  { %5537 = vmatmul.bf16.vlgmr.msrb.gmra.mxu1 %v12661_v34  ;;  %v9735_v1 = vld [vmem:[%s15271_s7 + $0x74] sm:$0xf] }
 0x21e   :  { %5559 = vmatpush.bf16.msrb.mxu3 %v8800_v45  ;;  %v2445_v3 = vpop.f32.mrf.mxu2  ;;  %v7768_v45 = vor.u32 %v9763_v12, %v7765_v16  ;;  %v7849_v12 = vld [vmem:[%s15271_s7 + $0x214] sm:$0xf0] }
 0x21f   :  { %v9882_v3 = vld [vmem:[%s15271_s7 + $0x50c] sm:$0xf] }
 0x220   :  { %5545 = vmatpush.bf16.msrb.mxu2 %v8604_v18  ;;  %5523 = vmatpush.bf16.msrb.mxu0 %v8044_v35  ;;  %v2469_v9 = vpop.f32.mrf.mxu0  ;;  %v10081_v18 = vld [vmem:[%s15271_s7 + $0xb40] sm:$0xf0]  ;;  %v8995_v35 = vld [vmem:[%s15271_s7 + $0xaf0] sm:$0xf] }
 0x221   :  { %v2470_v14 = vadd.f32 %v2469_v9, %v2457_v7  ;;  %v9024_v30 = vor.u32 %v10081_v18, %v9023_v15  ;;  %v7653_v7 = vld [vmem:[%s15271_s7 + $0x8c] sm:$0xf0]  ;;  %v9784_v9 = vld [vmem:[%s15271_s7 + $0x1fc] sm:$0xf]  ;;  %v12863_v18 = vld [vmem:[%s15270_s6] sm:$0xff] }
 0x222   :  { %5560 = vmatpush.bf16.msrb.mxu3 %v8772_v41  ;;  %v2484_v19 = vpop.f32.mrf.mxu1  ;;  %v10144_v15 = vld [vmem:[%s15271_s7 + $0xd38] sm:$0xf0]  ;;  %v7656_v21 = vor.u32 %v9735_v1, %v7653_v7  ;;  %v7852_v29 = vor.u32 %v9784_v9, %v7849_v12  ;;  %v8913_v1 = vld [vmem:[%s15271_s7 + $0xa64] sm:$0xf0]  ;;  %v8633_v9 = vld [vmem:[%s15271_s7 + $0x834] sm:$0xf0] }
 0x223   :  { %5524 = vmatmul.bf16.vlgmr.msrb.gmra.mxu0 %v12683_v47  ;;  %v2483_v5 = vadd.f32 %v2482_v56, %v2470_v14  ;;  %v7681_v56 = vld [vmem:[%s15271_s7 + $0xc4] sm:$0xf0]  ;;  %v8213_v14 = vld [vmem:[%s15271_s7 + $0x4ec] sm:$0xf0]  ;;  %v935_v19 = vperm.slane %v12863_v18, 5 }
 0x224   :  { %5546 = vmatpush.bf16.msrb.mxu2 %v8576_v38  ;;  %5568 = vmatpush.bf16.msra.mxu0 %v9136_v42  ;;  %v10074_v38 = vld [vmem:[%s15271_s7 + $0xb08] sm:$0xf0]  ;;  %v10165_v42 = vld [vmem:[%s15271_s7 + $0xde0] sm:$0xf0]  ;;  %v9980_v7 = vld [vmem:[%s15271_s7 + $0x81c] sm:$0xf] }
 0x225   :  { %v2646_v31 = vmax.f32 %v2483_v5, 0.0  ;;  %v8996_v44 = vor.u32 %v10074_v38, %v8995_v35  ;;  %v9360_v27 = vor.u32 %v10165_v42, %v9359_v37  ;;  %v7625_v5 = vld [vmem:[%s15271_s7 + $0x54] sm:$0xf0]  ;;  %v9868_v35 = vld [vmem:[%s15271_s7 + $0x49c] sm:$0xf] }
 0x226   :  { %5561 = vmatpush.bf16.msrb.mxu3 %v8744_v50  ;;  %v9798_v50 = vld [vmem:[%s15271_s7 + $0x26c] sm:$0xf]  ;;  %v8185_v38 = vld [vmem:[%s15271_s7 + $0x4b4] sm:$0xf0]  ;;  %v8101_v12 = vld [vmem:[%s15271_s7 + $0x40c] sm:$0xf0] }
 0x227   :  { %v12771_v41 = vpack.c.bf16 %v2646_v31, %v2646_v31  ;;  %5581 = vmatpush.bf16.msra.mxu1 %v9360_v27  ;;  %v7908_v61 = vor.u32 %v9798_v50, %v7905_v51  ;;  %v7821_v31 = vld [vmem:[%s15271_s7 + $0x1dc] sm:$0xf0]  ;;  %v9994_v27 = vld [vmem:[%s15271_s7 + $0x88c] sm:$0xf] }
 0x228   :  { %5547 = vmatpush.bf16.msrb.mxu2 %v8548_v52  ;;  %5569 = vmatpush.bf16.msra.mxu0 %v9108_v24  ;;  %v2471_v23 = vpop.f32.mrf.mxu0  ;;  %v7936_v52 = vor.u32 %v9805_v39, %v7933_v40  ;;  %v9742_v24 = vld [vmem:[%s15271_s7 + $0xac] sm:$0xf]  ;;  %v9247_v39 = vld [vmem:[%s15271_s7 + $0xce8] sm:$0xf]  ;;  %v10137_v40 = vld [vmem:[%s15271_s7 + $0xd00] sm:$0xf0] }
 0x229   :  { %v7684_v6 = vor.u32 %v9742_v24, %v7681_v56  ;;  %v9248_v37 = vor.u32 %v10137_v40, %v9247_v39  ;;  %v7628_v23 = vor.u32 %v9728_v22, %v7625_v5  ;;  %v8157_v50 = vld [vmem:[%s15271_s7 + $0x47c] sm:$0xf0]  ;;  %v9219_v24 = vld [vmem:[%s15271_s7 + $0xcb0] sm:$0xf]  ;;  %v8636_v5 = vor.u32 %v9980_v7, %v8633_v9  ;;  %v8353_v9 = vld [vmem:[%s15271_s7 + $0x604] sm:$0xf0] }
 0x22a   :  { %5562 = vmatpush.bf16.msrb.mxu3 %v8716_v63  ;;  %v10060_v63 = vld [vmem:[%s15271_s7 + $0xa98] sm:$0xf0] }
 0x22b   :  { %v8940_v36 = vor.u32 %v10060_v63, %v8939_v62  ;;  %v9854_v62 = vld [vmem:[%s15271_s7 + $0x42c] sm:$0xf] }
 0x22c   :  { %5548 = vmatpush.bf16.msrb.mxu2 %v8520_v60  ;;  %5570 = vmatpush.bf16.msra.mxu0 %v9080_v0  ;;  %v9332_v60 = vor.u32 %v10158_v53, %v9331_v20  ;;  %v9303_v0 = vld [vmem:[%s15271_s7 + $0xd58] sm:$0xf]  ;;  %v10130_v20 = vld [vmem:[%s15271_s7 + $0xcc8] sm:$0xf0] }
 0x22e   :  { %5607 = vmatpush.bf16.msra.mxu3 %v8020_v2  ;;  %5582 = vmatpush.bf16.msra.mxu1 %v9332_v60  ;;  %v10151_v2 = vld [vmem:[%s15271_s7 + $0xd70] sm:$0xf0] }
 0x22f   :  { %v9304_v4 = vor.u32 %v10151_v2, %v9303_v0  ;;  %v9191_v0 = vld [vmem:[%s15271_s7 + $0xc78] sm:$0xf] }
 0x230   :  { %5549 = vmatpush.bf16.msrb.mxu2 %v8492_v8  ;;  %5571 = vmatpush.bf16.msra.mxu0 %v9052_v13  ;;  %v12816_v28 = vpop.f32.mrf.mxu3  ;;  %v7880_v8 = vor.u32 %v9791_v57, %v7877_v58  ;;  %v9875_v13 = vld [vmem:[%s15271_s7 + $0x4d4] sm:$0xf]  ;;  %v8692_v57 = vor.u32 %v9994_v27, %v8689_v49  ;;  %v8577_v27 = vld [vmem:[%s15271_s7 + $0x7c4] sm:$0xf0]  ;;  %v9833_v49 = vld [vmem:[%s15271_s7 + $0x384] sm:$0xf] }
 0x231   :  { %v9987_v58 = vld [vmem:[%s15271_s7 + $0x854] sm:$0xf] }
 0x232   :  { %5608 = vmatpush.bf16.msra.mxu3 %v7992_v17  ;;  %5583 = vmatpush.bf16.msra.mxu1 %v9304_v4  ;;  %v9275_v17 = vld [vmem:[%s15271_s7 + $0xd20] sm:$0xf] }
 0x233   :  { %5550 = vmatmul.bf16.vlgmr.msrb.gmra.mxu2 %v12771_v41 }
 0x234   :  { %5594 = vmatpush.bf16.msra.mxu2 %v7796_v11  ;;  %5572 = vmatpush.bf16.msra.mxu0 %v9024_v30  ;;  %v8244_v11 = vor.u32 %v9882_v3, %v8241_v25  ;;  %v9777_v30 = vld [vmem:[%s15271_s7 + $0x1c4] sm:$0xf]  ;;  %v10123_v3 = vld [vmem:[%s15271_s7 + $0xc90] sm:$0xf0] }
 0x235   :  { %v7824_v46 = vor.u32 %v9777_v30, %v7821_v31  ;;  %v9192_v2 = vor.u32 %v10123_v3, %v9191_v0  ;;  %v8465_v30 = vld [vmem:[%s15271_s7 + $0x6e4] sm:$0xf0]  ;;  %v10022_v3 = vld [vmem:[%s15271_s7 + $0x96c] sm:$0xf] }
 0x236   :  { %5609 = vmatpush.bf16.msra.mxu3 %v7964_v33  ;;  %v2495_v16 = vpop.f32.mrf.mxu2  ;;  %v8216_v33 = vor.u32 %v9875_v13, %v8213_v14  ;;  %v9163_v14 = vld [vmem:[%s15271_s7 + $0xc40] sm:$0xf] }
 0x238   :  { %5595 = vmatpush.bf16.msra.mxu2 %v7768_v45  ;;  %5573 = vmatpush.bf16.msra.mxu0 %v8996_v44  ;;  %v9276_v45 = vor.u32 %v10144_v15, %v9275_v17  ;;  %v2510_v26 = vpop.f32.mrf.mxu3  ;;  %v7597_v44 = vld [vmem:[%s15271_s7 + $0x1c] sm:$0xf0]  ;;  %v10043_v15 = vld [vmem:[%s15271_s7 + $0xa14] sm:$0xf] }
 0x239   :  { %v7600_v53 = vor.u32 %v9721_v43, %v7597_v44  ;;  %v8857_v43 = vld [vmem:[%s15271_s7 + $0x9f4] sm:$0xf0]  ;;  %v9966_v44 = vld [vmem:[%s15271_s7 + $0x7ac] sm:$0xf] }
 0x23a   :  { %5610 = vmatpush.bf16.msra.mxu3 %v7936_v52  ;;  %5584 = vmatpush.bf16.msra.mxu1 %v9276_v45  ;;  %v2534_v42 = vpop.f32.mrf.mxu1  ;;  %v8188_v52 = vor.u32 %v9868_v35, %v8185_v38  ;;  %v9973_v45 = vld [vmem:[%s15271_s7 + $0x7e4] sm:$0xf]  ;;  %v9840_v35 = vld [vmem:[%s15271_s7 + $0x3bc] sm:$0xf]  ;;  %v8073_v38 = vld [vmem:[%s15271_s7 + $0x3d4] sm:$0xf0] }
 0x23c   :  { %5596 = vmatpush.bf16.msra.mxu2 %v7740_v10  ;;  %5574 = vmatpush.bf16.msra.mxu0 %v8968_v59  ;;  %v2496_v10 = vadd.f32 %v2495_v16, %v935_v19  ;;  %v8160_v59 = vor.u32 %v9861_v55, %v8157_v50  ;;  %v10116_v16 = vld [vmem:[%s15271_s7 + $0xc58] sm:$0xf0]  ;;  %v8885_v19 = vld [vmem:[%s15271_s7 + $0xa2c] sm:$0xf0]  ;;  %v8045_v55 = vld [vmem:[%s15271_s7 + $0x39c] sm:$0xf0] }
 0x23d   :  { %v8888_v40 = vor.u32 %v10043_v15, %v8885_v19  ;;  %v9924_v50 = vld [vmem:[%s15271_s7 + $0x65c] sm:$0xf]  ;;  %v8493_v15 = vld [vmem:[%s15271_s7 + $0x71c] sm:$0xf0] }
 0x23e   :  { %5611 = vmatpush.bf16.msra.mxu3 %v7908_v61  ;;  %5585 = vmatpush.bf16.msra.mxu1 %v9248_v37  ;;  %v2497_v51 = vpop.f32.mrf.mxu2  ;;  %v2509_v56 = vadd.f32 %v12816_v28, %v2496_v10  ;;  %v8661_v61 = vld [vmem:[%s15271_s7 + $0x86c] sm:$0xf0]  ;;  %v8129_v28 = vld [vmem:[%s15271_s7 + $0x444] sm:$0xf0]  ;;  %v10036_v37 = vld [vmem:[%s15271_s7 + $0x9dc] sm:$0xf] }
 0x240   :  { %5597 = vmatpush.bf16.msra.mxu2 %v7712_v54  ;;  %5575 = vmatpush.bf16.msra.mxu0 %v8940_v36  ;;  %v9220_v54 = vor.u32 %v10130_v20, %v9219_v24  ;;  %v2521_v60 = vpop.f32.mrf.mxu0  ;;  %v10050_v36 = vld [vmem:[%s15271_s7 + $0xa4c] sm:$0xf]  ;;  %v8409_v24 = vld [vmem:[%s15271_s7 + $0x674] sm:$0xf0]  ;;  %v8860_v20 = vor.u32 %v10036_v37, %v8857_v43  ;;  %v9896_v43 = vld [vmem:[%s15271_s7 + $0x57c] sm:$0xf] }
 0x241   :  { %v2522_v63 = vadd.f32 %v2521_v60, %v2509_v56  ;;  %v8916_v17 = vor.u32 %v10050_v36, %v8913_v1  ;;  %v10029_v56 = vld [vmem:[%s15271_s7 + $0x9a4] sm:$0xf]  ;;  %v8549_v60 = vld [vmem:[%s15271_s7 + $0x78c] sm:$0xf0]  ;;  %v936_v36 = vperm.slane %v12863_v18, 6 }
 0x242   :  { %5612 = vmatpush.bf16.msra.mxu3 %v7880_v8  ;;  %5586 = vmatpush.bf16.msra.mxu1 %v9220_v54  ;;  %v2536_v25 = vpop.f32.mrf.mxu1  ;;  %v8132_v8 = vor.u32 %v9854_v62, %v8129_v28  ;;  %v8580_v54 = vor.u32 %v9966_v44, %v8577_v27  ;;  %v9917_v62 = vld [vmem:[%s15271_s7 + $0x624] sm:$0xf]  ;;  %v8381_v28 = vld [vmem:[%s15271_s7 + $0x63c] sm:$0xf0]  ;;  %v7771_v37 = vld [vmem:[%s15271_s7 + $0x158] sm:$0xf] }
 0x243   :  { %v2535_v4 = vadd.f32 %v2534_v42, %v2522_v63  ;;  %v9931_v42 = vld [vmem:[%s15271_s7 + $0x694] sm:$0xf]  ;;  %v8801_v25 = vld [vmem:[%s15271_s7 + $0x984] sm:$0xf0]  ;;  %v8297_v44 = vld [vmem:[%s15271_s7 + $0x594] sm:$0xf0] }
 0x244   :  { %5598 = vmatpush.bf16.msra.mxu2 %v7684_v6  ;;  %5620 = vmatpush.bf16.msrb.mxu0 %v8244_v11  ;;  %v8664_v6 = vor.u32 %v9987_v58, %v8661_v61  ;;  %v9847_v11 = vld [vmem:[%s15271_s7 + $0x3f4] sm:$0xf]  ;;  %v8048_v58 = vor.u32 %v9833_v49, %v8045_v55  ;;  %v8804_v7 = vor.u32 %v10022_v3, %v8801_v25  ;;  %v7995_v3 = vld [vmem:[%s15271_s7 + $0x318] sm:$0xf] }
 0x245   :  { %v2647_v13 = vmax.f32 %v2535_v4, 0.0  ;;  %v8104_v26 = vor.u32 %v9847_v11, %v8101_v12  ;;  %v9952_v4 = vld [vmem:[%s15271_s7 + $0x73c] sm:$0xf]  ;;  %v10015_v12 = vld [vmem:[%s15271_s7 + $0x934] sm:$0xf]  ;;  %v8300_v49 = vor.u32 %v9896_v43, %v8297_v44 }
 0x246   :  { %5613 = vmatpush.bf16.msra.mxu3 %v7852_v29  ;;  %5587 = vmatpush.bf16.msra.mxu1 %v9192_v2  ;;  %v9938_v29 = vld [vmem:[%s15271_s7 + $0x6cc] sm:$0xf]  ;;  %v8384_v2 = vor.u32 %v9917_v62, %v8381_v28  ;;  %v9823_v25 = vld [vmem:[%s15271_s7 + $0x330] sm:$0xf0]  ;;  %v9025_v43 = vld [vmem:[%s15271_s7 + $0xb44] sm:$0xf0] }
 0x247   :  { %v12964_v22 = vpack.c.bf16 %v2647_v13, %v2647_v13  ;;  %v8468_v39 = vor.u32 %v9938_v29, %v8465_v30  ;;  %v8773_v13 = vld [vmem:[%s15271_s7 + $0x94c] sm:$0xf0]  ;;  %v7631_v44 = vld [vmem:[%s15271_s7 + $0x40] sm:$0xf] }
 0x248   :  { %5599 = vmatpush.bf16.msra.mxu2 %v7656_v21  ;;  %5621 = vmatpush.bf16.msrb.mxu0 %v8216_v33  ;;  %v9164_v21 = vor.u32 %v10116_v16, %v9163_v14  ;;  %v2523_v31 = vpop.f32.mrf.mxu0  ;;  %v8605_v33 = vld [vmem:[%s15271_s7 + $0x7fc] sm:$0xf0]  ;;  %v8325_v29 = vld [vmem:[%s15271_s7 + $0x5cc] sm:$0xf0] }
 0x249   :  { %5563 = vmatmul.bf16.vlgmr.msrb.gmra.mxu3 %v12964_v22  ;;  %v8608_v10 = vor.u32 %v9973_v45, %v8605_v33  ;;  %v8776_v45 = vor.u32 %v10015_v12, %v8773_v13  ;;  %v10008_v33 = vld [vmem:[%s15271_s7 + $0x8fc] sm:$0xf]  ;;  %v7967_v13 = vld [vmem:[%s15271_s7 + $0x2e0] sm:$0xf] }
 0x24a   :  { %5614 = vmatpush.bf16.msra.mxu3 %v7824_v46  ;;  %5588 = vmatpush.bf16.msra.mxu1 %v9164_v21  ;;  %v8076_v46 = vor.u32 %v9840_v35, %v8073_v38  ;;  %v7799_v21 = vld [vmem:[%s15271_s7 + $0x190] sm:$0xf]  ;;  %v8745_v35 = vld [vmem:[%s15271_s7 + $0x914] sm:$0xf0]  ;;  %v10092_v12 = vld [vmem:[%s15271_s7 + $0xb9c] sm:$0xf] }
 0x24c   :  { %5600 = vmatpush.bf16.msra.mxu2 %v7628_v23  ;;  %5622 = vmatpush.bf16.msrb.mxu0 %v8188_v52  ;;  %v8437_v23 = vld [vmem:[%s15271_s7 + $0x6ac] sm:$0xf0] }
 0x24d   :  { %v8440_v52 = vor.u32 %v9931_v42, %v8437_v23  ;;  %v9767_v42 = vld [vmem:[%s15271_s7 + $0x170] sm:$0xf0] }
 0x24e   :  { %5659 = vmatpush.bf16.msrb.mxu3 %v8916_v17  ;;  %5633 = vmatpush.bf16.msrb.mxu1 %v8468_v39  ;;  %v9945_v17 = vld [vmem:[%s15271_s7 + $0x704] sm:$0xf] }
 0x24f   :  { %v8496_v31 = vor.u32 %v9945_v17, %v8493_v15  ;;  %v7687_v17 = vld [vmem:[%s15271_s7 + $0xb0] sm:$0xf]  ;;  %v9746_v15 = vld [vmem:[%s15271_s7 + $0xc8] sm:$0xf0] }
 0x250   :  { %5601 = vmatpush.bf16.msra.mxu2 %v7600_v53  ;;  %5623 = vmatpush.bf16.msrb.mxu0 %v8160_v59  ;;  %v2560_v51 = vpop.f32.mrf.mxu3  ;;  %v8412_v53 = vor.u32 %v9924_v50, %v8409_v24  ;;  %v9959_v59 = vld [vmem:[%s15271_s7 + $0x774] sm:$0xf]  ;;  %v7772_v50 = vor.u32 %v9767_v42, %v7771_v37  ;;  %v8023_v24 = vld [vmem:[%s15271_s7 + $0x350] sm:$0xf]  ;;  %v10078_v37 = vld [vmem:[%s15271_s7 + $0xb2c] sm:$0xf] }
 0x251   :  { %v8552_v0 = vor.u32 %v9959_v59, %v8549_v60  ;;  %v9889_v59 = vld [vmem:[%s15271_s7 + $0x544] sm:$0xf]  ;;  %v8269_v60 = vld [vmem:[%s15271_s7 + $0x55c] sm:$0xf0]  ;;  %v7911_v42 = vld [vmem:[%s15271_s7 + $0x270] sm:$0xf] }
 0x252   :  { %5660 = vmatpush.bf16.msrb.mxu3 %v8888_v40  ;;  %5634 = vmatpush.bf16.msrb.mxu1 %v8440_v52  ;;  %v8717_v52 = vld [vmem:[%s15271_s7 + $0x8dc] sm:$0xf0] }
 0x253   :  { %5602 = vmatmul.bf16.vlgmr.msra.gmra.mxu2 %v12580_v48 }
 0x254   :  { %5646 = vmatpush.bf16.msrb.mxu2 %v8692_v57  ;;  %5624 = vmatpush.bf16.msrb.mxu0 %v8132_v8  ;;  %v8829_v57 = vld [vmem:[%s15271_s7 + $0x9bc] sm:$0xf0]  ;;  %v9910_v8 = vld [vmem:[%s15271_s7 + $0x5ec] sm:$0xf] }
 0x255   :  { %v8832_v61 = vor.u32 %v10029_v56, %v8829_v57  ;;  %v8356_v14 = vor.u32 %v9910_v8, %v8353_v9  ;;  %v7743_v56 = vld [vmem:[%s15271_s7 + $0x120] sm:$0xf]  ;;  %v9760_v57 = vld [vmem:[%s15271_s7 + $0x138] sm:$0xf0]  ;;  %v7996_v8 = vor.u32 %v9823_v25, %v7995_v3 }
 0x256   :  { %5661 = vmatpush.bf16.msrb.mxu3 %v8860_v20  ;;  %5635 = vmatpush.bf16.msrb.mxu1 %v8412_v53  ;;  %v2547_v63 = vpop.f32.mrf.mxu2  ;;  %v9830_v20 = vld [vmem:[%s15271_s7 + $0x368] sm:$0xf0]  ;;  %v10064_v25 = vld [vmem:[%s15271_s7 + $0xabc] sm:$0xf] }
 0x257   :  { %v2548_v19 = vadd.f32 %v2547_v63, %v936_v36  ;;  %v8024_v62 = vor.u32 %v9830_v20, %v8023_v24  ;;  %v7744_v63 = vor.u32 %v9760_v57, %v7743_v56  ;;  %v9753_v36 = vld [vmem:[%s15271_s7 + $0x100] sm:$0xf0]  ;;  %v7883_v24 = vld [vmem:[%s15271_s7 + $0x238] sm:$0xf]  ;;  %v9795_v20 = vld [vmem:[%s15271_s7 + $0x250] sm:$0xf0] }
 0x258   :  { %5647 = vmatpush.bf16.msrb.mxu2 %v8664_v6  ;;  %5625 = vmatpush.bf16.msrb.mxu0 %v8104_v26  ;;  %v8521_v6 = vld [vmem:[%s15271_s7 + $0x754] sm:$0xf0]  ;;  %v2562_v1 = vpop.f32.mrf.mxu3  ;;  %v9903_v26 = vld [vmem:[%s15271_s7 + $0x5b4] sm:$0xf]  ;;  %v8695_v57 = vld [vmem:[%s15271_s7 + $0x890] sm:$0xf] }
 0x259   :  { %v8524_v11 = vor.u32 %v9952_v4, %v8521_v6  ;;  %5615 = vmatmul.bf16.vlgmr.msra.gmra.mxu3 %v12551_v32  ;;  %v8328_v38 = vor.u32 %v9903_v26, %v8325_v29  ;;  %v2561_v40 = vadd.f32 %v2560_v51, %v2548_v19  ;;  %v10106_v51 = vld [vmem:[%s15271_s7 + $0xc0c] sm:$0xf]  ;;  %v9109_v4 = vld [vmem:[%s15271_s7 + $0xbec] sm:$0xf0]  ;;  %v7715_v6 = vld [vmem:[%s15271_s7 + $0xe8] sm:$0xf]  ;;  %v8272_v1 = vor.u32 %v9889_v59, %v8269_v60 }
 0x25a   :  { %5662 = vmatpush.bf16.msrb.mxu3 %v8832_v61  ;;  %5636 = vmatpush.bf16.msrb.mxu1 %v8384_v2  ;;  %v2586_v16 = vpop.f32.mrf.mxu1  ;;  %v10085_v26 = vld [vmem:[%s15271_s7 + $0xb64] sm:$0xf]  ;;  %v7939_v29 = vld [vmem:[%s15271_s7 + $0x2a8] sm:$0xf]  ;;  %v7884_v60 = vor.u32 %v9795_v20, %v7883_v24 }
 0x25c   :  { %5648 = vmatpush.bf16.msrb.mxu2 %v8636_v5  ;;  %5626 = vmatpush.bf16.msrb.mxu0 %v8076_v46  ;;  %v9774_v5 = vld [vmem:[%s15271_s7 + $0x1a8] sm:$0xf0]  ;;  %v10001_v46 = vld [vmem:[%s15271_s7 + $0x8c4] sm:$0xf] }
 0x25d   :  { %v7800_v39 = vor.u32 %v9774_v5, %v7799_v21 }
 0x25e   :  { %5663 = vmatpush.bf16.msrb.mxu3 %v8804_v7  ;;  %5637 = vmatpush.bf16.msrb.mxu1 %v8356_v14  ;;  %v2549_v30 = vpop.f32.mrf.mxu2  ;;  %v9816_v14 = vld [vmem:[%s15271_s7 + $0x2f8] sm:$0xf0] }
 0x25f   :  { %v7968_v21 = vor.u32 %v9816_v14, %v7967_v13  ;;  %v9809_v30 = vld [vmem:[%s15271_s7 + $0x2c0] sm:$0xf0] }
 0x260   :  { %5649 = vmatpush.bf16.msrb.mxu2 %v8608_v10  ;;  %5627 = vmatpush.bf16.msrb.mxu0 %v8048_v58  ;;  %v2573_v23 = vpop.f32.mrf.mxu0  ;;  %v8748_v10 = vor.u32 %v10008_v33, %v8745_v35  ;;  %v8720_v58 = vor.u32 %v10001_v46, %v8717_v52  ;;  %v7659_v33 = vld [vmem:[%s15271_s7 + $0x78] sm:$0xf]  ;;  %v9739_v35 = vld [vmem:[%s15271_s7 + $0x90] sm:$0xf0]  ;;  %v937_v46 = vperm.slane %v12863_v18, 7 }
 0x261   :  { %v2574_v27 = vadd.f32 %v2573_v23, %v2561_v40  ;;  %v7660_v40 = vor.u32 %v9739_v35, %v7659_v33  ;;  %v9802_v23 = vld [vmem:[%s15271_s7 + $0x288] sm:$0xf0]  ;;  %v8997_v18 = vld [vmem:[%s15271_s7 + $0xb0c] sm:$0xf0]  ;;  %v9781_v13 = vld [vmem:[%s15271_s7 + $0x1e0] sm:$0xf0] }
 0x262   :  { %5664 = vmatpush.bf16.msrb.mxu3 %v8776_v45  ;;  %5638 = vmatpush.bf16.msrb.mxu1 %v8328_v38  ;;  %v2588_v55 = vpop.f32.mrf.mxu1  ;;  %v7688_v45 = vor.u32 %v9746_v15, %v7687_v17  ;;  %v7940_v38 = vor.u32 %v9809_v30, %v7939_v29  ;;  %v8941_v17 = vld [vmem:[%s15271_s7 + $0xa9c] sm:$0xf0]  ;;  %v8919_v15 = vld [vmem:[%s15271_s7 + $0xa50] sm:$0xf]  ;;  %v9984_v35 = vld [vmem:[%s15271_s7 + $0x838] sm:$0xf0] }
 0x263   :  { %v2587_v53 = vadd.f32 %v2586_v16, %v2574_v27  ;;  %v9081_v16 = vld [vmem:[%s15271_s7 + $0xbb4] sm:$0xf0]  ;;  %v9732_v27 = vld [vmem:[%s15271_s7 + $0x58] sm:$0xf0]  ;;  %v9028_v55 = vor.u32 %v10078_v37, %v9025_v43  ;;  %v8639_v33 = vld [vmem:[%s15271_s7 + $0x820] sm:$0xf] }
 0x264   :  { %5650 = vmatpush.bf16.msrb.mxu2 %v8580_v54  ;;  %v9137_v54 = vld [vmem:[%s15271_s7 + $0xc24] sm:$0xf0]  ;;  %v9084_v5 = vor.u32 %v10092_v12, %v9081_v16  ;;  %v8640_v43 = vor.u32 %v9984_v35, %v8639_v33  ;;  %v8527_v33 = vld [vmem:[%s15271_s7 + $0x740] sm:$0xf]  ;;  %v9956_v35 = vld [vmem:[%s15271_s7 + $0x758] sm:$0xf0] }
 0x265   :  { %v2648_v61 = vmax.f32 %v2587_v53, 0.0  ;;  %v9140_v28 = vor.u32 %v10106_v51, %v9137_v54  ;;  %v10071_v51 = vld [vmem:[%s15271_s7 + $0xaf4] sm:$0xf]  ;;  %v7603_v53 = vld [vmem:[%s15271_s7 + $0x8] sm:$0xf] }
 0x266   :  { %5665 = vmatpush.bf16.msrb.mxu3 %v8748_v10  ;;  %5639 = vmatpush.bf16.msrb.mxu1 %v8300_v49  ;;  %v7912_v49 = vor.u32 %v9802_v23, %v7911_v42  ;;  %v9725_v54 = vld [vmem:[%s15271_s7 + $0x20] sm:$0xf0]  ;;  %v7827_v12 = vld [vmem:[%s15271_s7 + $0x1c8] sm:$0xf]  ;;  %v8891_v42 = vld [vmem:[%s15271_s7 + $0xa18] sm:$0xf] }
 0x267   :  { %v13135_v2 = vpack.c.bf16 %v2648_v61, %v2648_v61  ;;  %v9000_v61 = vor.u32 %v10071_v51, %v8997_v18  ;;  %v7828_v30 = vor.u32 %v9781_v13, %v7827_v12  ;;  %v10047_v23 = vld [vmem:[%s15271_s7 + $0xa30] sm:$0xf0]  ;;  %v10148_v18 = vld [vmem:[%s15271_s7 + $0xd5c] sm:$0xf]  ;;  %v8555_v12 = vld [vmem:[%s15271_s7 + $0x778] sm:$0xf] }
 0x268   :  { %5651 = vmatpush.bf16.msrb.mxu2 %v8552_v0  ;;  %v10099_v0 = vld [vmem:[%s15271_s7 + $0xbd4] sm:$0xf]  ;;  %v2575_v7 = vpop.f32.mrf.mxu0  ;;  %v8892_v24 = vor.u32 %v10047_v23, %v8891_v42  ;;  %v8779_v42 = vld [vmem:[%s15271_s7 + $0x938] sm:$0xf] }
 0x269   :  { %5576 = vmatmul.bf16.vlgmr.msra.gmra.mxu0 %v13135_v2  ;;  %v9112_v9 = vor.u32 %v10099_v0, %v9109_v4  ;;  %v8969_v4 = vld [vmem:[%s15271_s7 + $0xad4] sm:$0xf0]  ;;  %v9963_v13 = vld [vmem:[%s15271_s7 + $0x790] sm:$0xf0] }
 0x26a   :  { %5666 = vmatpush.bf16.msrb.mxu3 %v8720_v58  ;;  %5672 = vmatpush.bf16.msra.mxu0 %v9140_v28  ;;  %v9998_v58 = vld [vmem:[%s15271_s7 + $0x8a8] sm:$0xf0]  ;;  %v7855_v28 = vld [vmem:[%s15271_s7 + $0x200] sm:$0xf]  ;;  %v10019_v23 = vld [vmem:[%s15271_s7 + $0x950] sm:$0xf0] }
 0x26b   :  { %5640 = vmatpush.bf16.msrb.mxu1 %v8272_v1  ;;  %v8696_v3 = vor.u32 %v9998_v58, %v8695_v57  ;;  %v8191_v58 = vld [vmem:[%s15271_s7 + $0x4a0] sm:$0xf] }
 0x26c   :  { %5652 = vmatpush.bf16.msrb.mxu2 %v8524_v11  ;;  %v7716_v11 = vor.u32 %v9753_v36, %v7715_v6  ;;  %v8667_v6 = vld [vmem:[%s15271_s7 + $0x858] sm:$0xf]  ;;  %v9991_v36 = vld [vmem:[%s15271_s7 + $0x870] sm:$0xf0] }
 0x26d   :  { %5667 = vmatmul.bf16.vlgmr.msrb.gmra.mxu3 %v12964_v22  ;;  %v8668_v16 = vor.u32 %v9991_v36, %v8667_v6  ;;  %v10033_v6 = vld [vmem:[%s15271_s7 + $0x9c0] sm:$0xf0] }
 0x26e   :  { %5711 = vmatpush.bf16.msra.mxu3 %v8024_v62  ;;  %5673 = vmatpush.bf16.msra.mxu0 %v9112_v9  ;;  %v7604_v62 = vor.u32 %v9725_v54, %v7603_v53  ;;  %v8972_v9 = vor.u32 %v10064_v25, %v8969_v4  ;;  %v8863_v53 = vld [vmem:[%s15271_s7 + $0x9e0] sm:$0xf]  ;;  %v10040_v54 = vld [vmem:[%s15271_s7 + $0x9f8] sm:$0xf0]  ;;  %v8835_v4 = vld [vmem:[%s15271_s7 + $0x9a8] sm:$0xf] }
 0x270   :  { %5653 = vmatpush.bf16.msrb.mxu2 %v8496_v31  ;;  %v2612_v19 = vpop.f32.mrf.mxu3  ;;  %v9053_v31 = vld [vmem:[%s15271_s7 + $0xb7c] sm:$0xf0] }
 0x272   :  { %5712 = vmatpush.bf16.msra.mxu3 %v7996_v8  ;;  %5674 = vmatpush.bf16.msra.mxu0 %v9084_v5  ;;  %v10162_v5 = vld [vmem:[%s15271_s7 + $0xdcc] sm:$0xf] }
 0x273   :  { %5654 = vmatmul.bf16.vlgmr.msrb.gmra.mxu2 %v12771_v41 }
 0x274   :  { %5698 = vmatpush.bf16.msra.mxu2 %v7800_v39  ;;  %v9056_v39 = vor.u32 %v10085_v26, %v9053_v31  ;;  %v9886_v26 = vld [vmem:[%s15271_s7 + $0x528] sm:$0xf0]  ;;  %v9361_v31 = vld [vmem:[%s15271_s7 + $0xde4] sm:$0xf0] }
 0x276   :  { %5713 = vmatpush.bf16.msra.mxu3 %v7968_v21  ;;  %v2599_v10 = vpop.f32.mrf.mxu2  ;;  %5675 = vmatpush.bf16.msra.mxu0 %v9056_v39 }
 0x277   :  { %v2600_v59 = vadd.f32 %v2599_v10, %v937_v46  ;;  %v9364_v10 = vor.u32 %v10162_v5, %v9361_v31  ;;  %v9879_v46 = vld [vmem:[%s15271_s7 + $0x4f0] sm:$0xf0]  ;;  %v8556_v5 = vor.u32 %v9963_v13, %v8555_v12  ;;  %v9249_v31 = vld [vmem:[%s15271_s7 + $0xd04] sm:$0xf0]  ;;  %v9837_v13 = vld [vmem:[%s15271_s7 + $0x3a0] sm:$0xf0] }
 0x278   :  { %5699 = vmatpush.bf16.msra.mxu2 %v7772_v50  ;;  %v2614_v52 = vpop.f32.mrf.mxu3  ;;  %v7632_v50 = vor.u32 %v9732_v27, %v7631_v44  ;;  %v10155_v44 = vld [vmem:[%s15271_s7 + $0xd94] sm:$0xf]  ;;  %v8219_v27 = vld [vmem:[%s15271_s7 + $0x4d8] sm:$0xf] }
 0x279   :  { %5628 = vmatmul.bf16.vlgmr.msrb.gmra.mxu0 %v12683_v47  ;;  %v2613_v1 = vadd.f32 %v2612_v19, %v2600_v59  ;;  %v10054_v19 = vld [vmem:[%s15271_s7 + $0xa68] sm:$0xf0]  ;;  %v8220_v20 = vor.u32 %v9879_v46, %v8219_v27  ;;  %v9872_v59 = vld [vmem:[%s15271_s7 + $0x4b8] sm:$0xf0]  ;;  %v8107_v27 = vld [vmem:[%s15271_s7 + $0x3f8] sm:$0xf] }
 0x27a   :  { %5714 = vmatpush.bf16.msra.mxu3 %v7940_v38  ;;  %v2638_v56 = vpop.f32.mrf.mxu1  ;;  %5676 = vmatpush.bf16.msra.mxu0 %v9028_v55  ;;  %v8920_v39 = vor.u32 %v10054_v19, %v8919_v15  ;;  %v8611_v55 = vld [vmem:[%s15271_s7 + $0x7e8] sm:$0xf]  ;;  %v10026_v15 = vld [vmem:[%s15271_s7 + $0x988] sm:$0xf0]  ;;  %v9851_v46 = vld [vmem:[%s15271_s7 + $0x410] sm:$0xf0] }
 0x27c   :  { %5700 = vmatpush.bf16.msra.mxu2 %v7744_v63  ;;  %v9788_v63 = vld [vmem:[%s15271_s7 + $0x218] sm:$0xf0] }
 0x27d   :  { %v7856_v7 = vor.u32 %v9788_v63, %v7855_v28  ;;  %v9970_v28 = vld [vmem:[%s15271_s7 + $0x7c8] sm:$0xf0]  ;;  %v8864_v63 = vor.u32 %v10040_v54, %v8863_v53  ;;  %v8108_v53 = vor.u32 %v9851_v46, %v8107_v27  ;;  %v8751_v54 = vld [vmem:[%s15271_s7 + $0x900] sm:$0xf]  ;;  %v9935_v27 = vld [vmem:[%s15271_s7 + $0x6b0] sm:$0xf0] }
 0x27e   :  { %5715 = vmatpush.bf16.msra.mxu3 %v7912_v49  ;;  %v2601_v0 = vpop.f32.mrf.mxu2  ;;  %5677 = vmatpush.bf16.msra.mxu0 %v9000_v61  ;;  %v9333_v49 = vld [vmem:[%s15271_s7 + $0xdac] sm:$0xf0]  ;;  %v9305_v61 = vld [vmem:[%s15271_s7 + $0xd74] sm:$0xf0]  ;;  %v9750_v46 = vld [vmem:[%s15271_s7 + $0xec] sm:$0xf] }
 0x27f   :  { %v9308_v36 = vor.u32 %v10148_v18, %v9305_v61  ;;  %v7801_v18 = vld [vmem:[%s15271_s7 + $0x1ac] sm:$0xf0]  ;;  %v9844_v61 = vld [vmem:[%s15271_s7 + $0x3d8] sm:$0xf0] }
 0x280   :  { %5701 = vmatpush.bf16.msra.mxu2 %v7716_v11  ;;  %v2625_v8 = vpop.f32.mrf.mxu0  ;;  %v10057_v11 = vld [vmem:[%s15271_s7 + $0xa84] sm:$0xf] }
 0x281   :  { %v2626_v14 = vadd.f32 %v2625_v8, %v2613_v1  ;;  %v8944_v38 = vor.u32 %v10057_v11, %v8941_v17  ;;  %v8163_v8 = vld [vmem:[%s15271_s7 + $0x468] sm:$0xf]  ;;  %v9277_v11 = vld [vmem:[%s15271_s7 + $0xd3c] sm:$0xf0]  ;;  %v8807_v17 = vld [vmem:[%s15271_s7 + $0x970] sm:$0xf] }
 0x282   :  { %5716 = vmatpush.bf16.msra.mxu3 %v7884_v60  ;;  %v2640_v21 = vpop.f32.mrf.mxu1  ;;  %5678 = vmatpush.bf16.msra.mxu0 %v8972_v9  ;;  %v3170_v60 = vld [vmem:[%s15272_s8] sm:$0x7f] }
 0x283   :  { %v2639_v29 = vadd.f32 %v2638_v56, %v2626_v14  ;;  %v9336_v56 = vor.u32 %v10155_v44, %v9333_v49  ;;  %v3172_v25 = vperm.slane %v3170_v60, 0  ;;  %v9865_v9 = vld [vmem:[%s15271_s7 + $0x480] sm:$0xf0]  ;;  %v8836_v14 = vor.u32 %v10033_v6, %v8835_v4  ;;  %v10127_v44 = vld [vmem:[%s15271_s7 + $0xcb4] sm:$0xf] }
 0x284   :  { %5702 = vmatpush.bf16.msra.mxu2 %v7688_v45  ;;  %v8247_v45 = vld [vmem:[%s15271_s7 + $0x510] sm:$0xf]  ;;  %v8079_v60 = vld [vmem:[%s15271_s7 + $0x3c0] sm:$0xf] }
 0x285   :  { %v8248_v37 = vor.u32 %v9886_v26, %v8247_v45  ;;  %v10134_v45 = vld [vmem:[%s15271_s7 + $0xcec] sm:$0xf]  ;;  %v8135_v26 = vld [vmem:[%s15271_s7 + $0x430] sm:$0xf]  ;;  %v8080_v6 = vor.u32 %v9844_v61, %v8079_v60 }
 0x286   :  { %5717 = vmatpush.bf16.msra.mxu3 %v7856_v7  ;;  %5679 = vmatpush.bf16.msra.mxu0 %v8944_v38  ;;  %v10141_v7 = vld [vmem:[%s15271_s7 + $0xd24] sm:$0xf]  ;;  %v8808_v38 = vor.u32 %v10026_v15, %v8807_v17  ;;  %v9221_v49 = vld [vmem:[%s15271_s7 + $0xccc] sm:$0xf0] }
 0x287   :  { %v9280_v21 = vor.u32 %v10141_v7, %v9277_v11  ;;  %v8051_v7 = vld [vmem:[%s15271_s7 + $0x388] sm:$0xf]  ;;  %v8471_v15 = vld [vmem:[%s15271_s7 + $0x6d0] sm:$0xf] }
 0x288   :  { %5703 = vmatpush.bf16.msra.mxu2 %v7660_v40  ;;  %v2649_v40 = vmax.f32 %v2639_v29, 0.0  ;;  %v2627_v51 = vpop.f32.mrf.mxu0  ;;  %v9858_v29 = vld [vmem:[%s15271_s7 + $0x448] sm:$0xf0]  ;;  %v7689_v60 = vld [vmem:[%s15271_s7 + $0xcc] sm:$0xf0] }
 0x289   :  { %5680 = vmatmul.bf16.vlgmr.msra.gmra.mxu0 %v13135_v2 }
 0x28a   :  { %v13298_v52 = vpack.c.bf16 %v2649_v40, %v2649_v40  ;;  %5718 = vmatpush.bf16.msra.mxu3 %v7828_v30  ;;  %5724 = vmatpush.bf16.msrb.mxu0 %v8248_v37  ;;  %v8136_v40 = vor.u32 %v9858_v29, %v8135_v26  ;;  %v9942_v26 = vld [vmem:[%s15271_s7 + $0x6e8] sm:$0xf0]  ;;  %v9757_v29 = vld [vmem:[%s15271_s7 + $0x124] sm:$0xf] }
 0x28c   :  { %5704 = vmatpush.bf16.msra.mxu2 %v7632_v50  ;;  %v9977_v50 = vld [vmem:[%s15271_s7 + $0x800] sm:$0xf0]  ;;  %5589 = vmatmul.bf16.vlgmr.msra.gmra.mxu1 %v13298_v52 }
 0x28d   :  { %5685 = vmatpush.bf16.msra.mxu1 %v9364_v10  ;;  %v8612_v57 = vor.u32 %v9977_v50, %v8611_v55  ;;  %5719 = vmatmul.bf16.vlgmr.msra.gmra.mxu3 %v12551_v32  ;;  %v9252_v10 = vor.u32 %v10134_v45, %v9249_v31  ;;  %v8499_v55 = vld [vmem:[%s15271_s7 + $0x708] sm:$0xf]  ;;  %v9949_v50 = vld [vmem:[%s15271_s7 + $0x720] sm:$0xf0] }
 0x28e   :  { %5763 = vmatpush.bf16.msrb.mxu3 %v8920_v39  ;;  %5725 = vmatpush.bf16.msrb.mxu0 %v8220_v20  ;;  %v9771_v20 = vld [vmem:[%s15271_s7 + $0x194] sm:$0xf] }
 0x290   :  { %5705 = vmatpush.bf16.msra.mxu2 %v7604_v62  ;;  %v8583_v62 = vld [vmem:[%s15271_s7 + $0x7b0] sm:$0xf]  ;;  %v5512_v0 = vpop.f32.mrf.mxu3 }
 0x291   :  { %5686 = vmatpush.bf16.msra.mxu1 %v9336_v56  ;;  %v8584_v1 = vor.u32 %v9970_v28, %v8583_v62  ;;  %v10012_v56 = vld [vmem:[%s15271_s7 + $0x918] sm:$0xf0]  ;;  %v7804_v62 = vor.u32 %v9771_v20, %v7801_v18  ;;  %v7969_v20 = vld [vmem:[%s15271_s7 + $0x2fc] sm:$0xf0] }
 0x292   :  { %5764 = vmatpush.bf16.msrb.mxu3 %v8892_v24  ;;  %v8780_v24 = vor.u32 %v10019_v23, %v8779_v42  ;;  %v10120_v28 = vld [vmem:[%s15271_s7 + $0xc7c] sm:$0xf]  ;;  %v8472_v42 = vor.u32 %v9942_v26, %v8471_v15  ;;  %v10082_v15 = vld [vmem:[%s15271_s7 + $0xb48] sm:$0xf0] }
 0x293   :  { %5706 = vmatmul.bf16.vlgmr.msra.gmra.mxu2 %v12580_v48 }
 0x294   :  { %5750 = vmatpush.bf16.msrb.mxu2 %v8696_v3  ;;  %v8192_v3 = vor.u32 %v9872_v59, %v8191_v58  ;;  %v9224_v58 = vor.u32 %v10127_v44, %v9221_v49  ;;  %v8500_v59 = vor.u32 %v9949_v50, %v8499_v55  ;;  %v10103_v44 = vld [vmem:[%s15271_s7 + $0xbf0] sm:$0xf0]  ;;  %v7717_v49 = vld [vmem:[%s15271_s7 + $0x104] sm:$0xf0] }
 0x295   :  { %5687 = vmatpush.bf16.msra.mxu1 %v9308_v36  ;;  %v10113_v36 = vld [vmem:[%s15271_s7 + $0xc44] sm:$0xf] }
 0x296   :  { %5765 = vmatpush.bf16.msrb.mxu3 %v8864_v63  ;;  %5726 = vmatpush.bf16.msrb.mxu0 %v8192_v3  ;;  %v5499_v19 = vpop.f32.mrf.mxu2  ;;  %v9193_v63 = vld [vmem:[%s15271_s7 + $0xc94] sm:$0xf0]  ;;  %v9764_v3 = vld [vmem:[%s15271_s7 + $0x15c] sm:$0xf] }
 0x297   :  { %v5500_v30 = vadd.f32 %v5499_v19, %v3172_v25  ;;  %v7773_v25 = vld [vmem:[%s15271_s7 + $0x174] sm:$0xf0]  ;;  %v9196_v12 = vor.u32 %v10120_v28, %v9193_v63  ;;  %v9143_v19 = vld [vmem:[%s15271_s7 + $0xc10] sm:$0xf]  ;;  %v9806_v28 = vld [vmem:[%s15271_s7 + $0x2ac] sm:$0xf] }
 0x298   :  { %5751 = vmatpush.bf16.msrb.mxu2 %v8668_v16  ;;  %v8164_v16 = vor.u32 %v9865_v9, %v8163_v8  ;;  %v5514_v39 = vpop.f32.mrf.mxu3  ;;  %v8723_v8 = vld [vmem:[%s15271_s7 + $0x8c8] sm:$0xf]  ;;  %v10005_v9 = vld [vmem:[%s15271_s7 + $0x8e0] sm:$0xf0]  ;;  %v7776_v17 = vor.u32 %v9764_v3, %v7773_v25 }
 0x299   :  { %v5513_v37 = vadd.f32 %v5512_v0, %v5500_v30  ;;  %5688 = vmatpush.bf16.msra.mxu1 %v9280_v21  ;;  %v8752_v0 = vor.u32 %v10012_v56, %v8751_v54  ;;  %v10110_v21 = vld [vmem:[%s15271_s7 + $0xc28] sm:$0xf0]  ;;  %v8724_v45 = vor.u32 %v10005_v9, %v8723_v8  ;;  %v7745_v30 = vld [vmem:[%s15271_s7 + $0x13c] sm:$0xf0]  ;;  %v7941_v63 = vld [vmem:[%s15271_s7 + $0x2c4] sm:$0xf0] }
 0x29a   :  { %5766 = vmatpush.bf16.msrb.mxu3 %v8836_v14  ;;  %5727 = vmatpush.bf16.msrb.mxu0 %v8164_v16  ;;  %v5538_v51 = vpop.f32.mrf.mxu1  ;;  %v9827_v14 = vld [vmem:[%s15271_s7 + $0x354] sm:$0xf]  ;;  %v8025_v16 = vld [vmem:[%s15271_s7 + $0x36c] sm:$0xf0]  ;;  %v9144_v39 = vor.u32 %v10110_v21, %v9143_v19  ;;  %v7748_v23 = vor.u32 %v9757_v29, %v7745_v30  ;;  %v8415_v54 = vld [vmem:[%s15271_s7 + $0x660] sm:$0xf]  ;;  %v7944_v8 = vor.u32 %v9806_v28, %v7941_v63 }
 0x29b   :  { %v9087_v56 = vld [vmem:[%s15271_s7 + $0xba0] sm:$0xf]  ;;  %v8387_v25 = vld [vmem:[%s15271_s7 + $0x628] sm:$0xf]  ;;  %v9914_v19 = vld [vmem:[%s15271_s7 + $0x608] sm:$0xf0] }
 0x29c   :  { %5752 = vmatpush.bf16.msrb.mxu2 %v8640_v43  ;;  %v8528_v43 = vor.u32 %v9956_v35, %v8527_v33  ;;  %5641 = vmatmul.bf16.vlgmr.msrb.gmra.mxu1 %v12661_v34  ;;  %v8052_v33 = vor.u32 %v9837_v13, %v8051_v7  ;;  %v8028_v35 = vor.u32 %v9827_v14, %v8025_v16  ;;  %v7661_v7 = vld [vmem:[%s15271_s7 + $0x94] sm:$0xf0]  ;;  %v8359_v16 = vld [vmem:[%s15271_s7 + $0x5f0] sm:$0xf]  ;;  %v9729_v21 = vld [vmem:[%s15271_s7 + $0x44] sm:$0xf] }
 0x29d   :  { %5689 = vmatpush.bf16.msra.mxu1 %v9252_v10  ;;  %v8443_v10 = vld [vmem:[%s15271_s7 + $0x698] sm:$0xf]  ;;  %v9792_v30 = vld [vmem:[%s15271_s7 + $0x23c] sm:$0xf]  ;;  %v8947_v28 = vld [vmem:[%s15271_s7 + $0xa88] sm:$0xf] }
 0x29e   :  { %5767 = vmatpush.bf16.msrb.mxu3 %v8808_v38  ;;  %5728 = vmatpush.bf16.msrb.mxu0 %v8136_v40  ;;  %v9820_v40 = vld [vmem:[%s15271_s7 + $0x31c] sm:$0xf]  ;;  %v8444_v18 = vor.u32 %v9935_v27, %v8443_v10  ;;  %v7605_v10 = vld [vmem:[%s15271_s7 + $0x24] sm:$0xf0]  ;;  %v8697_v27 = vld [vmem:[%s15271_s7 + $0x8ac] sm:$0xf0] }
 0x29f   :  { %v9778_v63 = vld [vmem:[%s15271_s7 + $0x1cc] sm:$0xf] }
 0x2a0   :  { %5753 = vmatpush.bf16.msrb.mxu2 %v8612_v57  ;;  %v5501_v57 = vpop.f32.mrf.mxu2  ;;  %v5525_v4 = vpop.f32.mrf.mxu0 }
 0x2a1   :  { %v5526_v11 = vadd.f32 %v5525_v4, %v5513_v37  ;;  %5690 = vmatpush.bf16.msra.mxu1 %v9224_v58  ;;  %v7997_v37 = vld [vmem:[%s15271_s7 + $0x334] sm:$0xf0]  ;;  %v10096_v57 = vld [vmem:[%s15271_s7 + $0xbb8] sm:$0xf0]  ;;  %v9059_v4 = vld [vmem:[%s15271_s7 + $0xb68] sm:$0xf] }
 0x2a2   :  { %5768 = vmatpush.bf16.msrb.mxu3 %v8780_v24  ;;  %5729 = vmatpush.bf16.msrb.mxu0 %v8108_v53  ;;  %v8000_v50 = vor.u32 %v9820_v40, %v7997_v37  ;;  %v9813_v24 = vld [vmem:[%s15271_s7 + $0x2e4] sm:$0xf]  ;;  %v7720_v53 = vor.u32 %v9750_v46, %v7717_v49  ;;  %v9928_v58 = vld [vmem:[%s15271_s7 + $0x678] sm:$0xf0]  ;;  %v8331_v40 = vld [vmem:[%s15271_s7 + $0x5b8] sm:$0xf] }
 0x2a3   :  { %v13484_v31 = vadd.f32 %v5538_v51, %v5526_v11  ;;  %v7972_v61 = vor.u32 %v9813_v24, %v7969_v20  ;;  %v9799_v11 = vld [vmem:[%s15271_s7 + $0x274] sm:$0xf]  ;;  %v9003_v37 = vld [vmem:[%s15271_s7 + $0xaf8] sm:$0xf]  ;;  %v9785_v49 = vld [vmem:[%s15271_s7 + $0x204] sm:$0xf] }
 0x2a4   :  { %5754 = vmatpush.bf16.msrb.mxu2 %v8584_v1  ;;  %v9165_v1 = vld [vmem:[%s15271_s7 + $0xc5c] sm:$0xf0]  ;;  %v10068_v20 = vld [vmem:[%s15271_s7 + $0xad8] sm:$0xf0] }
 0x2a5   :  { %5691 = vmatpush.bf16.msra.mxu1 %v9196_v12  ;;  %v9168_v38 = vor.u32 %v10113_v36, %v9165_v1  ;;  %v9921_v36 = vld [vmem:[%s15271_s7 + $0x640] sm:$0xf0]  ;;  %v9736_v1 = vld [vmem:[%s15271_s7 + $0x7c] sm:$0xf]  ;;  %v7913_v12 = vld [vmem:[%s15271_s7 + $0x28c] sm:$0xf0] }
 0x2a6   :  { %5769 = vmatpush.bf16.msrb.mxu3 %v8752_v0  ;;  %5730 = vmatpush.bf16.msrb.mxu0 %v8080_v6  ;;  %v8416_v0 = vor.u32 %v9928_v58, %v8415_v54  ;;  %v10089_v6 = vld [vmem:[%s15271_s7 + $0xb80] sm:$0xf0]  ;;  %v8388_v13 = vor.u32 %v9921_v36, %v8387_v25  ;;  %v7664_v14 = vor.u32 %v9736_v1, %v7661_v7  ;;  %v8975_v24 = vld [vmem:[%s15271_s7 + $0xac0] sm:$0xf]  ;;  %v9900_v54 = vld [vmem:[%s15271_s7 + $0x598] sm:$0xf0] }
 0x2a7   :  { %v9060_v9 = vor.u32 %v10089_v6, %v9059_v4  ;;  %v8669_v58 = vld [vmem:[%s15271_s7 + $0x874] sm:$0xf0]  ;;  %v10061_v25 = vld [vmem:[%s15271_s7 + $0xaa0] sm:$0xf0]  ;;  %v10051_v4 = vld [vmem:[%s15271_s7 + $0xa54] sm:$0xf] }
 0x2a8   :  { %5755 = vmatpush.bf16.msrb.mxu2 %v8556_v5  ;;  %v5540_v5 = vpop.f32.mrf.mxu1  ;;  %v5527_v55 = vpop.f32.mrf.mxu0  ;;  %v8921_v6 = vld [vmem:[%s15271_s7 + $0xa6c] sm:$0xf0]  ;;  %v9883_v7 = vld [vmem:[%s15271_s7 + $0x514] sm:$0xf] }
 0x2a9   :  { %5692 = vmatpush.bf16.msra.mxu1 %v9168_v38  ;;  %v7633_v5 = vld [vmem:[%s15271_s7 + $0x5c] sm:$0xf0]  ;;  %v8360_v38 = vor.u32 %v9914_v19, %v8359_v16  ;;  %v9367_v1 = vld [vmem:[%s15271_s7 + $0xdd0] sm:$0xf]  ;;  %v8924_v16 = vor.u32 %v10051_v4, %v8921_v6  ;;  %v10044_v19 = vld [vmem:[%s15271_s7 + $0xa1c] sm:$0xf] }
 0x2aa   :  { %5770 = vmatpush.bf16.msrb.mxu3 %v8724_v45  ;;  %5731 = vmatpush.bf16.msrb.mxu0 %v8052_v33  ;;  %v7916_v45 = vor.u32 %v9799_v11, %v7913_v12  ;;  %v7885_v33 = vld [vmem:[%s15271_s7 + $0x254] sm:$0xf0]  ;;  %v7857_v55 = vld [vmem:[%s15271_s7 + $0x21c] sm:$0xf0]  ;;  %v10166_v11 = vld [vmem:[%s15271_s7 + $0xde8] sm:$0xf0] }
 0x2ab   :  { %v9981_v12 = vld [vmem:[%s15271_s7 + $0x824] sm:$0xf]  ;;  %v9255_v4 = vld [vmem:[%s15271_s7 + $0xcf0] sm:$0xf]  ;;  %v9855_v6 = vld [vmem:[%s15271_s7 + $0x434] sm:$0xf] }
 0x2ac   :  { %5756 = vmatpush.bf16.msrb.mxu2 %v8528_v43  ;;  %v9115_v43 = vld [vmem:[%s15271_s7 + $0xbd8] sm:$0xf]  ;;  %5693 = vmatmul.bf16.vlgmr.msra.gmra.mxu1 %v13298_v52 }
 0x2ad   :  { %v9116_v51 = vor.u32 %v10103_v44, %v9115_v43  ;;  %5737 = vmatpush.bf16.msrb.mxu1 %v8472_v42  ;;  %5732 = vmatmul.bf16.vlgmr.msrb.gmra.mxu0 %v12683_v47  ;;  %v10075_v42 = vld [vmem:[%s15271_s7 + $0xb10] sm:$0xf0]  ;;  %v7888_v43 = vor.u32 %v9792_v30, %v7885_v33  ;;  %v8221_v30 = vld [vmem:[%s15271_s7 + $0x4f4] sm:$0xf0] }
 0x2ae   :  { %5815 = vmatpush.bf16.msra.mxu3 %v8028_v35  ;;  %5776 = vmatpush.bf16.msra.mxu0 %v9144_v39  ;;  %v7636_v39 = vor.u32 %v9729_v21, %v7633_v5  ;;  %v9995_v44 = vld [vmem:[%s15271_s7 + $0x894] sm:$0xf]  ;;  %v9004_v46 = vor.u32 %v10075_v42, %v9003_v37  ;;  %v8893_v21 = vld [vmem:[%s15271_s7 + $0xa34] sm:$0xf0]  ;;  %v9368_v5 = vor.u32 %v10166_v11, %v9367_v1  ;;  %v10037_v42 = vld [vmem:[%s15271_s7 + $0x9e4] sm:$0xf] }
 0x2af   :  { %5771 = vmatmul.bf16.vlgmr.msrb.gmra.mxu3 %v12964_v22  ;;  %v10159_v33 = vld [vmem:[%s15271_s7 + $0xdb0] sm:$0xf0]  ;;  %v10138_v1 = vld [vmem:[%s15271_s7 + $0xd08] sm:$0xf0] }
 0x2b0   :  { %5757 = vmatpush.bf16.msrb.mxu2 %v8500_v59  ;;  %v9743_v59 = vld [vmem:[%s15271_s7 + $0xb4] sm:$0xf] }
 0x2b1   :  { %5738 = vmatpush.bf16.msrb.mxu1 %v8444_v18  ;;  %v7692_v3 = vor.u32 %v9743_v59, %v7689_v60  ;;  %v8700_v18 = vor.u32 %v9995_v44, %v8697_v27  ;;  %v8976_v60 = vor.u32 %v10068_v20, %v8975_v24  ;;  %v9869_v44 = vld [vmem:[%s15271_s7 + $0x4a4] sm:$0xf]  ;;  %v8193_v27 = vld [vmem:[%s15271_s7 + $0x4bc] sm:$0xf0]  ;;  %v10030_v24 = vld [vmem:[%s15271_s7 + $0x9ac] sm:$0xf] }
 0x2b2   :  { %5816 = vmatpush.bf16.msra.mxu3 %v8000_v50  ;;  %5777 = vmatpush.bf16.msra.mxu0 %v9116_v51  ;;  %v8837_v20 = vld [vmem:[%s15271_s7 + $0x9c4] sm:$0xf0] }
 0x2b3   :  { %5758 = vmatmul.bf16.vlgmr.msrb.gmra.mxu2 %v12771_v41 }
 0x2b4   :  { %5802 = vmatpush.bf16.msra.mxu2 %v7804_v62  ;;  %v9088_v62 = vor.u32 %v10096_v57, %v9087_v56  ;;  %v7860_v56 = vor.u32 %v9785_v49, %v7857_v55  ;;  %v9988_v57 = vld [vmem:[%s15271_s7 + $0x85c] sm:$0xf]  ;;  %v9967_v49 = vld [vmem:[%s15271_s7 + $0x7b4] sm:$0xf]  ;;  %v8585_v55 = vld [vmem:[%s15271_s7 + $0x7cc] sm:$0xf0] }
 0x2b5   :  { %5739 = vmatpush.bf16.msrb.mxu1 %v8416_v0  ;;  %v7829_v0 = vld [vmem:[%s15271_s7 + $0x1e4] sm:$0xf0]  ;;  %v8672_v36 = vor.u32 %v9988_v57, %v8669_v58  ;;  %v10145_v58 = vld [vmem:[%s15271_s7 + $0xd40] sm:$0xf0] }
 0x2b6   :  { %5817 = vmatpush.bf16.msra.mxu3 %v7972_v61  ;;  %5778 = vmatpush.bf16.msra.mxu0 %v9088_v62  ;;  %v5551_v26 = vpop.f32.mrf.mxu2  ;;  %v8275_v61 = vld [vmem:[%s15271_s7 + $0x548] sm:$0xf]  ;;  %v9893_v62 = vld [vmem:[%s15271_s7 + $0x560] sm:$0xf0] }
 0x2b7   :  { %v13593_v35 = vadd.f32 %v5551_v26, %v13484_v31  ;;  %v9722_v31 = vld [vmem:[%s15271_s7 + $0xc] sm:$0xf]  ;;  %v9339_v26 = vld [vmem:[%s15271_s7 + $0xd98] sm:$0xf]  ;;  %v8165_v57 = vld [vmem:[%s15271_s7 + $0x484] sm:$0xf0] }
 0x2b8   :  { %5803 = vmatpush.bf16.msra.mxu2 %v7776_v17  ;;  %v9031_v17 = vld [vmem:[%s15271_s7 + $0xb30] sm:$0xf]  ;;  %v7608_v51 = vor.u32 %v9722_v31, %v7605_v10  ;;  %v9340_v31 = vor.u32 %v10159_v33, %v9339_v26  ;;  %v8501_v26 = vld [vmem:[%s15271_s7 + $0x724] sm:$0xf0]  ;;  %v9775_v33 = vld [vmem:[%s15271_s7 + $0x1b0] sm:$0xf0] }
 0x2b9   :  { %v9032_v29 = vor.u32 %v10082_v15, %v9031_v17  ;;  %5740 = vmatpush.bf16.msrb.mxu1 %v8388_v13  ;;  %v8641_v13 = vld [vmem:[%s15271_s7 + $0x83c] sm:$0xf0]  ;;  %v8276_v17 = vor.u32 %v9893_v62, %v8275_v61  ;;  %v8840_v61 = vor.u32 %v10030_v24, %v8837_v20  ;;  %v10117_v24 = vld [vmem:[%s15271_s7 + $0xc60] sm:$0xf0]  ;;  %v9834_v20 = vld [vmem:[%s15271_s7 + $0x38c] sm:$0xf] }
 0x2ba   :  { %5818 = vmatpush.bf16.msra.mxu3 %v7944_v8  ;;  %5779 = vmatpush.bf16.msra.mxu0 %v9060_v9  ;;  %v8249_v8 = vld [vmem:[%s15271_s7 + $0x52c] sm:$0xf0]  ;;  %v7832_v9 = vor.u32 %v9778_v63, %v7829_v0 }
 0x2bb   :  { %v8252_v15 = vor.u32 %v9883_v7, %v8249_v8  ;;  %v8809_v63 = vld [vmem:[%s15271_s7 + $0x98c] sm:$0xf0]  ;;  %v9953_v7 = vld [vmem:[%s15271_s7 + $0x744] sm:$0xf]  ;;  %v8529_v8 = vld [vmem:[%s15271_s7 + $0x75c] sm:$0xf0] }
 0x2bc   :  { %5804 = vmatpush.bf16.msra.mxu2 %v7748_v23  ;;  %v9907_v23 = vld [vmem:[%s15271_s7 + $0x5d0] sm:$0xf0] }
 0x2bd   :  { %5741 = vmatpush.bf16.msrb.mxu1 %v8360_v38  ;;  %v8332_v50 = vor.u32 %v9907_v23, %v8331_v40  ;;  %v9974_v38 = vld [vmem:[%s15271_s7 + $0x7ec] sm:$0xf]  ;;  %v8896_v40 = vor.u32 %v10044_v19, %v8893_v21  ;;  %v8865_v23 = vld [vmem:[%s15271_s7 + $0x9fc] sm:$0xf0]  ;;  %v9848_v19 = vld [vmem:[%s15271_s7 + $0x3fc] sm:$0xf] }
 0x2be   :  { %5819 = vmatpush.bf16.msra.mxu3 %v7916_v45  ;;  %5780 = vmatpush.bf16.msra.mxu0 %v9032_v29  ;;  %v5553_v59 = vpop.f32.mrf.mxu2  ;;  %v8644_v45 = vor.u32 %v9981_v12, %v8641_v13  ;;  %v9876_v29 = vld [vmem:[%s15271_s7 + $0x4dc] sm:$0xf]  ;;  %v8781_v13 = vld [vmem:[%s15271_s7 + $0x954] sm:$0xf0] }
 0x2bf   :  { %v8224_v37 = vor.u32 %v9876_v29, %v8221_v30  ;;  %v9960_v59 = vld [vmem:[%s15271_s7 + $0x77c] sm:$0xf]  ;;  %v8109_v21 = vld [vmem:[%s15271_s7 + $0x414] sm:$0xf0] }
 0x2c0   :  { %5805 = vmatpush.bf16.msra.mxu2 %v7720_v53  ;;  %v8303_v53 = vld [vmem:[%s15271_s7 + $0x580] sm:$0xf]  ;;  %v10016_v12 = vld [vmem:[%s15271_s7 + $0x93c] sm:$0xf]  ;;  %v7807_v30 = vld [vmem:[%s15271_s7 + $0x198] sm:$0xf] }
 0x2c1   :  { %5742 = vmatpush.bf16.msrb.mxu1 %v8332_v50  ;;  %v8868_v50 = vor.u32 %v10037_v42, %v8865_v23  ;;  %v8784_v29 = vor.u32 %v10016_v12, %v8781_v13  ;;  %v9932_v13 = vld [vmem:[%s15271_s7 + $0x69c] sm:$0xf] }
 0x2c2   :  { %5820 = vmatpush.bf16.msra.mxu3 %v7888_v43  ;;  %5781 = vmatpush.bf16.msra.mxu0 %v9004_v46  ;;  %v9311_v43 = vld [vmem:[%s15271_s7 + $0xd60] sm:$0xf]  ;;  %v10152_v46 = vld [vmem:[%s15271_s7 + $0xd78] sm:$0xf0] }
 0x2c4   :  { %5806 = vmatpush.bf16.msra.mxu2 %v7692_v3  ;;  %v8304_v3 = vor.u32 %v9900_v54, %v8303_v53  ;;  %v8588_v53 = vor.u32 %v9967_v49, %v8585_v55  ;;  %v9283_v54 = vld [vmem:[%s15271_s7 + $0xd28] sm:$0xf]  ;;  %v7779_v49 = vld [vmem:[%s15271_s7 + $0x160] sm:$0xf]  ;;  %v9768_v55 = vld [vmem:[%s15271_s7 + $0x178] sm:$0xf0] }
 0x2c6   :  { %5821 = vmatpush.bf16.msra.mxu3 %v7860_v56  ;;  %5782 = vmatpush.bf16.msra.mxu0 %v8976_v60  ;;  %v9862_v56 = vld [vmem:[%s15271_s7 + $0x46c] sm:$0xf]  ;;  %v8557_v60 = vld [vmem:[%s15271_s7 + $0x794] sm:$0xf0] }
 0x2c7   :  { %5743 = vmatpush.bf16.msrb.mxu1 %v8304_v3  ;;  %v8168_v62 = vor.u32 %v9862_v56, %v8165_v57  ;;  %v9284_v3 = vor.u32 %v10145_v58, %v9283_v54  ;;  %v8053_v57 = vld [vmem:[%s15271_s7 + $0x3a4] sm:$0xf0]  ;;  %v8031_v58 = vld [vmem:[%s15271_s7 + $0x358] sm:$0xf] }
 0x2c8   :  { %5807 = vmatpush.bf16.msra.mxu2 %v7664_v14  ;;  %v8948_v14 = vor.u32 %v10061_v25, %v8947_v28  ;;  %v10023_v28 = vld [vmem:[%s15271_s7 + $0x974] sm:$0xf]  ;;  %v8560_v25 = vor.u32 %v9960_v59, %v8557_v60  ;;  %v7780_v60 = vor.u32 %v9768_v55, %v7779_v49  ;;  %v9918_v55 = vld [vmem:[%s15271_s7 + $0x62c] sm:$0xf] }
 0x2c9   :  { %v9831_v59 = vld [vmem:[%s15271_s7 + $0x370] sm:$0xf0] }
 0x2ca   :  { %5822 = vmatpush.bf16.msra.mxu3 %v7832_v9  ;;  %5783 = vmatpush.bf16.msra.mxu0 %v8948_v14  ;;  %v8812_v9 = vor.u32 %v10023_v28, %v8809_v63  ;;  %v9145_v28 = vld [vmem:[%s15271_s7 + $0xc2c] sm:$0xf0] }
 0x2cb   :  { %5744 = vmatpush.bf16.msrb.mxu1 %v8276_v17  ;;  %v8532_v17 = vor.u32 %v9953_v7, %v8529_v8  ;;  %v8003_v8 = vld [vmem:[%s15271_s7 + $0x320] sm:$0xf] }
 0x2cc   :  { %5808 = vmatpush.bf16.msra.mxu2 %v7636_v39  ;;  %v8613_v39 = vld [vmem:[%s15271_s7 + $0x804] sm:$0xf0]  ;;  %v13793_v14 = vpop.f32.mrf.mxu3 }
 0x2cd   :  { %v8616_v10 = vor.u32 %v9974_v38, %v8613_v39  ;;  %5784 = vmatmul.bf16.vlgmr.msra.gmra.mxu0 %v13135_v2  ;;  %5823 = vmatmul.bf16.vlgmr.msra.gmra.mxu3 %v12551_v32  ;;  %v8112_v38 = vor.u32 %v9848_v19, %v8109_v21  ;;  %v10009_v39 = vld [vmem:[%s15271_s7 + $0x904] sm:$0xf]  ;;  %v7723_v19 = vld [vmem:[%s15271_s7 + $0xf0] sm:$0xf]  ;;  %v9754_v21 = vld [vmem:[%s15271_s7 + $0x108] sm:$0xf0] }
 0x2ce   :  { %5867 = vmatpush.bf16.msrb.mxu3 %v8924_v16  ;;  %5828 = vmatpush.bf16.msrb.mxu0 %v8252_v15  ;;  %v9256_v16 = vor.u32 %v10138_v1, %v9255_v4  ;;  %v9227_v15 = vld [vmem:[%s15271_s7 + $0xcb8] sm:$0xf]  ;;  %v9761_v4 = vld [vmem:[%s15271_s7 + $0x140] sm:$0xf0] }
 0x2cf   :  { %5789 = vmatpush.bf16.msra.mxu1 %v9368_v5  ;;  %v10131_v5 = vld [vmem:[%s15271_s7 + $0xcd0] sm:$0xf0] }
 0x2d0   :  { %5809 = vmatpush.bf16.msra.mxu2 %v7608_v51  ;;  %5745 = vmatmul.bf16.vlgmr.msrb.gmra.mxu1 %v12661_v34  ;;  %v8196_v51 = vor.u32 %v9869_v44, %v8193_v27  ;;  %v9228_v42 = vor.u32 %v10131_v5, %v9227_v15  ;;  %v9199_v44 = vld [vmem:[%s15271_s7 + $0xc80] sm:$0xf]  ;;  %v10124_v27 = vld [vmem:[%s15271_s7 + $0xc98] sm:$0xf0]  ;;  %v8445_v15 = vld [vmem:[%s15271_s7 + $0x6b4] sm:$0xf0] }
 0x2d1   :  { %v9200_v56 = vor.u32 %v10124_v27, %v9199_v44  ;;  %v7947_v44 = vld [vmem:[%s15271_s7 + $0x2b0] sm:$0xf]  ;;  %v9810_v27 = vld [vmem:[%s15271_s7 + $0x2c8] sm:$0xf0] }
 0x2d2   :  { %5868 = vmatpush.bf16.msrb.mxu3 %v8896_v40  ;;  %5829 = vmatpush.bf16.msrb.mxu0 %v8224_v37  ;;  %v8753_v40 = vld [vmem:[%s15271_s7 + $0x91c] sm:$0xf0] }
 0x2d3   :  { %5810 = vmatmul.bf16.vlgmr.msra.gmra.mxu2 %v12580_v48  ;;  %5790 = vmatpush.bf16.msra.mxu1 %v9340_v31  ;;  %v9841_v31 = vld [vmem:[%s15271_s7 + $0x3c4] sm:$0xf] }
 0x2d4   :  { %5854 = vmatpush.bf16.msrb.mxu2 %v8700_v18  ;;  %v9312_v18 = vor.u32 %v10152_v46, %v9311_v43  ;;  %v7808_v43 = vor.u32 %v9775_v33, %v7807_v30  ;;  %v8756_v46 = vor.u32 %v10009_v39, %v8753_v40  ;;  %v5566_v54 = vpop.f32.mrf.mxu3  ;;  %v9817_v30 = vld [vmem:[%s15271_s7 + $0x300] sm:$0xf0]  ;;  %v8448_v33 = vor.u32 %v9932_v13, %v8445_v15  ;;  %v10072_v13 = vld [vmem:[%s15271_s7 + $0xafc] sm:$0xf]  ;;  %v7611_v15 = vld [vmem:[%s15271_s7 + $0x10] sm:$0xf] }
 0x2d5   :  { %v9925_v39 = vld [vmem:[%s15271_s7 + $0x664] sm:$0xf] }
 0x2d6   :  { %5869 = vmatpush.bf16.msrb.mxu3 %v8868_v50  ;;  %5830 = vmatpush.bf16.msrb.mxu0 %v8196_v51  ;;  %v13767_v0 = vpop.f32.mrf.mxu2  ;;  %v9171_v51 = vld [vmem:[%s15271_s7 + $0xc48] sm:$0xf]  ;;  %v10093_v40 = vld [vmem:[%s15271_s7 + $0xba4] sm:$0xf] }
 0x2d7   :  { %5791 = vmatpush.bf16.msra.mxu1 %v9312_v18  ;;  %v10002_v18 = vld [vmem:[%s15271_s7 + $0x8cc] sm:$0xf]  ;;  %v9172_v1 = vor.u32 %v10117_v24, %v9171_v51  ;;  %v9061_v51 = vld [vmem:[%s15271_s7 + $0xb84] sm:$0xf0] }
 0x2d8   :  { %5855 = vmatpush.bf16.msrb.mxu2 %v8672_v36  ;;  %v8137_v36 = vld [vmem:[%s15271_s7 + $0x44c] sm:$0xf0]  ;;  %v8389_v24 = vld [vmem:[%s15271_s7 + $0x644] sm:$0xf0] }
 0x2d9   :  { %v8140_v11 = vor.u32 %v9855_v6, %v8137_v36  ;;  %v8056_v6 = vor.u32 %v9834_v20, %v8053_v57  ;;  %v8032_v36 = vor.u32 %v9831_v59, %v8031_v58  ;;  %v7667_v20 = vld [vmem:[%s15271_s7 + $0x80] sm:$0xf]  ;;  %v7919_v58 = vld [vmem:[%s15271_s7 + $0x278] sm:$0xf]  ;;  %v9803_v59 = vld [vmem:[%s15271_s7 + $0x290] sm:$0xf0] }
 0x2da   :  { %5870 = vmatpush.bf16.msrb.mxu3 %v8840_v61  ;;  %5831 = vmatpush.bf16.msrb.mxu0 %v8168_v62  ;;  %v9939_v61 = vld [vmem:[%s15271_s7 + $0x6d4] sm:$0xf] }
 0x2db   :  { %5792 = vmatpush.bf16.msra.mxu1 %v9284_v3  ;;  %v10107_v62 = vld [vmem:[%s15271_s7 + $0xc14] sm:$0xf]  ;;  %v8473_v3 = vld [vmem:[%s15271_s7 + $0x6ec] sm:$0xf0] }
 0x2dc   :  { %5856 = vmatpush.bf16.msrb.mxu2 %v8644_v45  ;;  %v9946_v45 = vld [vmem:[%s15271_s7 + $0x70c] sm:$0xf]  ;;  %v9148_v7 = vor.u32 %v10107_v62, %v9145_v28  ;;  %v9911_v28 = vld [vmem:[%s15271_s7 + $0x5f4] sm:$0xf] }
 0x2dd   :  { %v8504_v23 = vor.u32 %v9946_v45, %v8501_v26  ;;  %v13910_v45 = vpop.f32.mrf.mxu3 }
 0x2de   :  { %5871 = vmatpush.bf16.msrb.mxu3 %v8812_v9  ;;  %5832 = vmatpush.bf16.msrb.mxu0 %v8140_v11  ;;  %v5605_v37 = vpop.f32.mrf.mxu2  ;;  %v9824_v9 = vld [vmem:[%s15271_s7 + $0x338] sm:$0xf0]  ;;  %v8476_v11 = vor.u32 %v9939_v61, %v8473_v3  ;;  %v8392_v61 = vor.u32 %v9918_v55, %v8389_v24  ;;  %v9033_v3 = vld [vmem:[%s15271_s7 + $0xb4c] sm:$0xf0]  ;;  %v10058_v24 = vld [vmem:[%s15271_s7 + $0xa8c] sm:$0xf] }
 0x2df   :  { %5793 = vmatpush.bf16.msra.mxu1 %v9256_v16  ;;  %v10100_v16 = vld [vmem:[%s15271_s7 + $0xbdc] sm:$0xf]  ;;  %v8004_v5 = vor.u32 %v9824_v9, %v8003_v8  ;;  %v9089_v37 = vld [vmem:[%s15271_s7 + $0xbbc] sm:$0xf0] }
 0x2e0   :  { %5857 = vmatpush.bf16.msrb.mxu2 %v8616_v10  ;;  %v8081_v10 = vld [vmem:[%s15271_s7 + $0x3dc] sm:$0xf0]  ;;  %v9796_v8 = vld [vmem:[%s15271_s7 + $0x258] sm:$0xf0] }
 0x2e1   :  { %v8084_v50 = vor.u32 %v9841_v31, %v8081_v10  ;;  %v9747_v31 = vld [vmem:[%s15271_s7 + $0xd0] sm:$0xf0] }
 0x2e2   :  { %5872 = vmatpush.bf16.msrb.mxu3 %v8784_v29  ;;  %5833 = vmatpush.bf16.msrb.mxu0 %v8112_v38  ;;  %v7975_v29 = vld [vmem:[%s15271_s7 + $0x2e8] sm:$0xf]  ;;  %v7724_v38 = vor.u32 %v9754_v21, %v7723_v19  ;;  %v9726_v19 = vld [vmem:[%s15271_s7 + $0x28] sm:$0xf0] }
 0x2e3   :  { %5794 = vmatpush.bf16.msra.mxu1 %v9228_v42  ;;  %v8417_v42 = vld [vmem:[%s15271_s7 + $0x67c] sm:$0xf0]  ;;  %v7976_v10 = vor.u32 %v9817_v30, %v7975_v29 }
 0x2e4   :  { %5858 = vmatpush.bf16.msrb.mxu2 %v8588_v53  ;;  %v8725_v53 = vld [vmem:[%s15271_s7 + $0x8e4] sm:$0xf0] }
 0x2e5   :  { %v8728_v63 = vor.u32 %v10002_v18, %v8725_v53  ;;  %v9740_v18 = vld [vmem:[%s15271_s7 + $0x98] sm:$0xf0]  ;;  %v7948_v53 = vor.u32 %v9810_v27, %v7947_v44  ;;  %v8305_v44 = vld [vmem:[%s15271_s7 + $0x59c] sm:$0xf0] }
 0x2e6   :  { %5873 = vmatpush.bf16.msrb.mxu3 %v8756_v46  ;;  %5834 = vmatpush.bf16.msrb.mxu0 %v8084_v50  ;;  %v8420_v46 = vor.u32 %v9925_v39, %v8417_v42  ;;  %v10086_v50 = vld [vmem:[%s15271_s7 + $0xb6c] sm:$0xf]  ;;  %v13963_v54 = vpop.f32.mrf.mxu0  ;;  %v7668_v62 = vor.u32 %v9740_v18, %v7667_v20  ;;  %v9789_v39 = vld [vmem:[%s15271_s7 + $0x220] sm:$0xf0]  ;;  %v7612_v42 = vor.u32 %v9726_v19, %v7611_v15  ;;  %v7835_v20 = vld [vmem:[%s15271_s7 + $0x1d0] sm:$0xf] }
 0x2e7   :  { %5795 = vmatpush.bf16.msra.mxu1 %v9200_v56  ;;  %v5618_v56 = vpop.f32.mrf.mxu3  ;;  %v9064_v57 = vor.u32 %v10086_v50, %v9061_v51  ;;  %v9890_v50 = vld [vmem:[%s15271_s7 + $0x54c] sm:$0xf]  ;;  %v8277_v51 = vld [vmem:[%s15271_s7 + $0x564] sm:$0xf0]  ;;  %v8227_v15 = vld [vmem:[%s15271_s7 + $0x4e0] sm:$0xf] }
 0x2e8   :  { %5859 = vmatpush.bf16.msrb.mxu2 %v8560_v25  ;;  %v7751_v25 = vld [vmem:[%s15271_s7 + $0x128] sm:$0xf]  ;;  %v9782_v18 = vld [vmem:[%s15271_s7 + $0x1e8] sm:$0xf0]  ;;  %v9880_v19 = vld [vmem:[%s15271_s7 + $0x4f8] sm:$0xf0] }
 0x2e9   :  { %v7752_v12 = vor.u32 %v9761_v4, %v7751_v25  ;;  %v8361_v25 = vld [vmem:[%s15271_s7 + $0x60c] sm:$0xf0]  ;;  %v7639_v4 = vld [vmem:[%s15271_s7 + $0x48] sm:$0xf] }
 0x2ea   :  { %5874 = vmatpush.bf16.msrb.mxu3 %v8728_v63  ;;  %5835 = vmatpush.bf16.msrb.mxu0 %v8056_v6  ;;  %v10079_v63 = vld [vmem:[%s15271_s7 + $0xb34] sm:$0xf]  ;;  %v9733_v6 = vld [vmem:[%s15271_s7 + $0x60] sm:$0xf0]  ;;  %v8364_v9 = vor.u32 %v9911_v28, %v8361_v25  ;;  %v8949_v56 = vld [vmem:[%s15271_s7 + $0xaa4] sm:$0xf0] }
 0x2eb   :  { %5796 = vmatpush.bf16.msra.mxu1 %v9172_v1  ;;  %v9036_v1 = vor.u32 %v10079_v63, %v9033_v3  ;;  %v9887_v28 = vld [vmem:[%s15271_s7 + $0x530] sm:$0xf0]  ;;  %v7836_v63 = vor.u32 %v9782_v18, %v7835_v20  ;;  %v9369_v3 = vld [vmem:[%s15271_s7 + $0xdec] sm:$0xf0]  ;;  %v8647_v25 = vld [vmem:[%s15271_s7 + $0x828] sm:$0xf] }
 0x2ec   :  { %5860 = vmatpush.bf16.msrb.mxu2 %v8532_v17  ;;  %v9117_v17 = vld [vmem:[%s15271_s7 + $0xbf4] sm:$0xf0]  ;;  %v10142_v20 = vld [vmem:[%s15271_s7 + $0xd2c] sm:$0xf]  ;;  %v8171_v18 = vld [vmem:[%s15271_s7 + $0x470] sm:$0xf] }
 0x2ed   :  { %v9120_v26 = vor.u32 %v10100_v16, %v9117_v17  ;;  %5836 = vmatmul.bf16.vlgmr.msrb.gmra.mxu0 %v12683_v47  ;;  %5875 = vmatmul.bf16.vlgmr.msrb.gmra.mxu3 %v12964_v22  ;;  %v9005_v16 = vld [vmem:[%s15271_s7 + $0xb14] sm:$0xf0] }
 0x2ee   :  { %5919 = vmatpush.bf16.msra.mxu3 %v8032_v36  ;;  %5880 = vmatpush.bf16.msra.mxu0 %v9148_v7  ;;  %v7920_v36 = vor.u32 %v9803_v59, %v7919_v58  ;;  %v7891_v7 = vld [vmem:[%s15271_s7 + $0x240] sm:$0xf]  ;;  %v8333_v17 = vld [vmem:[%s15271_s7 + $0x5d4] sm:$0xf0]  ;;  %v5579_v29 = vpop.f32.mrf.mxu0  ;;  %v10055_v58 = vld [vmem:[%s15271_s7 + $0xa70] sm:$0xf0] }
 0x2ef   :  { %5841 = vmatpush.bf16.msrb.mxu1 %v8476_v11  ;;  %v7640_v11 = vor.u32 %v9733_v6, %v7639_v4  ;;  %v7892_v21 = vor.u32 %v9796_v8, %v7891_v7  ;;  %v9985_v4 = vld [vmem:[%s15271_s7 + $0x840] sm:$0xf0]  ;;  %v8280_v8 = vor.u32 %v9890_v50, %v8277_v51  ;;  %v10034_v50 = vld [vmem:[%s15271_s7 + $0x9c8] sm:$0xf0] }
 0x2f0   :  { %5861 = vmatpush.bf16.msrb.mxu2 %v8504_v23  ;;  %v7695_v23 = vld [vmem:[%s15271_s7 + $0xb8] sm:$0xf]  ;;  %5797 = vmatmul.bf16.vlgmr.msra.gmra.mxu1 %v13298_v52  ;;  %v14021_v30 = vpop.f32.mrf.mxu3 }
 0x2f1   :  { %v7696_v49 = vor.u32 %v9747_v31, %v7695_v23  ;;  %v10065_v23 = vld [vmem:[%s15271_s7 + $0xac4] sm:$0xf]  ;;  %v8977_v31 = vld [vmem:[%s15271_s7 + $0xadc] sm:$0xf0] }
 0x2f2   :  { %5920 = vmatpush.bf16.msra.mxu3 %v8004_v5  ;;  %5881 = vmatpush.bf16.msra.mxu0 %v9120_v26  ;;  %v8703_v5 = vld [vmem:[%s15271_s7 + $0x898] sm:$0xf]  ;;  %v9999_v26 = vld [vmem:[%s15271_s7 + $0x8b0] sm:$0xf0]  ;;  %v8980_v55 = vor.u32 %v10065_v23, %v8977_v31  ;;  %v8199_v23 = vld [vmem:[%s15271_s7 + $0x4a8] sm:$0xf] }
 0x2f3   :  { %5862 = vmatmul.bf16.vlgmr.msrb.gmra.mxu2 %v12771_v41  ;;  %5842 = vmatpush.bf16.msrb.mxu1 %v8448_v33  ;;  %v9008_v33 = vor.u32 %v10072_v13, %v9005_v16  ;;  %v8648_v16 = vor.u32 %v9985_v4, %v8647_v25  ;;  %v9873_v31 = vld [vmem:[%s15271_s7 + $0x4c0] sm:$0xf0] }
 0x2f4   :  { %5906 = vmatpush.bf16.msra.mxu2 %v7808_v43  ;;  %v9092_v43 = vor.u32 %v10093_v40, %v9089_v37 }
 0x2f6   :  { %5921 = vmatpush.bf16.msra.mxu3 %v7976_v10  ;;  %5882 = vmatpush.bf16.msra.mxu0 %v9092_v43  ;;  %v8704_v10 = vor.u32 %v9999_v26, %v8703_v5  ;;  %v9897_v43 = vld [vmem:[%s15271_s7 + $0x584] sm:$0xf]  ;;  %v14090_v6 = vpop.f32.mrf.mxu0  ;;  %v8619_v5 = vld [vmem:[%s15271_s7 + $0x7f0] sm:$0xf]  ;;  %v9978_v26 = vld [vmem:[%s15271_s7 + $0x808] sm:$0xf0] }
 0x2f7   :  { %5843 = vmatpush.bf16.msrb.mxu1 %v8420_v46  ;;  %v8675_v46 = vld [vmem:[%s15271_s7 + $0x860] sm:$0xf] }
 0x2f8   :  { %5907 = vmatpush.bf16.msra.mxu2 %v7780_v60  ;;  %v13971_v60 = vpop.f32.mrf.mxu2 }
 0x2fa   :  { %5922 = vmatpush.bf16.msra.mxu3 %v7948_v53  ;;  %5883 = vmatpush.bf16.msra.mxu0 %v9064_v57  ;;  %v8308_v53 = vor.u32 %v9897_v43, %v8305_v44  ;;  %v8927_v57 = vld [vmem:[%s15271_s7 + $0xa58] sm:$0xf]  ;;  %v9971_v44 = vld [vmem:[%s15271_s7 + $0x7d0] sm:$0xf0] }
 0x2fb   :  { %5844 = vmatpush.bf16.msrb.mxu1 %v8392_v61  ;;  %v10163_v61 = vld [vmem:[%s15271_s7 + $0xdd4] sm:$0xf]  ;;  %v8928_v7 = vor.u32 %v10055_v58, %v8927_v57  ;;  %v8591_v43 = vld [vmem:[%s15271_s7 + $0x7b8] sm:$0xf]  ;;  %v9285_v57 = vld [vmem:[%s15271_s7 + $0xd44] sm:$0xf0] }
 0x2fc   :  { %5908 = vmatpush.bf16.msra.mxu2 %v7752_v12  ;;  %v9904_v12 = vld [vmem:[%s15271_s7 + $0x5bc] sm:$0xf]  ;;  %v9372_v13 = vor.u32 %v10163_v61, %v9369_v3  ;;  %v8563_v58 = vld [vmem:[%s15271_s7 + $0x780] sm:$0xf]  ;;  %v9288_v25 = vor.u32 %v10142_v20, %v9285_v57 }
 0x2fd   :  { %v8336_v37 = vor.u32 %v9904_v12, %v8333_v17  ;;  %v10048_v12 = vld [vmem:[%s15271_s7 + $0xa38] sm:$0xf0] }
 0x2fe   :  { %5923 = vmatpush.bf16.msra.mxu3 %v7920_v36  ;;  %5884 = vmatpush.bf16.msra.mxu0 %v9036_v1  ;;  %v5670_v36 = vpop.f32.mrf.mxu3  ;;  %v8952_v1 = vor.u32 %v10058_v24, %v8949_v56  ;;  %v10156_v17 = vld [vmem:[%s15271_s7 + $0xd9c] sm:$0xf]  ;;  %v8592_v24 = vor.u32 %v9971_v44, %v8591_v43  ;;  %v5565_v56 = vadd.f32 %v13793_v14, %v13593_v35  ;;  %v8815_v35 = vld [vmem:[%s15271_s7 + $0x978] sm:$0xf]  ;;  %v10027_v14 = vld [vmem:[%s15271_s7 + $0x990] sm:$0xf0] }
 0x2ff   :  { %5845 = vmatpush.bf16.msrb.mxu1 %v8364_v9  ;;  %v8143_v36 = vld [vmem:[%s15271_s7 + $0x438] sm:$0xf]  ;;  %v8759_v44 = vld [vmem:[%s15271_s7 + $0x908] sm:$0xf] }
 0x300   :  { %5909 = vmatpush.bf16.msra.mxu2 %v7724_v38  ;;  %v7863_v38 = vld [vmem:[%s15271_s7 + $0x208] sm:$0xf]  ;;  %v5657_v40 = vpop.f32.mrf.mxu2 }
 0x301   :  { %v7864_v27 = vor.u32 %v9789_v39, %v7863_v38  ;;  %v8871_v38 = vld [vmem:[%s15271_s7 + $0x9e8] sm:$0xf]  ;;  %v10041_v39 = vld [vmem:[%s15271_s7 + $0xa00] sm:$0xf0] }
 0x302   :  { %5924 = vmatpush.bf16.msra.mxu3 %v7892_v21  ;;  %5885 = vmatpush.bf16.msra.mxu0 %v9008_v33  ;;  %v9341_v21 = vld [vmem:[%s15271_s7 + $0xdb4] sm:$0xf0]  ;;  %v8228_v33 = vor.u32 %v9880_v19, %v8227_v15  ;;  %v8787_v19 = vld [vmem:[%s15271_s7 + $0x940] sm:$0xf] }
 0x303   :  { %5846 = vmatpush.bf16.msrb.mxu1 %v8336_v37  ;;  %v9344_v40 = vor.u32 %v10156_v17, %v9341_v21  ;;  %v8620_v37 = vor.u32 %v9978_v26, %v8619_v5  ;;  %v10020_v21 = vld [vmem:[%s15271_s7 + $0x958] sm:$0xf0] }
 0x304   :  { %5910 = vmatpush.bf16.msra.mxu2 %v7696_v49  ;;  %v9992_v49 = vld [vmem:[%s15271_s7 + $0x878] sm:$0xf0] }
 0x305   :  { %v8676_v59 = vor.u32 %v9992_v49, %v8675_v46  ;;  %v8872_v46 = vor.u32 %v10041_v39, %v8871_v38  ;;  %v8200_v49 = vor.u32 %v9873_v31, %v8199_v23  ;;  %v9852_v38 = vld [vmem:[%s15271_s7 + $0x418] sm:$0xf0]  ;;  %v9229_v39 = vld [vmem:[%s15271_s7 + $0xcd4] sm:$0xf0] }
 0x306   :  { %5925 = vmatpush.bf16.msra.mxu3 %v7864_v27  ;;  %5886 = vmatpush.bf16.msra.mxu0 %v8980_v55  ;;  %v5631_v27 = vpop.f32.mrf.mxu0  ;;  %v8843_v55 = vld [vmem:[%s15271_s7 + $0x9b0] sm:$0xf]  ;;  %v9772_v23 = vld [vmem:[%s15271_s7 + $0x19c] sm:$0xf]  ;;  %v7809_v31 = vld [vmem:[%s15271_s7 + $0x1b4] sm:$0xf0] }
 0x307   :  { %5847 = vmatpush.bf16.msrb.mxu1 %v8308_v53  ;;  %v9866_v53 = vld [vmem:[%s15271_s7 + $0x488] sm:$0xf0]  ;;  %v8844_v61 = vor.u32 %v10034_v50, %v8843_v55  ;;  %v10013_v27 = vld [vmem:[%s15271_s7 + $0x920] sm:$0xf0]  ;;  %v7812_v57 = vor.u32 %v9772_v23, %v7809_v31  ;;  %v8005_v23 = vld [vmem:[%s15271_s7 + $0x33c] sm:$0xf0] }
 0x308   :  { %5911 = vmatpush.bf16.msra.mxu2 %v7668_v62  ;;  %v8255_v62 = vld [vmem:[%s15271_s7 + $0x518] sm:$0xf] }
 0x309   :  { %v8256_v9 = vor.u32 %v9887_v28, %v8255_v62  ;;  %v5578_v62 = vadd.f32 %v13963_v54, %v5565_v56  ;;  %v8172_v28 = vor.u32 %v9866_v53, %v8171_v18  ;;  %v10135_v54 = vld [vmem:[%s15271_s7 + $0xcf4] sm:$0xf] }
 0x30a   :  { %5926 = vmatpush.bf16.msra.mxu3 %v7836_v63  ;;  %5887 = vmatpush.bf16.msra.mxu0 %v8952_v1  ;;  %v5590_v63 = vpop.f32.mrf.mxu1  ;;  %v9859_v1 = vld [vmem:[%s15271_s7 + $0x450] sm:$0xf0] }
 0x30b   :  { %5848 = vmatpush.bf16.msrb.mxu1 %v8280_v8  ;;  %v9257_v8 = vld [vmem:[%s15271_s7 + $0xd0c] sm:$0xf0]  ;;  %v8144_v15 = vor.u32 %v9859_v1, %v8143_v36  ;;  %v9838_v1 = vld [vmem:[%s15271_s7 + $0x3a8] sm:$0xf0] }
 0x30c   :  { %5912 = vmatpush.bf16.msra.mxu2 %v7640_v11  ;;  %v8899_v11 = vld [vmem:[%s15271_s7 + $0xa20] sm:$0xf]  ;;  %v9260_v5 = vor.u32 %v10135_v54, %v9257_v8  ;;  %v10006_v54 = vld [vmem:[%s15271_s7 + $0x8e8] sm:$0xf0]  ;;  %v8033_v8 = vld [vmem:[%s15271_s7 + $0x374] sm:$0xf0] }
 0x30d   :  { %v8900_v29 = vor.u32 %v10048_v12, %v8899_v11  ;;  %5888 = vmatmul.bf16.vlgmr.msra.gmra.mxu0 %v13135_v2  ;;  %5927 = vmatmul.bf16.vlgmr.msra.gmra.mxu3 %v12551_v32  ;;  %v9957_v11 = vld [vmem:[%s15271_s7 + $0x760] sm:$0xf0] }
 0x30e   :  { %5971 = vmatpush.bf16.msrb.mxu3 %v8928_v7  ;;  %5932 = vmatpush.bf16.msrb.mxu0 %v8256_v9  ;;  %v5591_v7 = vadd.f32 %v5590_v63, %v5578_v62  ;;  %v8535_v9 = vld [vmem:[%s15271_s7 + $0x748] sm:$0xf]  ;;  %v14194_v12 = vpop.f32.mrf.mxu0  ;;  %v8760_v62 = vor.u32 %v10013_v27, %v8759_v44  ;;  %v10114_v63 = vld [vmem:[%s15271_s7 + $0xc4c] sm:$0xf]  ;;  %v9123_v44 = vld [vmem:[%s15271_s7 + $0xbe0] sm:$0xf] }
 0x30f   :  { %5893 = vmatpush.bf16.msra.mxu1 %v9372_v13  ;;  %v8816_v13 = vor.u32 %v10027_v14, %v8815_v35  ;;  %v8536_v26 = vor.u32 %v9957_v11, %v8535_v9  ;;  %v7781_v35 = vld [vmem:[%s15271_s7 + $0x17c] sm:$0xf0]  ;;  %v10104_v27 = vld [vmem:[%s15271_s7 + $0xbf8] sm:$0xf0] }
 0x310   :  { %5913 = vmatpush.bf16.msra.mxu2 %v7612_v42  ;;  %v10149_v42 = vld [vmem:[%s15271_s7 + $0xd64] sm:$0xf]  ;;  %5849 = vmatmul.bf16.vlgmr.msrb.gmra.mxu1 %v12661_v34  ;;  %10170 = vtanh.f32 %v5591_v7  ;;  %v9828_v7 = vld [vmem:[%s15271_s7 + $0x35c] sm:$0xf] }
 0x312   :  { %5972 = vmatpush.bf16.msrb.mxu3 %v8900_v29  ;;  %5933 = vmatpush.bf16.msrb.mxu0 %v8228_v33  ;;  %v10128_v29 = vld [vmem:[%s15271_s7 + $0xcbc] sm:$0xf]  ;;  %v8115_v33 = vld [vmem:[%s15271_s7 + $0x400] sm:$0xf] }
 0x313   :  { %5914 = vmatmul.bf16.vlgmr.msra.gmra.mxu2 %v12580_v48  ;;  %5894 = vmatpush.bf16.msra.mxu1 %v9344_v40  ;;  %v8507_v40 = vld [vmem:[%s15271_s7 + $0x710] sm:$0xf]  ;;  %v8116_v43 = vor.u32 %v9852_v38, %v8115_v33  ;;  %v9232_v55 = vor.u32 %v10128_v29, %v9229_v39  ;;  %v8036_v33 = vor.u32 %v9828_v7, %v8033_v8  ;;  %v10090_v7 = vld [vmem:[%s15271_s7 + $0xb88] sm:$0xf0] }
 0x314   :  { %5958 = vmatpush.bf16.msrb.mxu2 %v8704_v10  ;;  %v9313_v10 = vld [vmem:[%s15271_s7 + $0xd7c] sm:$0xf0]  ;;  %v9922_v8 = vld [vmem:[%s15271_s7 + $0x648] sm:$0xf0] }
 0x315   :  { %v9316_v51 = vor.u32 %v10149_v42, %v9313_v10  ;;  %v8788_v42 = vor.u32 %v10020_v21, %v8787_v19  ;;  %v9758_v21 = vld [vmem:[%s15271_s7 + $0x12c] sm:$0xf] }
 0x316   :  { %5973 = vmatpush.bf16.msrb.mxu3 %v8872_v46  ;;  %5934 = vmatpush.bf16.msrb.mxu0 %v8200_v49  ;;  %v5707_v3 = vpop.f32.mrf.mxu2  ;;  %v5592_v46 = vpop.f32.mrf.mxu1 }
 0x317   :  { %5895 = vmatpush.bf16.msra.mxu1 %v9316_v51  ;;  %v5720_v49 = vpop.f32.mrf.mxu3  ;;  %v8087_v51 = vld [vmem:[%s15271_s7 + $0x3c8] sm:$0xf]  ;;  %v10171_v20 = vpop.eup %10170  ;;  %v9751_v46 = vld [vmem:[%s15271_s7 + $0xf4] sm:$0xf] }
 0x318   :  { %5959 = vmatpush.bf16.msrb.mxu2 %v8676_v59  ;;  %v9964_v59 = vld [vmem:[%s15271_s7 + $0x798] sm:$0xf0]  ;;  %6225 = vst [vmem:[#allocation2] sm:$0xff] %v10171_v20  ;;  %v7977_v20 = vld [vmem:[%s15271_s7 + $0x304] sm:$0xf0] }
 0x319   :  { %v8564_v4 = vor.u32 %v9964_v59, %v8563_v58  ;;  %v10121_v58 = vld [vmem:[%s15271_s7 + $0xc84] sm:$0xf]  ;;  %v9201_v59 = vld [vmem:[%s15271_s7 + $0xc9c] sm:$0xf0] }
 0x31a   :  { %5974 = vmatpush.bf16.msrb.mxu3 %v8844_v61  ;;  %5935 = vmatpush.bf16.msrb.mxu0 %v8172_v28  ;;  %v5683_v61 = vpop.f32.mrf.mxu0  ;;  %v9765_v28 = vld [vmem:[%s15271_s7 + $0x164] sm:$0xf]  ;;  %v9204_v36 = vor.u32 %v10121_v58, %v9201_v59  ;;  %v9095_v58 = vld [vmem:[%s15271_s7 + $0xba8] sm:$0xf] }
 0x31b   :  { %5896 = vmatpush.bf16.msra.mxu1 %v9288_v25  ;;  %v8059_v25 = vld [vmem:[%s15271_s7 + $0x390] sm:$0xf]  ;;  %v7784_v11 = vor.u32 %v9765_v28, %v7781_v35  ;;  %v10097_v59 = vld [vmem:[%s15271_s7 + $0xbc0] sm:$0xf0]  ;;  %v7697_v28 = vld [vmem:[%s15271_s7 + $0xd4] sm:$0xf0] }
 0x31c   :  { %5960 = vmatpush.bf16.msrb.mxu2 %v8648_v16  ;;  %v14199_v16 = vld [vmem:[%s15272_s8] sm:$0x7f]  ;;  %v8060_v29 = vor.u32 %v9838_v1, %v8059_v25  ;;  %v9807_v25 = vld [vmem:[%s15271_s7 + $0x2b4] sm:$0xf]  ;;  %v9067_v1 = vld [vmem:[%s15271_s7 + $0xb70] sm:$0xf] }
 0x31d   :  { %v3174_v17 = vperm.slane %v14199_v16, 2  ;;  %v3173_v18 = vperm.slane %v14199_v16, 1  ;;  %v9929_v61 = vld [vmem:[%s15271_s7 + $0x680] sm:$0xf0] }
 0x31e   :  { %5975 = vmatpush.bf16.msrb.mxu3 %v8816_v13  ;;  %5936 = vmatpush.bf16.msrb.mxu0 %v8144_v15  ;;  %v5709_v56 = vpop.f32.mrf.mxu2  ;;  %v8479_v13 = vld [vmem:[%s15271_s7 + $0x6d8] sm:$0xf]  ;;  %v10111_v15 = vld [vmem:[%s15271_s7 + $0xc30] sm:$0xf0]  ;;  %v5642_v38 = vpop.f32.mrf.mxu1 }
 0x31f   :  { %v5708_v10 = vadd.f32 %v5707_v3, %v3174_v17  ;;  %5897 = vmatpush.bf16.msra.mxu1 %v9260_v5  ;;  %v9173_v3 = vld [vmem:[%s15271_s7 + $0xc64] sm:$0xf0]  ;;  %v5604_v9 = vadd.f32 %v13767_v0, %v3173_v18  ;;  %v9151_v17 = vld [vmem:[%s15271_s7 + $0xc18] sm:$0xf]  ;;  %v9943_v0 = vld [vmem:[%s15271_s7 + $0x6f0] sm:$0xf0]  ;;  %v5722_v39 = vpop.f32.mrf.mxu3 }
 0x320   :  { %5961 = vmatpush.bf16.msrb.mxu2 %v8620_v37  ;;  %v9950_v37 = vld [vmem:[%s15271_s7 + $0x728] sm:$0xf0]  ;;  %v7753_v5 = vld [vmem:[%s15271_s7 + $0x144] sm:$0xf0]  ;;  %v8480_v31 = vor.u32 %v9943_v0, %v8479_v13  ;;  %v7921_v0 = vld [vmem:[%s15271_s7 + $0x294] sm:$0xf0] }
 0x321   :  { %v8508_v50 = vor.u32 %v9950_v37, %v8507_v40  ;;  %v14245_v53 = vadd.f32 %v5720_v49, %v5708_v10  ;;  %v9176_v40 = vor.u32 %v10114_v63, %v9173_v3  ;;  %v9152_v37 = vor.u32 %v10111_v15, %v9151_v17  ;;  %v7725_v49 = vld [vmem:[%s15271_s7 + $0x10c] sm:$0xf0]  ;;  %v9730_v39 = vld [vmem:[%s15271_s7 + $0x4c] sm:$0xf] }
 0x322   :  { %5976 = vmatpush.bf16.msrb.mxu3 %v8788_v42  ;;  %5937 = vmatpush.bf16.msrb.mxu0 %v8116_v43  ;;  %v9821_v42 = vld [vmem:[%s15271_s7 + $0x324] sm:$0xf]  ;;  %v7756_v10 = vor.u32 %v9758_v21, %v7753_v5  ;;  %v8451_v43 = vld [vmem:[%s15271_s7 + $0x6a0] sm:$0xf]  ;;  %v7728_v56 = vor.u32 %v9751_v46, %v7725_v49  ;;  %v9096_v3 = vor.u32 %v10097_v59, %v9095_v58  ;;  %v10076_v49 = vld [vmem:[%s15271_s7 + $0xb18] sm:$0xf0] }
 0x323   :  { %5898 = vmatpush.bf16.msra.mxu1 %v9232_v55  ;;  %v9068_v15 = vor.u32 %v10090_v7, %v9067_v1  ;;  %v9011_v46 = vld [vmem:[%s15271_s7 + $0xb00] sm:$0xf]  ;;  %v7865_v58 = vld [vmem:[%s15271_s7 + $0x224] sm:$0xf0]  ;;  %v8955_v1 = vld [vmem:[%s15271_s7 + $0xa90] sm:$0xf] }
 0x324   :  { %5962 = vmatpush.bf16.msrb.mxu2 %v8592_v24  ;;  %v9845_v24 = vld [vmem:[%s15271_s7 + $0x3e0] sm:$0xf0] }
 0x325   :  { %v8088_v14 = vor.u32 %v9845_v24, %v8087_v51  ;;  %v9124_v51 = vor.u32 %v10104_v27, %v9123_v44  ;;  %v9814_v24 = vld [vmem:[%s15271_s7 + $0x2ec] sm:$0xf] }
 0x326   :  { %5977 = vmatpush.bf16.msrb.mxu3 %v8760_v62  ;;  %v9744_v62 = vld [vmem:[%s15271_s7 + $0xbc] sm:$0xf]  ;;  %v5644_v63 = vpop.f32.mrf.mxu1 }
 0x327   :  { %5938 = vmatpush.bf16.msrb.mxu0 %v8088_v14  ;;  %5899 = vmatpush.bf16.msra.mxu1 %v9204_v36  ;;  %v7980_v14 = vor.u32 %v9814_v24, %v7977_v20  ;;  %v7700_v36 = vor.u32 %v9744_v62, %v7697_v28  ;;  %v9996_v20 = vld [vmem:[%s15271_s7 + $0x89c] sm:$0xf]  ;;  %v8983_v28 = vld [vmem:[%s15271_s7 + $0xac8] sm:$0xf] }
 0x328   :  { %5963 = vmatpush.bf16.msrb.mxu2 %v8564_v4  ;;  %v8731_v4 = vld [vmem:[%s15271_s7 + $0x8d0] sm:$0xf] }
 0x329   :  { %v8732_v19 = vor.u32 %v10006_v54, %v8731_v4  ;;  %v7949_v4 = vld [vmem:[%s15271_s7 + $0x2cc] sm:$0xf0] }
 0x32a   :  { %v7952_v17 = vor.u32 %v9807_v25, %v7949_v4  ;;  %v9901_v25 = vld [vmem:[%s15271_s7 + $0x5a0] sm:$0xf0] }
 0x32b   :  { %5978 = vmatpush.bf16.msrb.mxu3 %v8732_v19  ;;  %5939 = vmatpush.bf16.msrb.mxu0 %v8060_v29  ;;  %v9800_v19 = vld [vmem:[%s15271_s7 + $0x27c] sm:$0xf]  ;;  %v10083_v29 = vld [vmem:[%s15271_s7 + $0xb50] sm:$0xf0] }
 0x32c   :  { %5964 = vmatpush.bf16.msrb.mxu2 %v8536_v26  ;;  %v5617_v26 = vadd.f32 %v13910_v45, %v5604_v9  ;;  %5900 = vmatpush.bf16.msra.mxu1 %v9176_v40  ;;  %v9737_v9 = vld [vmem:[%s15271_s7 + $0x84] sm:$0xf]  ;;  %v7641_v40 = vld [vmem:[%s15271_s7 + $0x64] sm:$0xf0] }
 0x32e   :  { %v5630_v45 = vadd.f32 %v14090_v6, %v5617_v26  ;;  %v9936_v6 = vld [vmem:[%s15271_s7 + $0x6b8] sm:$0xf0]  ;;  %5940 = vmatmul.bf16.vlgmr.msrb.gmra.mxu0 %v12683_v47  ;;  %5979 = vmatmul.bf16.vlgmr.msrb.gmra.mxu3 %v12964_v22  ;;  %v8367_v26 = vld [vmem:[%s15271_s7 + $0x5f8] sm:$0xf] }
 0x32f   :  { %6023 = vmatpush.bf16.msra.mxu3 %v8036_v33  ;;  %5984 = vmatpush.bf16.msra.mxu0 %v9152_v37  ;;  %v8452_v18 = vor.u32 %v9936_v6, %v8451_v43  ;;  %v14408_v37 = vpop.f32.mrf.mxu0  ;;  %v7893_v43 = vld [vmem:[%s15271_s7 + $0x25c] sm:$0xf0]  ;;  %v7644_v6 = vor.u32 %v9730_v39, %v7641_v40  ;;  %v10167_v40 = vld [vmem:[%s15271_s7 + $0xdf0] sm:$0xf0] }
 0x330   :  { %5965 = vmatpush.bf16.msrb.mxu2 %v8508_v50  ;;  %v5643_v55 = vadd.f32 %v5642_v38, %v5630_v45  ;;  %v8008_v50 = vor.u32 %v9821_v42, %v8005_v23  ;;  %5945 = vmatpush.bf16.msrb.mxu1 %v8480_v31  ;;  %v9915_v38 = vld [vmem:[%s15271_s7 + $0x610] sm:$0xf0]  ;;  %v7924_v23 = vor.u32 %v9800_v19, %v7921_v0  ;;  %v5694_v45 = vpop.f32.mrf.mxu1 }
 0x331   :  { %5901 = vmatmul.bf16.vlgmr.msra.gmra.mxu1 %v13298_v52  ;;  %v8368_v27 = vor.u32 %v9915_v38, %v8367_v26  ;;  %v8929_v26 = vld [vmem:[%s15271_s7 + $0xa74] sm:$0xf0] }
 0x332   :  { %v5656_v35 = vadd.f32 %v13971_v60, %v5643_v55  ;;  %v8395_v60 = vld [vmem:[%s15271_s7 + $0x630] sm:$0xf]  ;;  %v9908_v55 = vld [vmem:[%s15271_s7 + $0x5d8] sm:$0xf0]  ;;  %v14447_v59 = vpop.f32.mrf.mxu3  ;;  %v8257_v38 = vld [vmem:[%s15271_s7 + $0x534] sm:$0xf0] }
 0x333   :  { %5966 = vmatmul.bf16.vlgmr.msrb.gmra.mxu2 %v12771_v41  ;;  %6024 = vmatpush.bf16.msra.mxu3 %v8008_v50  ;;  %v8396_v21 = vor.u32 %v9922_v8, %v8395_v60  ;;  %v9723_v50 = vld [vmem:[%s15271_s7 + $0x14] sm:$0xf]  ;;  %v8677_v60 = vld [vmem:[%s15271_s7 + $0x87c] sm:$0xf0] }
 0x334   :  { %6010 = vmatpush.bf16.msra.mxu2 %v7812_v57  ;;  %v8423_v57 = vld [vmem:[%s15271_s7 + $0x668] sm:$0xf]  ;;  %5985 = vmatpush.bf16.msra.mxu0 %v9124_v51  ;;  %v5669_v13 = vadd.f32 %v14021_v30, %v5656_v35  ;;  %v9039_v30 = vld [vmem:[%s15271_s7 + $0xb38] sm:$0xf]  ;;  %v7613_v51 = vld [vmem:[%s15271_s7 + $0x2c] sm:$0xf0] }
 0x335   :  { %5946 = vmatpush.bf16.msrb.mxu1 %v8452_v18  ;;  %v8424_v54 = vor.u32 %v9929_v61, %v8423_v57  ;;  %v9040_v31 = vor.u32 %v10083_v29, %v9039_v30  ;;  %v8705_v18 = vld [vmem:[%s15271_s7 + $0x8b4] sm:$0xf0]  ;;  %v9786_v57 = vld [vmem:[%s15271_s7 + $0x20c] sm:$0xf]  ;;  %v7616_v62 = vor.u32 %v9723_v50, %v7613_v51  ;;  %v10069_v35 = vld [vmem:[%s15271_s7 + $0xae0] sm:$0xf0] }
 0x336   :  { %v14397_v33 = vpop.f32.mrf.mxu2  ;;  %v5682_v42 = vadd.f32 %v14194_v12, %v5669_v13  ;;  %v8339_v12 = vld [vmem:[%s15271_s7 + $0x5c0] sm:$0xf]  ;;  %v8708_v63 = vor.u32 %v9996_v20, %v8705_v18  ;;  %v8984_v8 = vor.u32 %v10069_v35, %v8983_v28  ;;  %v10062_v13 = vld [vmem:[%s15271_s7 + $0xaa8] sm:$0xf0]  ;;  %v9884_v29 = vld [vmem:[%s15271_s7 + $0x51c] sm:$0xf] }
 0x337   :  { %6025 = vmatpush.bf16.msra.mxu3 %v7980_v14  ;;  %v8340_v61 = vor.u32 %v9908_v55, %v8339_v12  ;;  %v5735_v4 = vpop.f32.mrf.mxu0  ;;  %v9877_v55 = vld [vmem:[%s15271_s7 + $0x4e4] sm:$0xf]  ;;  %v8229_v50 = vld [vmem:[%s15271_s7 + $0x4fc] sm:$0xf0]  ;;  %v10160_v51 = vld [vmem:[%s15271_s7 + $0xdb8] sm:$0xf0] }
 0x338   :  { %6011 = vmatpush.bf16.msra.mxu2 %v7784_v11  ;;  %v7669_v11 = vld [vmem:[%s15271_s7 + $0x9c] sm:$0xf0]  ;;  %5986 = vmatpush.bf16.msra.mxu0 %v9096_v3  ;;  %v5695_v44 = vadd.f32 %v5694_v45, %v5682_v42  ;;  %v8311_v3 = vld [vmem:[%s15271_s7 + $0x588] sm:$0xf]  ;;  %v5696_v7 = vpop.f32.mrf.mxu1  ;;  %v9982_v42 = vld [vmem:[%s15271_s7 + $0x82c] sm:$0xf]  ;;  %v8956_v45 = vor.u32 %v10062_v13, %v8955_v1 }
 0x339   :  { %5947 = vmatpush.bf16.msrb.mxu1 %v8424_v54  ;;  %v7672_v5 = vor.u32 %v9737_v9, %v7669_v11  ;;  %v7868_v54 = vor.u32 %v9786_v57, %v7865_v58  ;;  %v8283_v9 = vld [vmem:[%s15271_s7 + $0x550] sm:$0xf]  ;;  %v9894_v11 = vld [vmem:[%s15271_s7 + $0x568] sm:$0xf0]  ;;  %v8312_v0 = vor.u32 %v9901_v25, %v8311_v3  ;;  %v8873_v58 = vld [vmem:[%s15271_s7 + $0xa04] sm:$0xf0] }
 0x33a   :  { %10172 = vtanh.f32 %v5695_v44  ;;  %v8260_v44 = vor.u32 %v9884_v29, %v8257_v38  ;;  %v8621_v20 = vld [vmem:[%s15271_s7 + $0x80c] sm:$0xf0]  ;;  %v10038_v57 = vld [vmem:[%s15271_s7 + $0x9ec] sm:$0xf]  ;;  %v9319_v28 = vld [vmem:[%s15271_s7 + $0xd68] sm:$0xf] }
 0x33b   :  { %6026 = vmatpush.bf16.msra.mxu3 %v7952_v17  ;;  %v9779_v17 = vld [vmem:[%s15271_s7 + $0x1d4] sm:$0xf]  ;;  %v9870_v35 = vld [vmem:[%s15271_s7 + $0x4ac] sm:$0xf]  ;;  %v9968_v3 = vld [vmem:[%s15271_s7 + $0x7bc] sm:$0xf]  ;;  %v8876_v4 = vor.u32 %v10038_v57, %v8873_v58 }
 0x33c   :  { %6012 = vmatpush.bf16.msra.mxu2 %v7756_v10  ;;  %5987 = vmatpush.bf16.msra.mxu0 %v9068_v15  ;;  %v9793_v10 = vld [vmem:[%s15271_s7 + $0x244] sm:$0xf]  ;;  %v7837_v15 = vld [vmem:[%s15271_s7 + $0x1ec] sm:$0xf0]  ;;  %v8593_v25 = vld [vmem:[%s15271_s7 + $0x7d4] sm:$0xf0] }
 0x33d   :  { %5948 = vmatpush.bf16.msrb.mxu1 %v8396_v21  ;;  %v7896_v24 = vor.u32 %v9793_v10, %v7893_v43  ;;  %v9375_v21 = vld [vmem:[%s15271_s7 + $0xdd8] sm:$0xf]  ;;  %v7840_v39 = vor.u32 %v9779_v17, %v7837_v15  ;;  %v5774_v10 = vpop.f32.mrf.mxu3  ;;  %v8284_v43 = vor.u32 %v9894_v11, %v8283_v9  ;;  %v8596_v7 = vor.u32 %v9968_v3, %v8593_v25  ;;  %v9863_v9 = vld [vmem:[%s15271_s7 + $0x474] sm:$0xf]  ;;  %v8173_v11 = vld [vmem:[%s15271_s7 + $0x48c] sm:$0xf0] }
 0x33e   :  { %v5761_v14 = vpop.f32.mrf.mxu2  ;;  %v9376_v12 = vor.u32 %v10167_v40, %v9375_v21  ;;  %v10146_v13 = vld [vmem:[%s15271_s7 + $0xd48] sm:$0xf0]  ;;  %v9961_v17 = vld [vmem:[%s15271_s7 + $0x784] sm:$0xf]  ;;  %v8565_v15 = vld [vmem:[%s15271_s7 + $0x79c] sm:$0xf0] }
 0x33f   :  { %6027 = vmatpush.bf16.msra.mxu3 %v7924_v23  ;;  %v8649_v23 = vld [vmem:[%s15271_s7 + $0x844] sm:$0xf0]  ;;  %v10024_v21 = vld [vmem:[%s15271_s7 + $0x97c] sm:$0xf]  ;;  %v9263_v29 = vld [vmem:[%s15271_s7 + $0xcf8] sm:$0xf] }
 0x340   :  { %6013 = vmatpush.bf16.msra.mxu2 %v7728_v56  ;;  %5988 = vmatpush.bf16.msra.mxu0 %v9040_v31  ;;  %v9012_v56 = vor.u32 %v10076_v49, %v9011_v46  ;;  %v10173_v19 = vpop.eup %10172  ;;  %v8652_v46 = vor.u32 %v9982_v42, %v8649_v23  ;;  %v9347_v49 = vld [vmem:[%s15271_s7 + $0xda0] sm:$0xf]  ;;  %v8201_v14 = vld [vmem:[%s15271_s7 + $0x4c4] sm:$0xf0]  ;;  %v9856_v38 = vld [vmem:[%s15271_s7 + $0x43c] sm:$0xf] }
 0x341   :  { %5949 = vmatpush.bf16.msrb.mxu1 %v8368_v27  ;;  %6226 = vst [vmem:[#allocation2 + $0x8] sm:$0xff] %v10173_v19  ;;  %v10045_v27 = vld [vmem:[%s15271_s7 + $0xa24] sm:$0xf]  ;;  %v10139_v42 = vld [vmem:[%s15271_s7 + $0xd10] sm:$0xf0] }
 0x342   :  { %v9954_v23 = vld [vmem:[%s15271_s7 + $0x74c] sm:$0xf]  ;;  %v9776_v57 = vld [vmem:[%s15271_s7 + $0x1b8] sm:$0xf0]  ;;  %v8089_v25 = vld [vmem:[%s15271_s7 + $0x3e4] sm:$0xf0] }
 0x343   :  { %6028 = vmatpush.bf16.msra.mxu3 %v7896_v24  ;;  %v9975_v24 = vld [vmem:[%s15271_s7 + $0x7f4] sm:$0xf]  ;;  %v9842_v3 = vld [vmem:[%s15271_s7 + $0x3cc] sm:$0xf] }
 0x344   :  { %6014 = vmatpush.bf16.msra.mxu2 %v7700_v36  ;;  %v9989_v36 = vld [vmem:[%s15271_s7 + $0x864] sm:$0xf]  ;;  %5989 = vmatpush.bf16.msra.mxu0 %v9012_v56  ;;  %v8232_v56 = vor.u32 %v9877_v55, %v8229_v50  ;;  %v8117_v50 = vld [vmem:[%s15271_s7 + $0x41c] sm:$0xf0] }
 0x345   :  { %5950 = vmatpush.bf16.msrb.mxu1 %v8340_v61  ;;  %v8680_v30 = vor.u32 %v9989_v36, %v8677_v60  ;;  %v9348_v61 = vor.u32 %v10160_v51, %v9347_v49  ;;  %v10031_v36 = vld [vmem:[%s15271_s7 + $0x9b4] sm:$0xf]  ;;  %v8845_v60 = vld [vmem:[%s15271_s7 + $0x9cc] sm:$0xf0]  ;;  %v9849_v55 = vld [vmem:[%s15271_s7 + $0x404] sm:$0xf] }
 0x346   :  { %v8848_v19 = vor.u32 %v10031_v36, %v8845_v60  ;;  %v10132_v51 = vld [vmem:[%s15271_s7 + $0xcd8] sm:$0xf0]  ;;  %v9207_v60 = vld [vmem:[%s15271_s7 + $0xc88] sm:$0xf] }
 0x347   :  { %6029 = vmatpush.bf16.msra.mxu3 %v7868_v54  ;;  %v8204_v54 = vor.u32 %v9870_v35, %v8201_v14 }
 0x348   :  { %6015 = vmatpush.bf16.msra.mxu2 %v7672_v5  ;;  %v10052_v5 = vld [vmem:[%s15271_s7 + $0xa5c] sm:$0xf]  ;;  %5990 = vmatpush.bf16.msra.mxu0 %v8984_v8  ;;  %v9291_v8 = vld [vmem:[%s15271_s7 + $0xd30] sm:$0xf] }
 0x349   :  { %v8932_v31 = vor.u32 %v10052_v5, %v8929_v26  ;;  %5951 = vmatpush.bf16.msrb.mxu1 %v8312_v0  ;;  %v8176_v0 = vor.u32 %v9863_v9, %v8173_v11  ;;  %v8817_v5 = vld [vmem:[%s15271_s7 + $0x994] sm:$0xf0]  ;;  %v9292_v26 = vor.u32 %v10146_v13, %v9291_v8  ;;  %v7787_v9 = vld [vmem:[%s15271_s7 + $0x168] sm:$0xf]  ;;  %v9769_v11 = vld [vmem:[%s15271_s7 + $0x180] sm:$0xf0] }
 0x34a   :  { %v8820_v10 = vor.u32 %v10024_v21, %v8817_v5  ;;  %v10003_v21 = vld [vmem:[%s15271_s7 + $0x8d4] sm:$0xf]  ;;  %v8733_v5 = vld [vmem:[%s15271_s7 + $0x8ec] sm:$0xf0] }
 0x34b   :  { %6030 = vmatpush.bf16.msra.mxu3 %v7840_v39  ;;  %v8145_v39 = vld [vmem:[%s15271_s7 + $0x454] sm:$0xf0] }
 0x34c   :  { %6016 = vmatpush.bf16.msra.mxu2 %v7644_v6  ;;  %v8901_v6 = vld [vmem:[%s15271_s7 + $0xa3c] sm:$0xf0]  ;;  %5991 = vmatpush.bf16.msra.mxu0 %v8956_v45  ;;  %v8537_v45 = vld [vmem:[%s15271_s7 + $0x764] sm:$0xf0] }
 0x34d   :  { %v8904_v18 = vor.u32 %v10045_v27, %v8901_v6  ;;  %5952 = vmatpush.bf16.msrb.mxu1 %v8284_v43  ;;  %v3175_v43 = vperm.slane %v14199_v16, 3  ;;  %v8148_v27 = vor.u32 %v9856_v38, %v8145_v39  ;;  %v10017_v6 = vld [vmem:[%s15271_s7 + $0x944] sm:$0xf]  ;;  %v8540_v49 = vor.u32 %v9954_v23, %v8537_v45  ;;  %v9235_v16 = vld [vmem:[%s15271_s7 + $0xcc0] sm:$0xf] }
 0x34e   :  { %6031 = vmatmul.bf16.vlgmr.msra.gmra.mxu3 %v12551_v32  ;;  %v9236_v14 = vor.u32 %v10132_v51, %v9235_v16  ;;  %v9832_v38 = vld [vmem:[%s15271_s7 + $0x378] sm:$0xf0]  ;;  %v7788_v39 = vor.u32 %v9769_v11, %v7787_v9  ;;  %v9153_v23 = vld [vmem:[%s15271_s7 + $0xc34] sm:$0xf0]  ;;  %v8736_v45 = vor.u32 %v10003_v21, %v8733_v5  ;;  %v5734_v51 = vadd.f32 %v14408_v37, %v14245_v53  ;;  %v8453_v53 = vld [vmem:[%s15271_s7 + $0x6bc] sm:$0xf0] }
 0x34f   :  { %6075 = vmatpush.bf16.msrb.mxu3 %v8932_v31  ;;  %5992 = vmatmul.bf16.vlgmr.msra.gmra.mxu0 %v13135_v2  ;;  %v14609_v31 = vpop.f32.mrf.mxu0  ;;  %v7731_v37 = vld [vmem:[%s15271_s7 + $0xf8] sm:$0xf]  ;;  %v8397_v21 = vld [vmem:[%s15271_s7 + $0x64c] sm:$0xf0]  ;;  %v7675_v5 = vld [vmem:[%s15271_s7 + $0x88] sm:$0xf] }
 0x350   :  { %6017 = vmatpush.bf16.msra.mxu2 %v7616_v62  ;;  %6036 = vmatpush.bf16.msrb.mxu0 %v8260_v44  ;;  %v8624_v62 = vor.u32 %v9975_v24, %v8621_v20  ;;  %v14612_v44 = vpop.f32.mrf.mxu1  ;;  %v9947_v24 = vld [vmem:[%s15271_s7 + $0x714] sm:$0xf]  ;;  %v8509_v20 = vld [vmem:[%s15271_s7 + $0x72c] sm:$0xf0]  ;;  %v5824_v35 = vpop.f32.mrf.mxu3  ;;  %v7955_v11 = vld [vmem:[%s15271_s7 + $0x2b8] sm:$0xf] }
 0x351   :  { %5997 = vmatpush.bf16.msra.mxu1 %v9376_v12  ;;  %v8789_v12 = vld [vmem:[%s15271_s7 + $0x95c] sm:$0xf0] }
 0x352   :  { %5953 = vmatmul.bf16.vlgmr.msrb.gmra.mxu1 %v12661_v34 }
 0x353   :  { %6018 = vmatmul.bf16.vlgmr.msra.gmra.mxu2 %v12580_v48  ;;  %6076 = vmatpush.bf16.msrb.mxu3 %v8904_v18  ;;  %v8792_v18 = vor.u32 %v10017_v6, %v8789_v12 }
 0x354   :  { %6062 = vmatpush.bf16.msrb.mxu2 %v8708_v63  ;;  %v10153_v63 = vld [vmem:[%s15271_s7 + $0xd80] sm:$0xf0]  ;;  %6037 = vmatpush.bf16.msrb.mxu0 %v8232_v56  ;;  %v7815_v56 = vld [vmem:[%s15271_s7 + $0x1a0] sm:$0xf] }
 0x355   :  { %5998 = vmatpush.bf16.msra.mxu1 %v9348_v61  ;;  %v9320_v1 = vor.u32 %v10153_v63, %v9319_v28  ;;  %v8120_v61 = vor.u32 %v9849_v55, %v8117_v50  ;;  %v8761_v28 = vld [vmem:[%s15271_s7 + $0x924] sm:$0xf0]  ;;  %v8512_v63 = vor.u32 %v9947_v24, %v8509_v20  ;;  %v7816_v36 = vor.u32 %v9776_v57, %v7815_v56  ;;  %v9825_v50 = vld [vmem:[%s15271_s7 + $0x340] sm:$0xf0]  ;;  %v9125_v57 = vld [vmem:[%s15271_s7 + $0xbfc] sm:$0xf0] }
 0x356   :  { %v5811_v40 = vpop.f32.mrf.mxu2  ;;  %v8011_v55 = vld [vmem:[%s15271_s7 + $0x328] sm:$0xf]  ;;  %v10101_v56 = vld [vmem:[%s15271_s7 + $0xbe4] sm:$0xf] }
 0x357   :  { %6077 = vmatpush.bf16.msrb.mxu3 %v8876_v4  ;;  %v5812_v58 = vadd.f32 %v5811_v40, %v3175_v43  ;;  %v9940_v40 = vld [vmem:[%s15271_s7 + $0x6dc] sm:$0xf]  ;;  %v7759_v43 = vld [vmem:[%s15271_s7 + $0x130] sm:$0xf] }
 0x358   :  { %6063 = vmatpush.bf16.msrb.mxu2 %v8680_v30  ;;  %6038 = vmatpush.bf16.msrb.mxu0 %v8204_v54  ;;  %v8568_v30 = vor.u32 %v9961_v17, %v8565_v15  ;;  %v5748_v13 = vpop.f32.mrf.mxu1  ;;  %v8092_v17 = vor.u32 %v9842_v3, %v8089_v25  ;;  %v9179_v15 = vld [vmem:[%s15271_s7 + $0xc50] sm:$0xf]  ;;  %v10094_v25 = vld [vmem:[%s15271_s7 + $0xbac] sm:$0xf] }
 0x359   :  { %5999 = vmatpush.bf16.msra.mxu1 %v9320_v1  ;;  %v14656_v4 = vadd.f32 %v5824_v35, %v5812_v58  ;;  %v10125_v1 = vld [vmem:[%s15271_s7 + $0xca0] sm:$0xf0]  ;;  %v9755_v58 = vld [vmem:[%s15271_s7 + $0x110] sm:$0xf0]  ;;  %v7983_v35 = vld [vmem:[%s15271_s7 + $0x2f0] sm:$0xf] }
 0x35a   :  { %v7732_v3 = vor.u32 %v9755_v58, %v7731_v37  ;;  %v9811_v13 = vld [vmem:[%s15271_s7 + $0x2d0] sm:$0xf0]  ;;  %v8341_v37 = vld [vmem:[%s15271_s7 + $0x5dc] sm:$0xf0]  ;;  %v7619_v58 = vld [vmem:[%s15271_s7 + $0x18] sm:$0xf] }
 0x35b   :  { %6078 = vmatpush.bf16.msrb.mxu3 %v8848_v19  ;;  %v10118_v19 = vld [vmem:[%s15271_s7 + $0xc68] sm:$0xf0] }
 0x35c   :  { %6064 = vmatpush.bf16.msrb.mxu2 %v8652_v46  ;;  %6039 = vmatpush.bf16.msrb.mxu0 %v8176_v0  ;;  %v9264_v46 = vor.u32 %v10139_v42, %v9263_v29  ;;  %v9835_v0 = vld [vmem:[%s15271_s7 + $0x394] sm:$0xf]  ;;  %v8039_v29 = vld [vmem:[%s15271_s7 + $0x360] sm:$0xf]  ;;  %v10108_v42 = vld [vmem:[%s15271_s7 + $0xc1c] sm:$0xf] }
 0x35d   :  { %6000 = vmatpush.bf16.msra.mxu1 %v9292_v26  ;;  %v9208_v26 = vor.u32 %v10125_v1, %v9207_v60  ;;  %v8040_v12 = vor.u32 %v9832_v38, %v8039_v29  ;;  %v9156_v16 = vor.u32 %v10108_v42, %v9153_v23  ;;  %v7703_v60 = vld [vmem:[%s15271_s7 + $0xc0] sm:$0xf]  ;;  %v9748_v1 = vld [vmem:[%s15271_s7 + $0xd8] sm:$0xf0]  ;;  %v7956_v29 = vor.u32 %v9811_v13, %v7955_v11 }
 0x35e   :  { %v5813_v54 = vpop.f32.mrf.mxu2 }
 0x35f   :  { %6079 = vmatpush.bf16.msrb.mxu3 %v8820_v10  ;;  %v8481_v10 = vld [vmem:[%s15271_s7 + $0x6f4] sm:$0xf0]  ;;  %v9097_v54 = vld [vmem:[%s15271_s7 + $0xbc4] sm:$0xf0] }
 0x360   :  { %6065 = vmatpush.bf16.msrb.mxu2 %v8624_v62  ;;  %6040 = vmatpush.bf16.msrb.mxu0 %v8148_v27  ;;  %v10010_v62 = vld [vmem:[%s15271_s7 + $0x90c] sm:$0xf]  ;;  %v8484_v24 = vor.u32 %v9940_v40, %v8481_v10  ;;  %v9100_v9 = vor.u32 %v10094_v25, %v9097_v54  ;;  %v9804_v40 = vld [vmem:[%s15271_s7 + $0x298] sm:$0xf0]  ;;  %v9041_v10 = vld [vmem:[%s15271_s7 + $0xb54] sm:$0xf0] }
 0x361   :  { %6001 = vmatpush.bf16.msra.mxu1 %v9264_v46  ;;  %v8764_v8 = vor.u32 %v10010_v62, %v8761_v28  ;;  %v9762_v27 = vld [vmem:[%s15271_s7 + $0x148] sm:$0xf0]  ;;  %v5826_v46 = vpop.f32.mrf.mxu3  ;;  %v8012_v62 = vor.u32 %v9825_v50, %v8011_v55  ;;  %v9128_v28 = vor.u32 %v10101_v56, %v9125_v57  ;;  %v9905_v56 = vld [vmem:[%s15271_s7 + $0x5c4] sm:$0xf] }
 0x362   :  { %v7760_v20 = vor.u32 %v9762_v27, %v7759_v43  ;;  %v8369_v27 = vld [vmem:[%s15271_s7 + $0x614] sm:$0xf0]  ;;  %v10073_v57 = vld [vmem:[%s15271_s7 + $0xb04] sm:$0xf]  ;;  %v8344_v25 = vor.u32 %v9905_v56, %v8341_v37  ;;  %v9349_v37 = vld [vmem:[%s15271_s7 + $0xdbc] sm:$0xf0] }
 0x363   :  { %6080 = vmatpush.bf16.msrb.mxu3 %v8792_v18  ;;  %v9933_v18 = vld [vmem:[%s15271_s7 + $0x6a4] sm:$0xf] }
 0x364   :  { %6066 = vmatpush.bf16.msrb.mxu2 %v8596_v7  ;;  %v5787_v7 = vpop.f32.mrf.mxu0  ;;  %6041 = vmatpush.bf16.msrb.mxu0 %v8120_v61  ;;  %v5747_v61 = vadd.f32 %v14612_v44, %v5734_v51  ;;  %v9926_v44 = vld [vmem:[%s15271_s7 + $0x66c] sm:$0xf]  ;;  %v7899_v51 = vld [vmem:[%s15271_s7 + $0x248] sm:$0xf] }
 0x365   :  { %6002 = vmatpush.bf16.msra.mxu1 %v9236_v14  ;;  %v9818_v14 = vld [vmem:[%s15271_s7 + $0x308] sm:$0xf0] }
 0x366   :  { %v5760_v7 = vadd.f32 %v14397_v33, %v5747_v61  ;;  %v9919_v33 = vld [vmem:[%s15271_s7 + $0x634] sm:$0xf] }
 0x367   :  { %6081 = vmatpush.bf16.msrb.mxu3 %v8764_v8  ;;  %v7984_v8 = vor.u32 %v9818_v14, %v7983_v35  ;;  %v8400_v42 = vor.u32 %v9919_v33, %v8397_v21  ;;  %v9727_v61 = vld [vmem:[%s15271_s7 + $0x30] sm:$0xf0]  ;;  %v10000_v35 = vld [vmem:[%s15271_s7 + $0x8b8] sm:$0xf0] }
 0x368   :  { %6067 = vmatpush.bf16.msrb.mxu2 %v8568_v30  ;;  %v8061_v30 = vld [vmem:[%s15271_s7 + $0x3ac] sm:$0xf0]  ;;  %6042 = vmatpush.bf16.msrb.mxu0 %v8092_v17  ;;  %v7620_v54 = vor.u32 %v9727_v61, %v7619_v58  ;;  %v10059_v33 = vld [vmem:[%s15271_s7 + $0xa94] sm:$0xf]  ;;  %v8627_v58 = vld [vmem:[%s15271_s7 + $0x7f8] sm:$0xf] }
 0x369   :  { %v8064_v6 = vor.u32 %v9835_v0, %v8061_v30  ;;  %6003 = vmatpush.bf16.msra.mxu1 %v9208_v26  ;;  %v9069_v0 = vld [vmem:[%s15271_s7 + $0xb8c] sm:$0xf0]  ;;  %v9741_v26 = vld [vmem:[%s15271_s7 + $0xa0] sm:$0xf0]  ;;  %v5773_v30 = vadd.f32 %v14447_v59, %v5760_v7  ;;  %v9912_v59 = vld [vmem:[%s15271_s7 + $0x5fc] sm:$0xf] }
 0x36a   :  { %v7676_v23 = vor.u32 %v9741_v26, %v7675_v5  ;;  %v9891_v21 = vld [vmem:[%s15271_s7 + $0x554] sm:$0xf]  ;;  %v8285_v5 = vld [vmem:[%s15271_s7 + $0x56c] sm:$0xf0] }
 0x36b   :  { %6082 = vmatpush.bf16.msrb.mxu3 %v8736_v45  ;;  %v10080_v45 = vld [vmem:[%s15271_s7 + $0xb3c] sm:$0xf]  ;;  %v5786_v46 = vadd.f32 %v14609_v31, %v5773_v30  ;;  %v8957_v26 = vld [vmem:[%s15271_s7 + $0xaac] sm:$0xf0]  ;;  %v7843_v30 = vld [vmem:[%s15271_s7 + $0x1d8] sm:$0xf] }
 0x36c   :  { %6068 = vmatpush.bf16.msrb.mxu2 %v8540_v49  ;;  %v9180_v49 = vor.u32 %v10118_v19, %v9179_v15  ;;  %6043 = vmatpush.bf16.msrb.mxu0 %v8064_v6  ;;  %v7704_v15 = vor.u32 %v9748_v1, %v7703_v60  ;;  %v10087_v19 = vld [vmem:[%s15271_s7 + $0xb74] sm:$0xf]  ;;  %v7647_v6 = vld [vmem:[%s15271_s7 + $0x50] sm:$0xf]  ;;  %v9044_v50 = vor.u32 %v10080_v45, %v9041_v10  ;;  %v8985_v60 = vld [vmem:[%s15271_s7 + $0xae4] sm:$0xf0] }
 0x36d   :  { %v9072_v38 = vor.u32 %v10087_v19, %v9069_v0  ;;  %v5798_v55 = vpop.f32.mrf.mxu1  ;;  %v8263_v45 = vld [vmem:[%s15271_s7 + $0x520] sm:$0xf]  ;;  %v9888_v10 = vld [vmem:[%s15271_s7 + $0x538] sm:$0xf0]  ;;  %v9979_v61 = vld [vmem:[%s15271_s7 + $0x810] sm:$0xf0] }
 0x36e   :  { %6004 = vmatpush.bf16.msra.mxu1 %v9180_v49  ;;  %6083 = vmatmul.bf16.vlgmr.msrb.gmra.mxu3 %v12964_v22  ;;  %v14820_v49 = vpop.f32.mrf.mxu0 }
 0x36f   :  { %6127 = vmatpush.bf16.msra.mxu3 %v8040_v12  ;;  %6044 = vmatmul.bf16.vlgmr.msrb.gmra.mxu0 %v12683_v47  ;;  %v9734_v12 = vld [vmem:[%s15271_s7 + $0x68] sm:$0xf0] }
 0x370   :  { %6069 = vmatpush.bf16.msrb.mxu2 %v8512_v63  ;;  %6088 = vmatpush.bf16.msra.mxu0 %v9156_v16  ;;  %v8456_v63 = vor.u32 %v9933_v18, %v8453_v53  ;;  %v8372_v18 = vor.u32 %v9912_v59, %v8369_v27  ;;  %v7648_v31 = vor.u32 %v9734_v12, %v7647_v6  ;;  %v9013_v53 = vld [vmem:[%s15271_s7 + $0xb1c] sm:$0xf0]  ;;  %v9377_v6 = vld [vmem:[%s15271_s7 + $0xdf4] sm:$0xf0]  ;;  %v8655_v12 = vld [vmem:[%s15271_s7 + $0x830] sm:$0xf] }
 0x371   :  { %6005 = vmatmul.bf16.vlgmr.msra.gmra.mxu1 %v13298_v52  ;;  %v9016_v14 = vor.u32 %v10073_v57, %v9013_v53  ;;  %v8235_v57 = vld [vmem:[%s15271_s7 + $0x4e8] sm:$0xf]  ;;  %v9881_v53 = vld [vmem:[%s15271_s7 + $0x500] sm:$0xf0] }
 0x372   :  { %6049 = vmatpush.bf16.msrb.mxu1 %v8484_v24  ;;  %v9797_v24 = vld [vmem:[%s15271_s7 + $0x260] sm:$0xf0] }
 0x373   :  { %6070 = vmatmul.bf16.vlgmr.msrb.gmra.mxu2 %v12771_v41  ;;  %6128 = vmatpush.bf16.msra.mxu3 %v8012_v62  ;;  %v7900_v62 = vor.u32 %v9797_v24, %v7899_v51  ;;  %v8288_v51 = vor.u32 %v9891_v21, %v8285_v5  ;;  %v8264_v24 = vor.u32 %v9888_v10, %v8263_v45  ;;  %v8571_v21 = vld [vmem:[%s15271_s7 + $0x788] sm:$0xf]  ;;  %v9965_v5 = vld [vmem:[%s15271_s7 + $0x7a0] sm:$0xf0]  ;;  %v9265_v10 = vld [vmem:[%s15271_s7 + $0xd14] sm:$0xf0] }
 0x374   :  { %6114 = vmatpush.bf16.msra.mxu2 %v7816_v36  ;;  %v8425_v36 = vld [vmem:[%s15271_s7 + $0x684] sm:$0xf0]  ;;  %6089 = vmatpush.bf16.msra.mxu0 %v9128_v28  ;;  %v8711_v28 = vld [vmem:[%s15271_s7 + $0x8a0] sm:$0xf] }
 0x375   :  { %v8428_v17 = vor.u32 %v9926_v44, %v8425_v36  ;;  %v14858_v44 = vpop.f32.mrf.mxu3  ;;  %v10066_v36 = vld [vmem:[%s15271_s7 + $0xacc] sm:$0xf]  ;;  %v8712_v7 = vor.u32 %v10000_v35, %v8711_v28  ;;  %v5800_v19 = vpop.f32.mrf.mxu1  ;;  %v8236_v28 = vor.u32 %v9881_v53, %v8235_v57  ;;  %v8879_v35 = vld [vmem:[%s15271_s7 + $0x9f0] sm:$0xf]  ;;  %v9853_v57 = vld [vmem:[%s15271_s7 + $0x420] sm:$0xf0] }
 0x376   :  { %6050 = vmatpush.bf16.msrb.mxu1 %v8456_v63  ;;  %v14808_v43 = vpop.f32.mrf.mxu2  ;;  %v7871_v63 = vld [vmem:[%s15271_s7 + $0x210] sm:$0xf]  ;;  %v5839_v11 = vpop.f32.mrf.mxu0  ;;  %v8988_v0 = vor.u32 %v10066_v36, %v8985_v60  ;;  %v9874_v36 = vld [vmem:[%s15271_s7 + $0x4c8] sm:$0xf0]  ;;  %v9321_v60 = vld [vmem:[%s15271_s7 + $0xd84] sm:$0xf0] }
 0x377   :  { %6129 = vmatpush.bf16.msra.mxu3 %v7984_v8  ;;  %v9898_v8 = vld [vmem:[%s15271_s7 + $0x58c] sm:$0xf]  ;;  %v10035_v11 = vld [vmem:[%s15271_s7 + $0x9d0] sm:$0xf0]  ;;  %v9237_v53 = vld [vmem:[%s15271_s7 + $0xcdc] sm:$0xf0] }
 0x378   :  { %6115 = vmatpush.bf16.msra.mxu2 %v7788_v39  ;;  %6090 = vmatpush.bf16.msra.mxu0 %v9100_v9  ;;  %v7927_v39 = vld [vmem:[%s15271_s7 + $0x280] sm:$0xf]  ;;  %v8313_v9 = vld [vmem:[%s15271_s7 + $0x5a4] sm:$0xf0]  ;;  %v9867_v19 = vld [vmem:[%s15271_s7 + $0x490] sm:$0xf0] }
 0x379   :  { %v7928_v16 = vor.u32 %v9804_v40, %v7927_v39  ;;  %v8316_v39 = vor.u32 %v9898_v8, %v8313_v9  ;;  %v10164_v40 = vld [vmem:[%s15271_s7 + $0xddc] sm:$0xf] }
 0x37a   :  { %6051 = vmatpush.bf16.msrb.mxu1 %v8428_v17  ;;  %v8683_v17 = vld [vmem:[%s15271_s7 + $0x868] sm:$0xf] }
 0x37b   :  { %6130 = vmatpush.bf16.msra.mxu3 %v7956_v29  ;;  %v9783_v29 = vld [vmem:[%s15271_s7 + $0x1f0] sm:$0xf0] }
 0x37c   :  { %6116 = vmatpush.bf16.msra.mxu2 %v7760_v20  ;;  %6091 = vmatpush.bf16.msra.mxu0 %v9072_v38  ;;  %v5799_v20 = vadd.f32 %v5798_v55, %v5786_v46  ;;  %v7844_v27 = vor.u32 %v9783_v29, %v7843_v30  ;;  %v9986_v46 = vld [vmem:[%s15271_s7 + $0x848] sm:$0xf0]  ;;  %v8823_v29 = vld [vmem:[%s15271_s7 + $0x980] sm:$0xf] }
 0x37d   :  { %v8656_v56 = vor.u32 %v9986_v46, %v8655_v12 }
 0x37e   :  { %6052 = vmatpush.bf16.msrb.mxu1 %v8400_v42  ;;  %10174 = vtanh.f32 %v5799_v20  ;;  %v5865_v1 = vpop.f32.mrf.mxu2  ;;  %v8935_v42 = vld [vmem:[%s15271_s7 + $0xa60] sm:$0xf]  ;;  %v8907_v20 = vld [vmem:[%s15271_s7 + $0xa28] sm:$0xf] }
 0x37f   :  { %6131 = vmatpush.bf16.msra.mxu3 %v7928_v16  ;;  %v8960_v16 = vor.u32 %v10059_v33, %v8957_v26  ;;  %v8599_v1 = vld [vmem:[%s15271_s7 + $0x7c0] sm:$0xf]  ;;  %v8179_v33 = vld [vmem:[%s15271_s7 + $0x478] sm:$0xf] }
 0x380   :  { %6117 = vmatpush.bf16.msra.mxu2 %v7732_v3  ;;  %6092 = vmatpush.bf16.msra.mxu0 %v9044_v50  ;;  %v9790_v3 = vld [vmem:[%s15271_s7 + $0x228] sm:$0xf0]  ;;  %v5878_v50 = vpop.f32.mrf.mxu3  ;;  %v8180_v30 = vor.u32 %v9867_v19, %v8179_v33  ;;  %v10115_v19 = vld [vmem:[%s15271_s7 + $0xc54] sm:$0xf] }
 0x381   :  { %v7872_v13 = vor.u32 %v9790_v3, %v7871_v63  ;;  %v8628_v3 = vor.u32 %v9979_v61, %v8627_v58  ;;  %v9951_v58 = vld [vmem:[%s15271_s7 + $0x730] sm:$0xf0] }
 0x382   :  { %6053 = vmatpush.bf16.msrb.mxu1 %v8372_v18  ;;  %v10049_v18 = vld [vmem:[%s15271_s7 + $0xa40] sm:$0xf0] }
 0x383   :  { %6132 = vmatpush.bf16.msra.mxu3 %v7900_v62  ;;  %v8908_v62 = vor.u32 %v10049_v18, %v8907_v20  ;;  %v10021_v20 = vld [vmem:[%s15271_s7 + $0x960] sm:$0xf0] }
 0x384   :  { %6118 = vmatpush.bf16.msra.mxu2 %v7704_v15  ;;  %v9993_v15 = vld [vmem:[%s15271_s7 + $0x880] sm:$0xf0]  ;;  %6093 = vmatpush.bf16.msra.mxu0 %v9016_v14  ;;  %v10175_v38 = vpop.eup %10174  ;;  %v10042_v14 = vld [vmem:[%s15271_s7 + $0xa08] sm:$0xf0] }
 0x385   :  { %6227 = vst [vmem:[#allocation2 + $0x10] sm:$0xff] %v10175_v38  ;;  %v8684_v59 = vor.u32 %v9993_v15, %v8683_v17  ;;  %v8880_v8 = vor.u32 %v10042_v14, %v8879_v35  ;;  %v10143_v15 = vld [vmem:[%s15271_s7 + $0xd34] sm:$0xf]  ;;  %v10028_v38 = vld [vmem:[%s15271_s7 + $0x998] sm:$0xf0] }
 0x386   :  { %6054 = vmatpush.bf16.msrb.mxu1 %v8344_v25  ;;  %v10150_v25 = vld [vmem:[%s15271_s7 + $0xd6c] sm:$0xf]  ;;  %v8824_v46 = vor.u32 %v10028_v38, %v8823_v29  ;;  %v8767_v35 = vld [vmem:[%s15271_s7 + $0x910] sm:$0xf]  ;;  %v8487_v38 = vld [vmem:[%s15271_s7 + $0x6e0] sm:$0xf] }
 0x387   :  { %6133 = vmatpush.bf16.msra.mxu3 %v7872_v13  ;;  %v9324_v13 = vor.u32 %v10150_v25, %v9321_v60  ;;  %v10014_v14 = vld [vmem:[%s15271_s7 + $0x928] sm:$0xf0] }
 0x388   :  { %6119 = vmatpush.bf16.msra.mxu2 %v7676_v23  ;;  %v10056_v23 = vld [vmem:[%s15271_s7 + $0xa78] sm:$0xf0]  ;;  %6094 = vmatpush.bf16.msra.mxu0 %v8988_v0  ;;  %v9293_v0 = vld [vmem:[%s15271_s7 + $0xd4c] sm:$0xf0] }
 0x389   :  { %v8936_v55 = vor.u32 %v10056_v23, %v8935_v42  ;;  %v10136_v42 = vld [vmem:[%s15271_s7 + $0xcfc] sm:$0xf]  ;;  %v8151_v23 = vld [vmem:[%s15271_s7 + $0x440] sm:$0xf] }
 0x38a   :  { %6055 = vmatpush.bf16.msrb.mxu1 %v8316_v39  ;;  %v9296_v39 = vor.u32 %v10143_v15, %v9293_v0  ;;  %v15020_v12 = vpop.f32.mrf.mxu0  ;;  %v9268_v18 = vor.u32 %v10136_v42, %v9265_v10  ;;  %v10007_v15 = vld [vmem:[%s15271_s7 + $0x8f0] sm:$0xf0]  ;;  %v8067_v0 = vld [vmem:[%s15271_s7 + $0x398] sm:$0xf] }
 0x38b   :  { %6134 = vmatpush.bf16.msra.mxu3 %v7844_v27  ;;  %v8543_v27 = vld [vmem:[%s15271_s7 + $0x750] sm:$0xf] }
 0x38c   :  { %6120 = vmatpush.bf16.msra.mxu2 %v7648_v31  ;;  %v9380_v31 = vor.u32 %v10164_v40, %v9377_v6  ;;  %6095 = vmatpush.bf16.msra.mxu0 %v8960_v16  ;;  %v8572_v40 = vor.u32 %v9965_v5, %v8571_v21  ;;  %v9958_v6 = vld [vmem:[%s15271_s7 + $0x768] sm:$0xf0]  ;;  %v15025_v16 = vld [vmem:[%s15272_s8] sm:$0x7f]  ;;  %v9839_v21 = vld [vmem:[%s15271_s7 + $0x3b0] sm:$0xf0] }
 0x38d   :  { %v15028_v50 = vpop.f32.mrf.mxu1  ;;  %v9181_v5 = vld [vmem:[%s15271_s7 + $0xc6c] sm:$0xf0] }
 0x38e   :  { %6056 = vmatpush.bf16.msrb.mxu1 %v8288_v51  ;;  %6135 = vmatmul.bf16.vlgmr.msra.gmra.mxu3 %v12551_v32  ;;  %v8851_v32 = vld [vmem:[%s15271_s7 + $0x9b8] sm:$0xf] }
 0x38f   :  { %6179 = vmatpush.bf16.msrb.mxu3 %v8936_v55  ;;  %6096 = vmatmul.bf16.vlgmr.msra.gmra.mxu0 %v13135_v2  ;;  %v8852_v26 = vor.u32 %v10035_v11, %v8851_v32  ;;  %v3176_v55 = vperm.slane %v15025_v16, 4  ;;  %v8768_v32 = vor.u32 %v10014_v14, %v8767_v35 }
 0x390   :  { %6121 = vmatpush.bf16.msra.mxu2 %v7620_v54  ;;  %6140 = vmatpush.bf16.msrb.mxu0 %v8264_v24  ;;  %v8207_v54 = vld [vmem:[%s15271_s7 + $0x4b0] sm:$0xf]  ;;  %v8795_v24 = vld [vmem:[%s15271_s7 + $0x948] sm:$0xf] }
 0x391   :  { %6057 = vmatmul.bf16.vlgmr.msrb.gmra.mxu1 %v12661_v34  ;;  %v8208_v9 = vor.u32 %v9874_v36, %v8207_v54  ;;  %v8796_v61 = vor.u32 %v10021_v20, %v8795_v24  ;;  %v8095_v54 = vld [vmem:[%s15271_s7 + $0x3d0] sm:$0xf]  ;;  %v9846_v36 = vld [vmem:[%s15271_s7 + $0x3e8] sm:$0xf0] }
 0x392   :  { %6101 = vmatpush.bf16.msra.mxu1 %v9380_v31  ;;  %v8544_v31 = vor.u32 %v9958_v6, %v8543_v27  ;;  %v9131_v27 = vld [vmem:[%s15271_s7 + $0xbe8] sm:$0xf]  ;;  %v10105_v6 = vld [vmem:[%s15271_s7 + $0xc00] sm:$0xf0]  ;;  %v10098_v24 = vld [vmem:[%s15271_s7 + $0xbc8] sm:$0xf0] }
 0x393   :  { %6122 = vmatmul.bf16.vlgmr.msra.gmra.mxu2 %v12580_v48  ;;  %v10157_v48 = vld [vmem:[%s15271_s7 + $0xda4] sm:$0xf]  ;;  %6180 = vmatpush.bf16.msrb.mxu3 %v8908_v62  ;;  %v9930_v20 = vld [vmem:[%s15271_s7 + $0x688] sm:$0xf0] }
 0x394   :  { %6166 = vmatpush.bf16.msrb.mxu2 %v8712_v7  ;;  %v9352_v63 = vor.u32 %v10157_v48, %v9349_v37  ;;  %v9972_v7 = vld [vmem:[%s15271_s7 + $0x7d8] sm:$0xf0]  ;;  %6141 = vmatpush.bf16.msrb.mxu0 %v8236_v28  ;;  %v8123_v48 = vld [vmem:[%s15271_s7 + $0x408] sm:$0xf]  ;;  %v8515_v37 = vld [vmem:[%s15271_s7 + $0x718] sm:$0xf] }
 0x395   :  { %v8600_v17 = vor.u32 %v9972_v7, %v8599_v1  ;;  %v8124_v28 = vor.u32 %v9853_v57, %v8123_v48  ;;  %v8516_v25 = vor.u32 %v9951_v58, %v8515_v37  ;;  %v10122_v7 = vld [vmem:[%s15271_s7 + $0xc8c] sm:$0xf]  ;;  %v5852_v11 = vpop.f32.mrf.mxu1  ;;  %v8403_v48 = vld [vmem:[%s15271_s7 + $0x638] sm:$0xf]  ;;  %v9047_v58 = vld [vmem:[%s15271_s7 + $0xb40] sm:$0xf] }
 0x396   :  { %6102 = vmatpush.bf16.msra.mxu1 %v9352_v63  ;;  %v5915_v45 = vpop.f32.mrf.mxu2  ;;  %v5928_v63 = vpop.f32.mrf.mxu3  ;;  %v8991_v11 = vld [vmem:[%s15271_s7 + $0xad0] sm:$0xf] }
 0x397   :  { %6181 = vmatpush.bf16.msrb.mxu3 %v8880_v8  ;;  %v5916_v62 = vadd.f32 %v5915_v45, %v3176_v55  ;;  %v9209_v8 = vld [vmem:[%s15271_s7 + $0xca4] sm:$0xf0]  ;;  %v5838_v45 = vadd.f32 %v14820_v49, %v14656_v4  ;;  %v9132_v49 = vor.u32 %v10105_v6, %v9131_v27  ;;  %v10161_v6 = vld [vmem:[%s15271_s7 + $0xdc0] sm:$0xf0] }
 0x398   :  { %6167 = vmatpush.bf16.msrb.mxu2 %v8684_v59  ;;  %6142 = vmatpush.bf16.msrb.mxu0 %v8208_v9  ;;  %v9860_v59 = vld [vmem:[%s15271_s7 + $0x458] sm:$0xf0]  ;;  %v5891_v9 = vpop.f32.mrf.mxu0  ;;  %v9212_v33 = vor.u32 %v10122_v7, %v9209_v8  ;;  %v9909_v7 = vld [vmem:[%s15271_s7 + $0x5e0] sm:$0xf0]  ;;  %v9355_v27 = vld [vmem:[%s15271_s7 + $0xda8] sm:$0xf] }
 0x399   :  { %v8152_v51 = vor.u32 %v9860_v59, %v8151_v23  ;;  %v15066_v60 = vadd.f32 %v5928_v63, %v5916_v62  ;;  %v9184_v23 = vor.u32 %v10115_v19, %v9181_v5  ;;  %v5851_v4 = vadd.f32 %v15028_v50, %v5838_v45  ;;  %v8431_v50 = vld [vmem:[%s15271_s7 + $0x670] sm:$0xf] }
 0x39a   :  { %6103 = vmatpush.bf16.msra.mxu1 %v9324_v13  ;;  %v8096_v13 = vor.u32 %v9846_v36, %v8095_v54  ;;  %v9019_v36 = vld [vmem:[%s15271_s7 + $0xb08] sm:$0xf] }
 0x39b   :  { %6182 = vmatpush.bf16.msrb.mxu3 %v8852_v26  ;;  %v9159_v26 = vld [vmem:[%s15271_s7 + $0xc20] sm:$0xf] }
 0x39c   :  { %6168 = vmatpush.bf16.msrb.mxu2 %v8656_v56  ;;  %6143 = vmatpush.bf16.msrb.mxu0 %v8180_v30  ;;  %v10129_v56 = vld [vmem:[%s15271_s7 + $0xcc4] sm:$0xf]  ;;  %v10112_v30 = vld [vmem:[%s15271_s7 + $0xc38] sm:$0xf0] }
 0x39d   :  { %v9160_v59 = vor.u32 %v10112_v30, %v9159_v26  ;;  %v8963_v30 = vld [vmem:[%s15271_s7 + $0xa98] sm:$0xf] }
 0x39e   :  { %6104 = vmatpush.bf16.msra.mxu1 %v9296_v39  ;;  %v5917_v1 = vpop.f32.mrf.mxu2  ;;  %v9944_v39 = vld [vmem:[%s15271_s7 + $0x6f8] sm:$0xf0]  ;;  %v5930_v42 = vpop.f32.mrf.mxu3 }
 0x39f   :  { %6183 = vmatpush.bf16.msrb.mxu3 %v8824_v46  ;;  %v8488_v10 = vor.u32 %v9944_v39, %v8487_v38  ;;  %v9937_v46 = vld [vmem:[%s15271_s7 + $0x6c0] sm:$0xf0]  ;;  %v8291_v38 = vld [vmem:[%s15271_s7 + $0x558] sm:$0xf]  ;;  %v9895_v39 = vld [vmem:[%s15271_s7 + $0x570] sm:$0xf0] }
 0x3a0   :  { %6169 = vmatpush.bf16.msrb.mxu2 %v8628_v3  ;;  %6144 = vmatpush.bf16.msrb.mxu0 %v8152_v51  ;;  %v9240_v3 = vor.u32 %v10129_v56, %v9237_v53  ;;  %v9103_v51 = vld [vmem:[%s15271_s7 + $0xbb0] sm:$0xf]  ;;  %v10091_v56 = vld [vmem:[%s15271_s7 + $0xb90] sm:$0xf0]  ;;  %v10077_v1 = vld [vmem:[%s15271_s7 + $0xb20] sm:$0xf0]  ;;  %v8292_v45 = vor.u32 %v9895_v39, %v8291_v38 }
 0x3a1   :  { %v9020_v8 = vor.u32 %v10077_v1, %v9019_v36  ;;  %v10168_v42 = vld [vmem:[%s15271_s7 + $0xdf8] sm:$0xf0] }
 0x3a2   :  { %6105 = vmatpush.bf16.msra.mxu1 %v9268_v18  ;;  %v9104_v18 = vor.u32 %v10098_v24, %v9103_v51 }
 0x3a3   :  { %6184 = vmatpush.bf16.msrb.mxu3 %v8796_v61  ;;  %v10084_v61 = vld [vmem:[%s15271_s7 + $0xb58] sm:$0xf0] }
 0x3a4   :  { %6170 = vmatpush.bf16.msrb.mxu2 %v8600_v17  ;;  %6145 = vmatpush.bf16.msrb.mxu0 %v8124_v28  ;;  %v8739_v17 = vld [vmem:[%s15271_s7 + $0x8d8] sm:$0xf]  ;;  %v8375_v28 = vld [vmem:[%s15271_s7 + $0x600] sm:$0xf] }
 0x3a5   :  { %v8740_v29 = vor.u32 %v10007_v15, %v8739_v17  ;;  %v8319_v15 = vld [vmem:[%s15271_s7 + $0x590] sm:$0xf] }
 0x3a6   :  { %6106 = vmatpush.bf16.msra.mxu1 %v9240_v3  ;;  %v9048_v3 = vor.u32 %v10084_v61, %v9047_v58  ;;  %v9215_v58 = vld [vmem:[%s15271_s7 + $0xc90] sm:$0xf]  ;;  %v10126_v61 = vld [vmem:[%s15271_s7 + $0xca8] sm:$0xf0] }
 0x3a7   :  { %6185 = vmatpush.bf16.msrb.mxu3 %v8768_v32 }
 0x3a8   :  { %6171 = vmatpush.bf16.msrb.mxu2 %v8572_v40  ;;  %6146 = vmatpush.bf16.msrb.mxu0 %v8096_v13  ;;  %v8068_v40 = vor.u32 %v9839_v21, %v8067_v0  ;;  %v10070_v13 = vld [vmem:[%s15271_s7 + $0xae8] sm:$0xf0] }
 0x3a9   :  { %v8992_v21 = vor.u32 %v10070_v13, %v8991_v11 }
 0x3aa   :  { %6107 = vmatpush.bf16.msra.mxu1 %v9212_v33  ;;  %v9902_v33 = vld [vmem:[%s15271_s7 + $0x5a8] sm:$0xf0] }
 0x3ab   :  { %6186 = vmatpush.bf16.msrb.mxu3 %v8740_v29  ;;  %v15164_v14 = vpop.f32.mrf.mxu0  ;;  %v8320_v26 = vor.u32 %v9902_v33, %v8319_v15  ;;  %v10063_v29 = vld [vmem:[%s15271_s7 + $0xab0] sm:$0xf0] }
 0x3ac   :  { %6172 = vmatpush.bf16.msrb.mxu2 %v8544_v31  ;;  %6147 = vmatpush.bf16.msrb.mxu0 %v8068_v40  ;;  %v8432_v31 = vor.u32 %v9930_v20, %v8431_v50  ;;  %v9383_v40 = vld [vmem:[%s15271_s7 + $0xde0] sm:$0xf]  ;;  %v5942_v36 = vadd.f32 %v15164_v14, %v15066_v60 }
 0x3ad   :  { %v9271_v50 = vld [vmem:[%s15271_s7 + $0xd00] sm:$0xf] }
 0x3ae   :  { %6108 = vmatpush.bf16.msra.mxu1 %v9184_v23  ;;  %6187 = vmatmul.bf16.vlgmr.msrb.gmra.mxu3 %v12964_v22  ;;  %v5864_v22 = vadd.f32 %v14808_v43, %v5851_v4  ;;  %v9923_v43 = vld [vmem:[%s15271_s7 + $0x650] sm:$0xf0]  ;;  %v5902_v63 = vpop.f32.mrf.mxu1  ;;  %v8964_v23 = vor.u32 %v10063_v29, %v8963_v30  ;;  %v10154_v4 = vld [vmem:[%s15271_s7 + $0xd88] sm:$0xf0] }
 0x3af   :  { %6148 = vmatmul.bf16.vlgmr.msrb.gmra.mxu0 %v12683_v47  ;;  %v9075_v47 = vld [vmem:[%s15271_s7 + $0xb78] sm:$0xf]  ;;  %v8404_v37 = vor.u32 %v9923_v43, %v8403_v48 }
 0x3b0   :  { %6173 = vmatpush.bf16.msrb.mxu2 %v8516_v25  ;;  %6192 = vmatpush.bf16.msra.mxu0 %v9160_v59  ;;  %v5877_v57 = vadd.f32 %v14858_v44, %v5864_v22  ;;  %v9076_v53 = vor.u32 %v10091_v56, %v9075_v47  ;;  %v9916_v44 = vld [vmem:[%s15271_s7 + $0x618] sm:$0xf0]  ;;  %v3177_v22 = vperm.slane %v15025_v16, 5  ;;  %v9243_v47 = vld [vmem:[%s15271_s7 + $0xcc8] sm:$0xf] }
 0x3b1   :  { %6109 = vmatmul.bf16.vlgmr.msra.gmra.mxu1 %v13298_v52  ;;  %v8376_v54 = vor.u32 %v9916_v44, %v8375_v28  ;;  %v15178_v9 = vpop.f32.mrf.mxu3  ;;  %v10133_v56 = vld [vmem:[%s15271_s7 + $0xce0] sm:$0xf0] }
 0x3b2   :  { %6153 = vmatpush.bf16.msrb.mxu1 %v8488_v10  ;;  %v5890_v35 = vadd.f32 %v15020_v12, %v5877_v57  ;;  %v8347_v12 = vld [vmem:[%s15271_s7 + $0x5c8] sm:$0xf]  ;;  %v9384_v10 = vor.u32 %v10168_v42, %v9383_v40  ;;  %v9244_v57 = vor.u32 %v10133_v56, %v9243_v47 }
 0x3b3   :  { %6174 = vmatmul.bf16.vlgmr.msrb.gmra.mxu2 %v12771_v41  ;;  %v8459_v41 = vld [vmem:[%s15271_s7 + $0x6a8] sm:$0xf]  ;;  %v8348_v32 = vor.u32 %v9909_v7, %v8347_v12  ;;  %v5943_v19 = vpop.f32.mrf.mxu0 }
 0x3b4   :  { %v8460_v55 = vor.u32 %v9937_v46, %v8459_v41  ;;  %6193 = vmatpush.bf16.msra.mxu0 %v9132_v49  ;;  %v5903_v25 = vadd.f32 %v5902_v63, %v5890_v35  ;;  %v9356_v41 = vor.u32 %v10161_v6, %v9355_v27  ;;  %v9327_v46 = vld [vmem:[%s15271_s7 + $0xd70] sm:$0xf]  ;;  %v9216_v35 = vor.u32 %v10126_v61, %v9215_v58  ;;  %v9187_v63 = vld [vmem:[%s15271_s7 + $0xc58] sm:$0xf] }
 0x3b5   :  { %v9328_v49 = vor.u32 %v10154_v4, %v9327_v46 }
 0x3b6   :  { %6154 = vmatpush.bf16.msrb.mxu1 %v8460_v55  ;;  %v15155_v62 = vpop.f32.mrf.mxu2  ;;  %10176 = vtanh.f32 %v5903_v25  ;;  %v5904_v0 = vpop.f32.mrf.mxu1  ;;  %v9299_v55 = vld [vmem:[%s15271_s7 + $0xd38] sm:$0xf] }
 0x3b8   :  { %6194 = vmatpush.bf16.msra.mxu0 %v9104_v18 }
 0x3b9   :  { %v5982_v59 = vpop.f32.mrf.mxu3 }
 0x3ba   :  { %6155 = vmatpush.bf16.msrb.mxu1 %v8432_v31 }
 0x3bc   :  { %6195 = vmatpush.bf16.msra.mxu0 %v9076_v53  ;;  %v10177_v5 = vpop.eup %10176 }
 0x3bd   :  { %6228 = vst [vmem:[#allocation2 + $0x18] sm:$0xff] %v10177_v5 }
 0x3be   :  { %6156 = vmatpush.bf16.msrb.mxu1 %v8404_v37  ;;  %v5969_v17 = vpop.f32.mrf.mxu2 }
 0x3c0   :  { %6196 = vmatpush.bf16.msra.mxu0 %v9048_v3  ;;  %v10119_v3 = vld [vmem:[%s15271_s7 + $0xc70] sm:$0xf0] }
 0x3c2   :  { %6157 = vmatpush.bf16.msrb.mxu1 %v8376_v54  ;;  %v9188_v54 = vor.u32 %v10119_v3, %v9187_v63 }
 0x3c4   :  { %6197 = vmatpush.bf16.msra.mxu0 %v9020_v8 }
 0x3c6   :  { %6158 = vmatpush.bf16.msrb.mxu1 %v8348_v32 }
 0x3c8   :  { %6198 = vmatpush.bf16.msra.mxu0 %v8992_v21 }
 0x3ca   :  { %6159 = vmatpush.bf16.msrb.mxu1 %v8320_v26 }
 0x3cc   :  { %6199 = vmatpush.bf16.msra.mxu0 %v8964_v23  ;;  %v5993_v20 = vpop.f32.mrf.mxu0 }
 0x3ce   :  { %6160 = vmatpush.bf16.msrb.mxu1 %v8292_v45 }
 0x3cf   :  { %6200 = vmatmul.bf16.vlgmr.msra.gmra.mxu0 %v13135_v2  ;;  %v10147_v2 = vld [vmem:[%s15271_s7 + $0xd50] sm:$0xf0]  ;;  %v5954_v18 = vpop.f32.mrf.mxu1 }
 0x3d0   :  { %v9300_v51 = vor.u32 %v10147_v2, %v9299_v55  ;;  %v5955_v1 = vadd.f32 %v5954_v18, %v5942_v36 }
 0x3d1   :  { %6161 = vmatmul.bf16.vlgmr.msrb.gmra.mxu1 %v12661_v34  ;;  %v10140_v34 = vld [vmem:[%s15271_s7 + $0xd18] sm:$0xf0]  ;;  %v6032_v43 = vpop.f32.mrf.mxu3  ;;  %s10213_s7 = smov [#allocation2]  }
 0x3d2   :  { %6205 = vmatpush.bf16.msra.mxu1 %v9384_v10  ;;  %v9272_v31 = vor.u32 %v10140_v34, %v9271_v50  ;;  %v5968_v12 = vadd.f32 %v15155_v62, %v5955_v1  ;;  %v3178_v62 = vperm.slane %v15025_v16, 6  ;;  %s6238_s29 = sshll.u32 %s10213_s7, 4  ;;  %s6239_s29 = int_to_ptr.vmem [resolvable:$true] %s6238_s29 }
 0x3d4   :  { %v5995_v28 = vpop.f32.mrf.mxu0  ;;  %v5981_v7 = vadd.f32 %v15178_v9, %v5968_v12 }
 0x3d6   :  { %6206 = vmatpush.bf16.msra.mxu1 %v9356_v41  ;;  %v6019_v24 = vpop.f32.mrf.mxu2  ;;  %v5994_v32 = vadd.f32 %v5993_v20, %v5981_v7 }
 0x3d7   :  { %v6020_v48 = vadd.f32 %v6019_v24, %v3177_v22  ;;  %v5956_v44 = vpop.f32.mrf.mxu1 }
 0x3d9   :  { %v6033_v53 = vadd.f32 %v6032_v43, %v6020_v48  ;;  %v6034_v25 = vpop.f32.mrf.mxu3 }
 0x3da   :  { %6207 = vmatpush.bf16.msra.mxu1 %v9328_v49 }
 0x3de   :  { %6208 = vmatpush.bf16.msra.mxu1 %v9300_v51  ;;  %v6021_v37 = vpop.f32.mrf.mxu2 }
 0x3e2   :  { %6209 = vmatpush.bf16.msra.mxu1 %v9272_v31 }
 0x3e6   :  { %6210 = vmatpush.bf16.msra.mxu1 %v9244_v57 }
 0x3ea   :  { %6211 = vmatpush.bf16.msra.mxu1 %v9216_v35 }
 0x3ec   :  { %v6045_v11 = vpop.f32.mrf.mxu0 }
 0x3ed   :  { %v6046_v42 = vadd.f32 %v6045_v11, %v6033_v53 }
 0x3ee   :  { %6212 = vmatpush.bf16.msra.mxu1 %v9188_v54  ;;  %v6006_v13 = vpop.f32.mrf.mxu1 }
 0x3ef   :  { %v6007_v17 = vadd.f32 %v6006_v13, %v5994_v32 }
 0x3f1   :  { %6213 = vmatmul.bf16.vlgmr.msra.gmra.mxu1 %v13298_v52  ;;  %10178 = vtanh.f32 %v6007_v17  ;;  %v6084_v15 = vpop.f32.mrf.mxu3 }
 0x3f4   :  { %v6047_v19 = vpop.f32.mrf.mxu0 }
 0x3f6   :  { %v6071_v8 = vpop.f32.mrf.mxu2  ;;  %v6008_v0 = vpop.f32.mrf.mxu1 }
 0x3f7   :  { %v10179_v21 = vpop.eup %10178 }
 0x3f8   :  { %6229 = vst [vmem:[#allocation2 + $0x20] sm:$0xff] %v10179_v21 }
 0x3f9   :  { %v6086_v60 = vpop.f32.mrf.mxu3 }
 0x3fe   :  { %v6073_v33 = vpop.f32.mrf.mxu2 }
 0x40c   :  { %v6097_v5 = vpop.f32.mrf.mxu0 }
 0x40e   :  { %v6058_v52 = vpop.f32.mrf.mxu1 }
 0x40f   :  { %v6059_v23 = vadd.f32 %v6058_v52, %v6046_v42 }
 0x411   :  { %v6136_v9 = vpop.f32.mrf.mxu3  ;;  %v6072_v59 = vadd.f32 %v6071_v8, %v6059_v23 }
 0x413   :  { %v6085_v45 = vadd.f32 %v6084_v15, %v6072_v59 }
 0x414   :  { %v6099_v38 = vpop.f32.mrf.mxu0 }
 0x415   :  { %v6098_v27 = vadd.f32 %v6097_v5, %v6085_v45 }
 0x416   :  { %v6123_v14 = vpop.f32.mrf.mxu2  ;;  %v6060_v39 = vpop.f32.mrf.mxu1 }
 0x417   :  { %v6124_v26 = vadd.f32 %v6123_v14, %v3178_v62 }
 0x419   :  { %v6137_v30 = vadd.f32 %v6136_v9, %v6124_v26  ;;  %v6138_v40 = vpop.f32.mrf.mxu3 }
 0x41e   :  { %v6125_v29 = vpop.f32.mrf.mxu2 }
 0x42c   :  { %v6149_v6 = vpop.f32.mrf.mxu0 }
 0x42d   :  { %v6150_v22 = vadd.f32 %v6149_v6, %v6137_v30 }
 0x42e   :  { %v6110_v41 = vpop.f32.mrf.mxu1 }
 0x42f   :  { %v6111_v46 = vadd.f32 %v6110_v41, %v6098_v27 }
 0x431   :  { %10180 = vtanh.f32 %v6111_v46  ;;  %v6188_v4 = vpop.f32.mrf.mxu3 }
 0x434   :  { %v6151_v49 = vpop.f32.mrf.mxu0 }
 0x436   :  { %v6175_v10 = vpop.f32.mrf.mxu2  ;;  %v6112_v55 = vpop.f32.mrf.mxu1 }
 0x437   :  { %v10181_v2 = vpop.eup %10180 }
 0x438   :  { %6230 = vst [vmem:[#allocation2 + $0x28] sm:$0xff] %v10181_v2 }
 0x439   :  { %v6190_v51 = vpop.f32.mrf.mxu3 }
 0x43e   :  { %v6177_v16 = vpop.f32.mrf.mxu2 }
 0x44c   :  { %v6201_v24 = vpop.f32.mrf.mxu0 }
 0x44e   :  { %v6162_v50 = vpop.f32.mrf.mxu1 }
 0x44f   :  { %v6163_v18 = vadd.f32 %v6162_v50, %v6150_v22 }
 0x451   :  { %v6176_v31 = vadd.f32 %v6175_v10, %v6163_v18 }
 0x453   :  { %v6189_v47 = vadd.f32 %v6188_v4, %v6176_v31 }
 0x454   :  { %v6203_v34 = vpop.f32.mrf.mxu0 }
 0x455   :  { %v6202_v56 = vadd.f32 %v6201_v24, %v6189_v47 }
 0x456   :  { %v6164_v20 = vpop.f32.mrf.mxu1 }
 0x46e   :  { %v6214_v48 = vpop.f32.mrf.mxu1 }
 0x46f   :  { %v6215_v43 = vadd.f32 %v6214_v48, %v6202_v56 }
 0x471   :  { %10182 = vtanh.f32 %v6215_v43 }
 0x476   :  { %v6216_v57 = vpop.f32.mrf.mxu1 }
 0x477   :  { %v10183_v53 = vpop.eup %10182 }
 0x478   :  { %6232 = vst.msk [vmem:[#allocation2 + $0x30] sm:$0xff] %vm6231_vm0, %v10183_v53 }
 0x479   :  { %6243 = dma.vmem_to_hbm [thread:$0]  %s6239_s29, 896, %s6241_s11, [#allocation3]  }
 0x47a   :  { %10211 = dma.done.wait [#allocation3], 896  }
 0x47b   :  { %10212 = vsyncadd [#allocation3], 4294966400 }
 0x47c   :  { %6248 = vsyncpa [#allocation3], 1 }

</bundles_post_ra>
